<compile_context>
chip_gen: v7x
topology: tpu7x:2x2x1
jax: 0.10.0
libtpu: 0.0.40
codegen_flags: <defaults>
</compile_context>

<pallas_src>
import numpy as np

import jax
import jax.numpy as jnp
from jax.experimental import pallas as pl
from jax.experimental.pallas import tpu as pltpu


# -----------------------------------------------------------------------------------
# Fused forward kernel (one grid step == one image)
# -----------------------------------------------------------------------------------
def _alexnet_kernel(x_ref,
                    w1e_ref, w1o_ref, b1_ref, s16e_ref, s16o_ref,
                    w2e_ref, w2o_ref, b2_ref, s7e_ref, s7o_ref,
                    w3_ref, b3_ref, w4_ref, b4_ref,
                    wf1_ref, bf1_ref, wf2_ref, bf2_ref, wf3_ref, bf3_ref,
                    o_ref):
    f32 = jnp.float32

    def mxu(a, b):
        # bf16 x bf16 matmul with f32 accumulation.
        return jnp.dot(a.astype(jnp.bfloat16), b.astype(jnp.bfloat16),
                       preferred_element_type=f32)

    def conv3x3(x, w_ref, rows_out):
        # 3x3 conv as 3 matmuls against per-tap-row block-Toeplitz matrices.
        acc = mxu(x[0:rows_out, :], w_ref[0])
        acc = acc + mxu(x[1:rows_out + 1, :], w_ref[1])
        acc = acc + mxu(x[2:rows_out + 2, :], w_ref[2])
        return acc

    x = x_ref[0]                                                   # (34, 34*Cin) f32

    # conv_1 (pad=1) + relu, fused with the W half of the 2x2/2 pool_1.
    e = conv3x3(x, w1e_ref, 32)                                    # even-w columns (32, 512)
    o = conv3x3(x, w1o_ref, 32)                                    # odd-w  columns (32, 512)
    yw = jnp.maximum(jnp.maximum(e, o) + b1_ref[...], 0.0)         # (32, 512)
    # H half of pool_1 via 0/1 row-selection matmuls.
    p = jnp.maximum(mxu(s16e_ref[...], yw), mxu(s16o_ref[...], yw))    # (16, 512)

    # conv_2 (pad=0) + relu, fused with the W half of pool_2.
    e = conv3x3(p, w2e_ref, 14)                                    # (14, 224)
    o = conv3x3(p, w2o_ref, 14)                                    # (14, 224)
    yw = jnp.maximum(jnp.maximum(e, o) + b2_ref[...], 0.0)         # (14, 224)
    # H half of pool_2; selection matrices carry one zero row on top/bottom,
    # which is exactly conv_3's zero padding in H.
    p = jnp.maximum(mxu(s7e_ref[...], yw), mxu(s7o_ref[...], yw))      # (9, 224)

    # conv_3 (pad=1; W padding folded into the Toeplitz weight) + relu.
    y = jnp.maximum(conv3x3(p, w3_ref, 7) + b3_ref[...], 0.0)      # (7, 448)

    # conv_4 (pad=0) + relu.
    z = jnp.maximum(conv3x3(y, w4_ref, 5) + b4_ref[...], 0.0)      # (5, 320)

    # pool_3: 3x3, stride 2 -> four (1, 64) corners (ph, pw).
    cols0 = jnp.maximum(jnp.maximum(z[:, 0:64], z[:, 64:128]), z[:, 128:192])       # pw=0
    cols1 = jnp.maximum(jnp.maximum(z[:, 128:192], z[:, 192:256]), z[:, 256:320])   # pw=1

    def rowmax3(m, r):
        return jnp.maximum(jnp.maximum(m[r:r + 1, :], m[r + 1:r + 2, :]),
                           m[r + 2:r + 3, :])

    p00 = rowmax3(cols0, 0)   # (ph=0, pw=0)
    p01 = rowmax3(cols1, 0)   # (ph=0, pw=1)
    p10 = rowmax3(cols0, 2)   # (ph=1, pw=0)
    p11 = rowmax3(cols1, 2)   # (ph=1, pw=1)

    # fc_1 + relu (PyTorch's NCHW flatten order is folded into the fc_1 weight blocks).
    h = (mxu(p00, wf1_ref[0]) + mxu(p01, wf1_ref[1]) +
         mxu(p10, wf1_ref[2]) + mxu(p11, wf1_ref[3]) + bf1_ref[...])
    h = jnp.maximum(h, 0.0)                                        # (1, 512)

    # fc_2 (no activation).
    h = mxu(h, wf2_ref[...]) + bf2_ref[...]                        # (1, 256)

    # fc_3 (output zero-padded to a full, lane-dense 128-wide store).
    out = mxu(h, wf3_ref[...]) + bf3_ref[...]                      # (1, 128)
    o_ref[0] = out.astype(o_ref.dtype)


# -----------------------------------------------------------------------------------
# Host-side weight repacking (pure numpy, done once outside jit)
# -----------------------------------------------------------------------------------
def _conv_tap_mats(w_oihw, ws_stored, w_out, p_eff, pool_split):
    """Per-tap-row (di) Toeplitz matrices for conv-as-matmul on (H, W*C) 2-D maps.

    Input columns are ws*Cin + ci.  Output columns: standard (wo*Cout + co) when
    pool_split=False; grouped [even wo | odd wo] (each half ordered (wo//2)*Cout + co)
    when pool_split=True so a following 2x2 pool's W direction is max of the two halves.
    p_eff=1 folds a zero W-padding of 1 into the weight (taps outside the map are dropped).
    """
    w = np.asarray(jax.device_get(w_oihw), np.float32)
    cout, cin, kh, kw = w.shape
    half = (w_out // 2) * cout
    t = np.zeros((kh, ws_stored * cin, w_out * cout), np.float32)
    for wo in range(w_out):
        base = ((wo % 2) * half + (wo // 2) * cout) if pool_split else wo * cout
        for di in range(kh):
            for dj in range(kw):
                ws = wo + dj - p_eff
                if 0 <= ws < ws_stored:
                    t[di, ws * cin:(ws + 1) * cin, base:base + cout] = w[:, :, di, dj].T
    return t


def _row_select(n_out, n_in, parity, pad_rows):
    """0/1 matrix selecting rows parity, parity+2, ... (optionally framed by zero rows)."""
    s = np.zeros((n_out + 2 * pad_rows, n_in), np.float32)
    for i in range(n_out):
        s[pad_rows + i, 2 * i + parity] = 1.0
    return s


def prepare_kernel_params(params, n_classes):
    """Repack PyTorch-layout parameters into kernel-ready matrices (bf16 matmul operands,
    f32 biases).  Done once on the host; the jitted forward only touches the result."""
    assert n_classes <= 128

    def host(a):
        return np.asarray(jax.device_get(a), np.float32)

    w1, b1 = host(params["w1"]), host(params["b1"])
    w2, b2 = host(params["w2"]), host(params["b2"])
    w3, b3 = host(params["w3"]), host(params["b3"])
    w4, b4 = host(params["w4"]), host(params["b4"])
    wf1, bf1 = host(params["wf1"]), host(params["bf1"])
    wf2, bf2 = host(params["wf2"]), host(params["bf2"])
    wf3, bf3 = host(params["wf3"]), host(params["bf3"])

    t1 = _conv_tap_mats(w1, ws_stored=34, w_out=32, p_eff=0, pool_split=True)   # (3, 34*Cin, 1024)
    t2 = _conv_tap_mats(w2, ws_stored=16, w_out=14, p_eff=0, pool_split=True)   # (3, 512, 448)
    t3 = _conv_tap_mats(w3, ws_stored=7,  w_out=7,  p_eff=1, pool_split=False)  # (3, 224, 448)
    t4 = _conv_tap_mats(w4, ws_stored=7,  w_out=5,  p_eff=0, pool_split=False)  # (3, 448, 320)

    # fc_1: fold PyTorch's NCHW flatten (feature index = c*4 + h*2 + w) into the weight.
    wf1k = np.zeros((4, 64, 512), np.float32)
    for h in range(2):
        for w in range(2):
            cols = np.arange(64) * 4 + h * 2 + w
            wf1k[h * 2 + w] = wf1[:, cols].T                       # (64, 512)

    # fc_3: pad the output dim to a full 128-lane store; the wrapper slices it back.
    wf3k = np.zeros((256, 128), np.float32)
    wf3k[:, :n_classes] = wf3.T
    bf3k = np.zeros((1, 128), np.float32)
    bf3k[0, :n_classes] = bf3

    bf16, f32 = jnp.bfloat16, jnp.float32
    return {
        "w1e": jnp.asarray(t1[:, :, :512], bf16),
        "w1o": jnp.asarray(t1[:, :, 512:], bf16),
        "b1":  jnp.asarray(np.tile(b1, 16)[None, :], f32),
        "s16e": jnp.asarray(_row_select(16, 32, 0, 0), bf16),
        "s16o": jnp.asarray(_row_select(16, 32, 1, 0), bf16),
        "w2e": jnp.asarray(t2[:, :, :224], bf16),
        "w2o": jnp.asarray(t2[:, :, 224:], bf16),
        "b2":  jnp.asarray(np.tile(b2, 7)[None, :], f32),
        "s7e": jnp.asarray(_row_select(7, 14, 0, 1), bf16),       # zero rows = conv_3 H-pad
        "s7o": jnp.asarray(_row_select(7, 14, 1, 1), bf16),
        "w3":  jnp.asarray(t3, bf16),
        "b3":  jnp.asarray(np.tile(b3, 7)[None, :], f32),
        "w4":  jnp.asarray(t4, bf16),
        "b4":  jnp.asarray(np.tile(b4, 5)[None, :], f32),
        "wf1": jnp.asarray(wf1k, bf16),
        "bf1": jnp.asarray(bf1[None, :], f32),
        "wf2": jnp.asarray(wf2.T, bf16),
        "bf2": jnp.asarray(bf2[None, :], f32),
        "wf3": jnp.asarray(wf3k, bf16),
        "bf3": jnp.asarray(bf3k, f32),
    }


_KP_ORDER = ("w1e", "w1o", "b1", "s16e", "s16o",
             "w2e", "w2o", "b2", "s7e", "s7o",
             "w3", "b3", "w4", "b4",
             "wf1", "bf1", "wf2", "bf2", "wf3", "bf3")


# -----------------------------------------------------------------------------------
# Public forward pass (mirrors AlexnetLight.forward)
# -----------------------------------------------------------------------------------
def alexnet_light_forward(x_nchw, kp, *, n_classes):
    B, C, H, W = x_nchw.shape
    assert H == 32 and W == 32, "AlexnetLight's fc_1 (256 features) requires 32x32 input"

    # Input prep (cheap, one pass): NCHW -> NHWC, zero-pad by 1, flatten to (H, W*C).
    x = jnp.transpose(x_nchw, (0, 2, 3, 1))
    x = jnp.pad(x, ((0, 0), (1, 1), (1, 1), (0, 0)))
    x = x.reshape(B, 34, 34 * C).astype(jnp.float32)

    def wspec(shape):
        nd = len(shape)
        return pl.BlockSpec(shape, lambda b, _nd=nd: (0,) * _nd)   # resident across grid

    in_specs = [pl.BlockSpec((1, 34, 34 * C), lambda b: (b, 0, 0))]
    in_specs += [wspec(tuple(kp[k].shape)) for k in _KP_ORDER]

    out = pl.pallas_call(
        _alexnet_kernel,
        out_shape=jax.ShapeDtypeStruct((B, 1, 128), jnp.float32),
        grid=(B,),
        in_specs=in_specs,
        out_specs=pl.BlockSpec((1, 1, 128), lambda b: (b, 0, 0)),
        compiler_params=pltpu.CompilerParams(
            dimension_semantics=("parallel",),            # both TCs on v7x, 1 image each
            vmem_limit_bytes=32 * 1024 * 1024,            # ~10 MiB actually used
        ),
    )(x, *[kp[k] for k in _KP_ORDER])

    return out[:, 0, :n_classes]


# -----------------------------------------------------------------------------------
# Deterministic, PyTorch-like parameter init (torch layouts)
# -----------------------------------------------------------------------------------
def init_params(key, n_classes, i_channel):
    def conv_p(k, cout, cin, ksz):
        kw, kb = jax.random.split(k)
        bound = 1.0 / np.sqrt(cin * ksz * ksz)
        w = jax.random.uniform(kw, (cout, cin, ksz, ksz), jnp.float32, -bound, bound)
        b = jax.random.uniform(kb, (cout,), jnp.float32, -bound, bound)
        return w, b

    def fc_p(k, nout, nin):
        kw, kb = jax.random.split(k)
        bound = 1.0 / np.sqrt(nin)
        w = jax.random.uniform(kw, (nout, nin), jnp.float32, -bound, bound)
        b = jax.random.uniform(kb, (nout,), jnp.float32, -bound, bound)
        return w, b

    keys = jax.random.split(key, 7)
    p = {}
    p["w1"], p["b1"] = conv_p(keys[0], 32, i_channel, 3)
    p["w2"], p["b2"] = conv_p(keys[1], 32, 32, 3)
    p["w3"], p["b3"] = conv_p(keys[2], 64, 32, 3)
    p["w4"], p["b4"] = conv_p(keys[3], 64, 64, 3)
    p["wf1"], p["bf1"] = fc_p(keys[4], 512, 256)   # i_dense_dim = 256
    p["wf2"], p["bf2"] = fc_p(keys[5], 256, 512)
    p["wf3"], p["bf3"] = fc_p(keys[6], n_classes, 256)
    return p


if __name__ == "__main__":
    n_classes, i_channel = 10, 3
    key = jax.random.PRNGKey(0)
    k_params, k_x = jax.random.split(key)

    params = init_params(k_params, n_classes, i_channel)
    kparams = prepare_kernel_params(params, n_classes)

    # 32x32 spatial is required so the flatten yields 256 features (i_dense_dim).
    x = jax.random.normal(k_x, (2, i_channel, 32, 32), jnp.float32)

    fwd = jax.jit(alexnet_light_forward, static_argnames=("n_classes",))
    out = fwd(x, kparams, n_classes=n_classes)
    out = jax.block_until_ready(out)

    assert out.shape == (2, n_classes), out.shape
    assert bool(jnp.all(jnp.isfinite(out)))
    print("KERNEL_OK")
</pallas_src>

<mosaic_0001>
module attributes {stable_mosaic.version = 11 : i64} {
  func.func @_alexnet_kernel(%arg0: i32, %arg1: memref<1x34x102xf32, #tpu.memory_space<vmem>>, %arg2: memref<3x102x512xbf16, #tpu.memory_space<vmem>>, %arg3: memref<3x102x512xbf16, #tpu.memory_space<vmem>>, %arg4: memref<1x512xf32, #tpu.memory_space<vmem>>, %arg5: memref<16x32xbf16, #tpu.memory_space<vmem>>, %arg6: memref<16x32xbf16, #tpu.memory_space<vmem>>, %arg7: memref<3x512x224xbf16, #tpu.memory_space<vmem>>, %arg8: memref<3x512x224xbf16, #tpu.memory_space<vmem>>, %arg9: memref<1x224xf32, #tpu.memory_space<vmem>>, %arg10: memref<9x14xbf16, #tpu.memory_space<vmem>>, %arg11: memref<9x14xbf16, #tpu.memory_space<vmem>>, %arg12: memref<3x224x448xbf16, #tpu.memory_space<vmem>>, %arg13: memref<1x448xf32, #tpu.memory_space<vmem>>, %arg14: memref<3x448x320xbf16, #tpu.memory_space<vmem>>, %arg15: memref<1x320xf32, #tpu.memory_space<vmem>>, %arg16: memref<4x64x512xbf16, #tpu.memory_space<vmem>>, %arg17: memref<1x512xf32, #tpu.memory_space<vmem>>, %arg18: memref<512x256xbf16, #tpu.memory_space<vmem>>, %arg19: memref<1x256xf32, #tpu.memory_space<vmem>>, %arg20: memref<256x128xbf16, #tpu.memory_space<vmem>>, %arg21: memref<1x128xf32, #tpu.memory_space<vmem>>, %arg22: memref<1x1x128xf32, #tpu.memory_space<vmem>>) attributes {dimension_semantics = [#tpu.dimension_semantics<parallel>], iteration_bounds = array<i64: 2>, scalar_prefetch = 0 : i64, scratch_operands = 0 : i64, tpu.core_type = #tpu.core_type<tc>, window_params = [{transform_indices = @transform_0, window_bounds = array<i64: 1, 34, 102>}, {pipeline_mode = #tpu.pipeline_mode<synchronous>, transform_indices = @transform_1, window_bounds = array<i64: 3, 102, 512>}, {pipeline_mode = #tpu.pipeline_mode<synchronous>, transform_indices = @transform_2, window_bounds = array<i64: 3, 102, 512>}, {pipeline_mode = #tpu.pipeline_mode<synchronous>, transform_indices = @transform_3, window_bounds = array<i64: 1, 512>}, {pipeline_mode = #tpu.pipeline_mode<synchronous>, transform_indices = @transform_4, window_bounds = array<i64: 16, 32>}, {pipeline_mode = #tpu.pipeline_mode<synchronous>, transform_indices = @transform_5, window_bounds = array<i64: 16, 32>}, {pipeline_mode = #tpu.pipeline_mode<synchronous>, transform_indices = @transform_6, window_bounds = array<i64: 3, 512, 224>}, {pipeline_mode = #tpu.pipeline_mode<synchronous>, transform_indices = @transform_7, window_bounds = array<i64: 3, 512, 224>}, {pipeline_mode = #tpu.pipeline_mode<synchronous>, transform_indices = @transform_8, window_bounds = array<i64: 1, 224>}, {pipeline_mode = #tpu.pipeline_mode<synchronous>, transform_indices = @transform_9, window_bounds = array<i64: 9, 14>}, {pipeline_mode = #tpu.pipeline_mode<synchronous>, transform_indices = @transform_10, window_bounds = array<i64: 9, 14>}, {pipeline_mode = #tpu.pipeline_mode<synchronous>, transform_indices = @transform_11, window_bounds = array<i64: 3, 224, 448>}, {pipeline_mode = #tpu.pipeline_mode<synchronous>, transform_indices = @transform_12, window_bounds = array<i64: 1, 448>}, {pipeline_mode = #tpu.pipeline_mode<synchronous>, transform_indices = @transform_13, window_bounds = array<i64: 3, 448, 320>}, {pipeline_mode = #tpu.pipeline_mode<synchronous>, transform_indices = @transform_14, window_bounds = array<i64: 1, 320>}, {pipeline_mode = #tpu.pipeline_mode<synchronous>, transform_indices = @transform_15, window_bounds = array<i64: 4, 64, 512>}, {pipeline_mode = #tpu.pipeline_mode<synchronous>, transform_indices = @transform_16, window_bounds = array<i64: 1, 512>}, {pipeline_mode = #tpu.pipeline_mode<synchronous>, transform_indices = @transform_17, window_bounds = array<i64: 512, 256>}, {pipeline_mode = #tpu.pipeline_mode<synchronous>, transform_indices = @transform_18, window_bounds = array<i64: 1, 256>}, {pipeline_mode = #tpu.pipeline_mode<synchronous>, transform_indices = @transform_19, window_bounds = array<i64: 256, 128>}, {pipeline_mode = #tpu.pipeline_mode<synchronous>, transform_indices = @transform_20, window_bounds = array<i64: 1, 128>}, {transform_indices = @transform_21, window_bounds = array<i64: 1, 1, 128>}]} {
    %c0 = arith.constant 0 : index
    %c0_0 = arith.constant 0 : index
    %c0_1 = arith.constant 0 : index
    %0 = vector.load %arg1[%c0, %c0_0, %c0_1] : memref<1x34x102xf32, #tpu.memory_space<vmem>>, vector<1x34x102xf32>
    %1 = vector.shape_cast %0 : vector<1x34x102xf32> to vector<34x102xf32>
    %2 = vector.extract_strided_slice %1 {offsets = [0, 0], sizes = [32, 102], strides = [1, 1]} : vector<34x102xf32> to vector<32x102xf32>
    %c0_2 = arith.constant 0 : index
    %c0_3 = arith.constant 0 : index
    %c0_4 = arith.constant 0 : index
    %3 = vector.load %arg2[%c0_2, %c0_3, %c0_4] : memref<3x102x512xbf16, #tpu.memory_space<vmem>>, vector<1x102x512xbf16>
    %4 = vector.shape_cast %3 : vector<1x102x512xbf16> to vector<102x512xbf16>
    %5 = arith.truncf %2 : vector<32x102xf32> to vector<32x102xbf16>
    %cst = arith.constant dense<0.000000e+00> : vector<32x512xf32>
    %6 = tpu.matmul %5, %4, %cst {dimension_numbers = #tpu.dot_dimension_numbers<[1], [0], [0], [1], [0, 0, 1, 1], [], []>} : vector<32x102xbf16>, vector<102x512xbf16>, vector<32x512xf32> -> vector<32x512xf32>
    %7 = vector.extract_strided_slice %1 {offsets = [1, 0], sizes = [32, 102], strides = [1, 1]} : vector<34x102xf32> to vector<32x102xf32>
    %c1 = arith.constant 1 : index
    %c0_5 = arith.constant 0 : index
    %c0_6 = arith.constant 0 : index
    %8 = vector.load %arg2[%c1, %c0_5, %c0_6] : memref<3x102x512xbf16, #tpu.memory_space<vmem>>, vector<1x102x512xbf16>
    %9 = vector.shape_cast %8 : vector<1x102x512xbf16> to vector<102x512xbf16>
    %10 = arith.truncf %7 : vector<32x102xf32> to vector<32x102xbf16>
    %cst_7 = arith.constant dense<0.000000e+00> : vector<32x512xf32>
    %11 = tpu.matmul %10, %9, %cst_7 {dimension_numbers = #tpu.dot_dimension_numbers<[1], [0], [0], [1], [0, 0, 1, 1], [], []>} : vector<32x102xbf16>, vector<102x512xbf16>, vector<32x512xf32> -> vector<32x512xf32>
    %12 = arith.addf %6, %11 : vector<32x512xf32>
    %13 = vector.extract_strided_slice %1 {offsets = [2, 0], sizes = [32, 102], strides = [1, 1]} : vector<34x102xf32> to vector<32x102xf32>
    %c2 = arith.constant 2 : index
    %c0_8 = arith.constant 0 : index
    %c0_9 = arith.constant 0 : index
    %14 = vector.load %arg2[%c2, %c0_8, %c0_9] : memref<3x102x512xbf16, #tpu.memory_space<vmem>>, vector<1x102x512xbf16>
    %15 = vector.shape_cast %14 : vector<1x102x512xbf16> to vector<102x512xbf16>
    %16 = arith.truncf %13 : vector<32x102xf32> to vector<32x102xbf16>
    %cst_10 = arith.constant dense<0.000000e+00> : vector<32x512xf32>
    %17 = tpu.matmul %16, %15, %cst_10 {dimension_numbers = #tpu.dot_dimension_numbers<[1], [0], [0], [1], [0, 0, 1, 1], [], []>} : vector<32x102xbf16>, vector<102x512xbf16>, vector<32x512xf32> -> vector<32x512xf32>
    %18 = arith.addf %12, %17 : vector<32x512xf32>
    %19 = vector.extract_strided_slice %1 {offsets = [0, 0], sizes = [32, 102], strides = [1, 1]} : vector<34x102xf32> to vector<32x102xf32>
    %c0_11 = arith.constant 0 : index
    %c0_12 = arith.constant 0 : index
    %c0_13 = arith.constant 0 : index
    %20 = vector.load %arg3[%c0_11, %c0_12, %c0_13] : memref<3x102x512xbf16, #tpu.memory_space<vmem>>, vector<1x102x512xbf16>
    %21 = vector.shape_cast %20 : vector<1x102x512xbf16> to vector<102x512xbf16>
    %22 = arith.truncf %19 : vector<32x102xf32> to vector<32x102xbf16>
    %cst_14 = arith.constant dense<0.000000e+00> : vector<32x512xf32>
    %23 = tpu.matmul %22, %21, %cst_14 {dimension_numbers = #tpu.dot_dimension_numbers<[1], [0], [0], [1], [0, 0, 1, 1], [], []>} : vector<32x102xbf16>, vector<102x512xbf16>, vector<32x512xf32> -> vector<32x512xf32>
    %24 = vector.extract_strided_slice %1 {offsets = [1, 0], sizes = [32, 102], strides = [1, 1]} : vector<34x102xf32> to vector<32x102xf32>
    %c1_15 = arith.constant 1 : index
    %c0_16 = arith.constant 0 : index
    %c0_17 = arith.constant 0 : index
    %25 = vector.load %arg3[%c1_15, %c0_16, %c0_17] : memref<3x102x512xbf16, #tpu.memory_space<vmem>>, vector<1x102x512xbf16>
    %26 = vector.shape_cast %25 : vector<1x102x512xbf16> to vector<102x512xbf16>
    %27 = arith.truncf %24 : vector<32x102xf32> to vector<32x102xbf16>
    %cst_18 = arith.constant dense<0.000000e+00> : vector<32x512xf32>
    %28 = tpu.matmul %27, %26, %cst_18 {dimension_numbers = #tpu.dot_dimension_numbers<[1], [0], [0], [1], [0, 0, 1, 1], [], []>} : vector<32x102xbf16>, vector<102x512xbf16>, vector<32x512xf32> -> vector<32x512xf32>
    %29 = arith.addf %23, %28 : vector<32x512xf32>
    %30 = vector.extract_strided_slice %1 {offsets = [2, 0], sizes = [32, 102], strides = [1, 1]} : vector<34x102xf32> to vector<32x102xf32>
    %c2_19 = arith.constant 2 : index
    %c0_20 = arith.constant 0 : index
    %c0_21 = arith.constant 0 : index
    %31 = vector.load %arg3[%c2_19, %c0_20, %c0_21] : memref<3x102x512xbf16, #tpu.memory_space<vmem>>, vector<1x102x512xbf16>
    %32 = vector.shape_cast %31 : vector<1x102x512xbf16> to vector<102x512xbf16>
    %33 = arith.truncf %30 : vector<32x102xf32> to vector<32x102xbf16>
    %cst_22 = arith.constant dense<0.000000e+00> : vector<32x512xf32>
    %34 = tpu.matmul %33, %32, %cst_22 {dimension_numbers = #tpu.dot_dimension_numbers<[1], [0], [0], [1], [0, 0, 1, 1], [], []>} : vector<32x102xbf16>, vector<102x512xbf16>, vector<32x512xf32> -> vector<32x512xf32>
    %35 = arith.addf %29, %34 : vector<32x512xf32>
    %36 = arith.maximumf %18, %35 : vector<32x512xf32>
    %c0_23 = arith.constant 0 : index
    %c0_24 = arith.constant 0 : index
    %37 = vector.load %arg4[%c0_23, %c0_24] : memref<1x512xf32, #tpu.memory_space<vmem>>, vector<1x512xf32>
    %38 = vector.broadcast %37 : vector<1x512xf32> to vector<32x512xf32>
    %39 = arith.addf %36, %38 : vector<32x512xf32>
    %cst_25 = arith.constant 0.000000e+00 : f32
    %40 = vector.broadcast %cst_25 : f32 to vector<32x512xf32>
    %41 = arith.maximumf %39, %40 : vector<32x512xf32>
    %c0_26 = arith.constant 0 : index
    %c0_27 = arith.constant 0 : index
    %42 = vector.load %arg5[%c0_26, %c0_27] : memref<16x32xbf16, #tpu.memory_space<vmem>>, vector<16x32xbf16>
    %43 = arith.truncf %41 : vector<32x512xf32> to vector<32x512xbf16>
    %cst_28 = arith.constant dense<0.000000e+00> : vector<16x512xf32>
    %44 = tpu.matmul %42, %43, %cst_28 {dimension_numbers = #tpu.dot_dimension_numbers<[1], [0], [0], [1], [0, 0, 1, 1], [], []>} : vector<16x32xbf16>, vector<32x512xbf16>, vector<16x512xf32> -> vector<16x512xf32>
    %c0_29 = arith.constant 0 : index
    %c0_30 = arith.constant 0 : index
    %45 = vector.load %arg6[%c0_29, %c0_30] : memref<16x32xbf16, #tpu.memory_space<vmem>>, vector<16x32xbf16>
    %46 = arith.truncf %41 : vector<32x512xf32> to vector<32x512xbf16>
    %cst_31 = arith.constant dense<0.000000e+00> : vector<16x512xf32>
    %47 = tpu.matmul %45, %46, %cst_31 {dimension_numbers = #tpu.dot_dimension_numbers<[1], [0], [0], [1], [0, 0, 1, 1], [], []>} : vector<16x32xbf16>, vector<32x512xbf16>, vector<16x512xf32> -> vector<16x512xf32>
    %48 = arith.maximumf %44, %47 : vector<16x512xf32>
    %49 = vector.extract_strided_slice %48 {offsets = [0, 0], sizes = [14, 512], strides = [1, 1]} : vector<16x512xf32> to vector<14x512xf32>
    %c0_32 = arith.constant 0 : index
    %c0_33 = arith.constant 0 : index
    %c0_34 = arith.constant 0 : index
    %50 = vector.load %arg7[%c0_32, %c0_33, %c0_34] : memref<3x512x224xbf16, #tpu.memory_space<vmem>>, vector<1x512x224xbf16>
    %51 = vector.shape_cast %50 : vector<1x512x224xbf16> to vector<512x224xbf16>
    %52 = arith.truncf %49 : vector<14x512xf32> to vector<14x512xbf16>
    %cst_35 = arith.constant dense<0.000000e+00> : vector<14x224xf32>
    %53 = tpu.matmul %52, %51, %cst_35 {dimension_numbers = #tpu.dot_dimension_numbers<[1], [0], [0], [1], [0, 0, 1, 1], [], []>} : vector<14x512xbf16>, vector<512x224xbf16>, vector<14x224xf32> -> vector<14x224xf32>
    %54 = vector.extract_strided_slice %48 {offsets = [1, 0], sizes = [14, 512], strides = [1, 1]} : vector<16x512xf32> to vector<14x512xf32>
    %c1_36 = arith.constant 1 : index
    %c0_37 = arith.constant 0 : index
    %c0_38 = arith.constant 0 : index
    %55 = vector.load %arg7[%c1_36, %c0_37, %c0_38] : memref<3x512x224xbf16, #tpu.memory_space<vmem>>, vector<1x512x224xbf16>
    %56 = vector.shape_cast %55 : vector<1x512x224xbf16> to vector<512x224xbf16>
    %57 = arith.truncf %54 : vector<14x512xf32> to vector<14x512xbf16>
    %cst_39 = arith.constant dense<0.000000e+00> : vector<14x224xf32>
    %58 = tpu.matmul %57, %56, %cst_39 {dimension_numbers = #tpu.dot_dimension_numbers<[1], [0], [0], [1], [0, 0, 1, 1], [], []>} : vector<14x512xbf16>, vector<512x224xbf16>, vector<14x224xf32> -> vector<14x224xf32>
    %59 = arith.addf %53, %58 : vector<14x224xf32>
    %60 = vector.extract_strided_slice %48 {offsets = [2, 0], sizes = [14, 512], strides = [1, 1]} : vector<16x512xf32> to vector<14x512xf32>
    %c2_40 = arith.constant 2 : index
    %c0_41 = arith.constant 0 : index
    %c0_42 = arith.constant 0 : index
    %61 = vector.load %arg7[%c2_40, %c0_41, %c0_42] : memref<3x512x224xbf16, #tpu.memory_space<vmem>>, vector<1x512x224xbf16>
    %62 = vector.shape_cast %61 : vector<1x512x224xbf16> to vector<512x224xbf16>
    %63 = arith.truncf %60 : vector<14x512xf32> to vector<14x512xbf16>
    %cst_43 = arith.constant dense<0.000000e+00> : vector<14x224xf32>
    %64 = tpu.matmul %63, %62, %cst_43 {dimension_numbers = #tpu.dot_dimension_numbers<[1], [0], [0], [1], [0, 0, 1, 1], [], []>} : vector<14x512xbf16>, vector<512x224xbf16>, vector<14x224xf32> -> vector<14x224xf32>
    %65 = arith.addf %59, %64 : vector<14x224xf32>
    %66 = vector.extract_strided_slice %48 {offsets = [0, 0], sizes = [14, 512], strides = [1, 1]} : vector<16x512xf32> to vector<14x512xf32>
    %c0_44 = arith.constant 0 : index
    %c0_45 = arith.constant 0 : index
    %c0_46 = arith.constant 0 : index
    %67 = vector.load %arg8[%c0_44, %c0_45, %c0_46] : memref<3x512x224xbf16, #tpu.memory_space<vmem>>, vector<1x512x224xbf16>
    %68 = vector.shape_cast %67 : vector<1x512x224xbf16> to vector<512x224xbf16>
    %69 = arith.truncf %66 : vector<14x512xf32> to vector<14x512xbf16>
    %cst_47 = arith.constant dense<0.000000e+00> : vector<14x224xf32>
    %70 = tpu.matmul %69, %68, %cst_47 {dimension_numbers = #tpu.dot_dimension_numbers<[1], [0], [0], [1], [0, 0, 1, 1], [], []>} : vector<14x512xbf16>, vector<512x224xbf16>, vector<14x224xf32> -> vector<14x224xf32>
    %71 = vector.extract_strided_slice %48 {offsets = [1, 0], sizes = [14, 512], strides = [1, 1]} : vector<16x512xf32> to vector<14x512xf32>
    %c1_48 = arith.constant 1 : index
    %c0_49 = arith.constant 0 : index
    %c0_50 = arith.constant 0 : index
    %72 = vector.load %arg8[%c1_48, %c0_49, %c0_50] : memref<3x512x224xbf16, #tpu.memory_space<vmem>>, vector<1x512x224xbf16>
    %73 = vector.shape_cast %72 : vector<1x512x224xbf16> to vector<512x224xbf16>
    %74 = arith.truncf %71 : vector<14x512xf32> to vector<14x512xbf16>
    %cst_51 = arith.constant dense<0.000000e+00> : vector<14x224xf32>
    %75 = tpu.matmul %74, %73, %cst_51 {dimension_numbers = #tpu.dot_dimension_numbers<[1], [0], [0], [1], [0, 0, 1, 1], [], []>} : vector<14x512xbf16>, vector<512x224xbf16>, vector<14x224xf32> -> vector<14x224xf32>
    %76 = arith.addf %70, %75 : vector<14x224xf32>
    %77 = vector.extract_strided_slice %48 {offsets = [2, 0], sizes = [14, 512], strides = [1, 1]} : vector<16x512xf32> to vector<14x512xf32>
    %c2_52 = arith.constant 2 : index
    %c0_53 = arith.constant 0 : index
    %c0_54 = arith.constant 0 : index
    %78 = vector.load %arg8[%c2_52, %c0_53, %c0_54] : memref<3x512x224xbf16, #tpu.memory_space<vmem>>, vector<1x512x224xbf16>
    %79 = vector.shape_cast %78 : vector<1x512x224xbf16> to vector<512x224xbf16>
    %80 = arith.truncf %77 : vector<14x512xf32> to vector<14x512xbf16>
    %cst_55 = arith.constant dense<0.000000e+00> : vector<14x224xf32>
    %81 = tpu.matmul %80, %79, %cst_55 {dimension_numbers = #tpu.dot_dimension_numbers<[1], [0], [0], [1], [0, 0, 1, 1], [], []>} : vector<14x512xbf16>, vector<512x224xbf16>, vector<14x224xf32> -> vector<14x224xf32>
    %82 = arith.addf %76, %81 : vector<14x224xf32>
    %83 = arith.maximumf %65, %82 : vector<14x224xf32>
    %c0_56 = arith.constant 0 : index
    %c0_57 = arith.constant 0 : index
    %84 = vector.load %arg9[%c0_56, %c0_57] : memref<1x224xf32, #tpu.memory_space<vmem>>, vector<1x224xf32>
    %85 = vector.broadcast %84 : vector<1x224xf32> to vector<14x224xf32>
    %86 = arith.addf %83, %85 : vector<14x224xf32>
    %cst_58 = arith.constant 0.000000e+00 : f32
    %87 = vector.broadcast %cst_58 : f32 to vector<14x224xf32>
    %88 = arith.maximumf %86, %87 : vector<14x224xf32>
    %c0_59 = arith.constant 0 : index
    %c0_60 = arith.constant 0 : index
    %89 = vector.load %arg10[%c0_59, %c0_60] : memref<9x14xbf16, #tpu.memory_space<vmem>>, vector<9x14xbf16>
    %90 = arith.truncf %88 : vector<14x224xf32> to vector<14x224xbf16>
    %cst_61 = arith.constant dense<0.000000e+00> : vector<9x224xf32>
    %91 = tpu.matmul %89, %90, %cst_61 {dimension_numbers = #tpu.dot_dimension_numbers<[1], [0], [0], [1], [0, 0, 1, 1], [], []>} : vector<9x14xbf16>, vector<14x224xbf16>, vector<9x224xf32> -> vector<9x224xf32>
    %c0_62 = arith.constant 0 : index
    %c0_63 = arith.constant 0 : index
    %92 = vector.load %arg11[%c0_62, %c0_63] : memref<9x14xbf16, #tpu.memory_space<vmem>>, vector<9x14xbf16>
    %93 = arith.truncf %88 : vector<14x224xf32> to vector<14x224xbf16>
    %cst_64 = arith.constant dense<0.000000e+00> : vector<9x224xf32>
    %94 = tpu.matmul %92, %93, %cst_64 {dimension_numbers = #tpu.dot_dimension_numbers<[1], [0], [0], [1], [0, 0, 1, 1], [], []>} : vector<9x14xbf16>, vector<14x224xbf16>, vector<9x224xf32> -> vector<9x224xf32>
    %95 = arith.maximumf %91, %94 : vector<9x224xf32>
    %96 = vector.extract_strided_slice %95 {offsets = [0, 0], sizes = [7, 224], strides = [1, 1]} : vector<9x224xf32> to vector<7x224xf32>
    %c0_65 = arith.constant 0 : index
    %c0_66 = arith.constant 0 : index
    %c0_67 = arith.constant 0 : index
    %97 = vector.load %arg12[%c0_65, %c0_66, %c0_67] : memref<3x224x448xbf16, #tpu.memory_space<vmem>>, vector<1x224x448xbf16>
    %98 = vector.shape_cast %97 : vector<1x224x448xbf16> to vector<224x448xbf16>
    %99 = arith.truncf %96 : vector<7x224xf32> to vector<7x224xbf16>
    %cst_68 = arith.constant dense<0.000000e+00> : vector<7x448xf32>
    %100 = tpu.matmul %99, %98, %cst_68 {dimension_numbers = #tpu.dot_dimension_numbers<[1], [0], [0], [1], [0, 0, 1, 1], [], []>} : vector<7x224xbf16>, vector<224x448xbf16>, vector<7x448xf32> -> vector<7x448xf32>
    %101 = vector.extract_strided_slice %95 {offsets = [1, 0], sizes = [7, 224], strides = [1, 1]} : vector<9x224xf32> to vector<7x224xf32>
    %c1_69 = arith.constant 1 : index
    %c0_70 = arith.constant 0 : index
    %c0_71 = arith.constant 0 : index
    %102 = vector.load %arg12[%c1_69, %c0_70, %c0_71] : memref<3x224x448xbf16, #tpu.memory_space<vmem>>, vector<1x224x448xbf16>
    %103 = vector.shape_cast %102 : vector<1x224x448xbf16> to vector<224x448xbf16>
    %104 = arith.truncf %101 : vector<7x224xf32> to vector<7x224xbf16>
    %cst_72 = arith.constant dense<0.000000e+00> : vector<7x448xf32>
    %105 = tpu.matmul %104, %103, %cst_72 {dimension_numbers = #tpu.dot_dimension_numbers<[1], [0], [0], [1], [0, 0, 1, 1], [], []>} : vector<7x224xbf16>, vector<224x448xbf16>, vector<7x448xf32> -> vector<7x448xf32>
    %106 = arith.addf %100, %105 : vector<7x448xf32>
    %107 = vector.extract_strided_slice %95 {offsets = [2, 0], sizes = [7, 224], strides = [1, 1]} : vector<9x224xf32> to vector<7x224xf32>
    %c2_73 = arith.constant 2 : index
    %c0_74 = arith.constant 0 : index
    %c0_75 = arith.constant 0 : index
    %108 = vector.load %arg12[%c2_73, %c0_74, %c0_75] : memref<3x224x448xbf16, #tpu.memory_space<vmem>>, vector<1x224x448xbf16>
    %109 = vector.shape_cast %108 : vector<1x224x448xbf16> to vector<224x448xbf16>
    %110 = arith.truncf %107 : vector<7x224xf32> to vector<7x224xbf16>
    %cst_76 = arith.constant dense<0.000000e+00> : vector<7x448xf32>
    %111 = tpu.matmul %110, %109, %cst_76 {dimension_numbers = #tpu.dot_dimension_numbers<[1], [0], [0], [1], [0, 0, 1, 1], [], []>} : vector<7x224xbf16>, vector<224x448xbf16>, vector<7x448xf32> -> vector<7x448xf32>
    %112 = arith.addf %106, %111 : vector<7x448xf32>
    %c0_77 = arith.constant 0 : index
    %c0_78 = arith.constant 0 : index
    %113 = vector.load %arg13[%c0_77, %c0_78] : memref<1x448xf32, #tpu.memory_space<vmem>>, vector<1x448xf32>
    %114 = vector.broadcast %113 : vector<1x448xf32> to vector<7x448xf32>
    %115 = arith.addf %112, %114 : vector<7x448xf32>
    %cst_79 = arith.constant 0.000000e+00 : f32
    %116 = vector.broadcast %cst_79 : f32 to vector<7x448xf32>
    %117 = arith.maximumf %115, %116 : vector<7x448xf32>
    %118 = vector.extract_strided_slice %117 {offsets = [0, 0], sizes = [5, 448], strides = [1, 1]} : vector<7x448xf32> to vector<5x448xf32>
    %c0_80 = arith.constant 0 : index
    %c0_81 = arith.constant 0 : index
    %c0_82 = arith.constant 0 : index
    %119 = vector.load %arg14[%c0_80, %c0_81, %c0_82] : memref<3x448x320xbf16, #tpu.memory_space<vmem>>, vector<1x448x320xbf16>
    %120 = vector.shape_cast %119 : vector<1x448x320xbf16> to vector<448x320xbf16>
    %121 = arith.truncf %118 : vector<5x448xf32> to vector<5x448xbf16>
    %cst_83 = arith.constant dense<0.000000e+00> : vector<5x320xf32>
    %122 = tpu.matmul %121, %120, %cst_83 {dimension_numbers = #tpu.dot_dimension_numbers<[1], [0], [0], [1], [0, 0, 1, 1], [], []>} : vector<5x448xbf16>, vector<448x320xbf16>, vector<5x320xf32> -> vector<5x320xf32>
    %123 = vector.extract_strided_slice %117 {offsets = [1, 0], sizes = [5, 448], strides = [1, 1]} : vector<7x448xf32> to vector<5x448xf32>
    %c1_84 = arith.constant 1 : index
    %c0_85 = arith.constant 0 : index
    %c0_86 = arith.constant 0 : index
    %124 = vector.load %arg14[%c1_84, %c0_85, %c0_86] : memref<3x448x320xbf16, #tpu.memory_space<vmem>>, vector<1x448x320xbf16>
    %125 = vector.shape_cast %124 : vector<1x448x320xbf16> to vector<448x320xbf16>
    %126 = arith.truncf %123 : vector<5x448xf32> to vector<5x448xbf16>
    %cst_87 = arith.constant dense<0.000000e+00> : vector<5x320xf32>
    %127 = tpu.matmul %126, %125, %cst_87 {dimension_numbers = #tpu.dot_dimension_numbers<[1], [0], [0], [1], [0, 0, 1, 1], [], []>} : vector<5x448xbf16>, vector<448x320xbf16>, vector<5x320xf32> -> vector<5x320xf32>
    %128 = arith.addf %122, %127 : vector<5x320xf32>
    %129 = vector.extract_strided_slice %117 {offsets = [2, 0], sizes = [5, 448], strides = [1, 1]} : vector<7x448xf32> to vector<5x448xf32>
    %c2_88 = arith.constant 2 : index
    %c0_89 = arith.constant 0 : index
    %c0_90 = arith.constant 0 : index
    %130 = vector.load %arg14[%c2_88, %c0_89, %c0_90] : memref<3x448x320xbf16, #tpu.memory_space<vmem>>, vector<1x448x320xbf16>
    %131 = vector.shape_cast %130 : vector<1x448x320xbf16> to vector<448x320xbf16>
    %132 = arith.truncf %129 : vector<5x448xf32> to vector<5x448xbf16>
    %cst_91 = arith.constant dense<0.000000e+00> : vector<5x320xf32>
    %133 = tpu.matmul %132, %131, %cst_91 {dimension_numbers = #tpu.dot_dimension_numbers<[1], [0], [0], [1], [0, 0, 1, 1], [], []>} : vector<5x448xbf16>, vector<448x320xbf16>, vector<5x320xf32> -> vector<5x320xf32>
    %134 = arith.addf %128, %133 : vector<5x320xf32>
    %c0_92 = arith.constant 0 : index
    %c0_93 = arith.constant 0 : index
    %135 = vector.load %arg15[%c0_92, %c0_93] : memref<1x320xf32, #tpu.memory_space<vmem>>, vector<1x320xf32>
    %136 = vector.broadcast %135 : vector<1x320xf32> to vector<5x320xf32>
    %137 = arith.addf %134, %136 : vector<5x320xf32>
    %cst_94 = arith.constant 0.000000e+00 : f32
    %138 = vector.broadcast %cst_94 : f32 to vector<5x320xf32>
    %139 = arith.maximumf %137, %138 : vector<5x320xf32>
    %140 = vector.extract_strided_slice %139 {offsets = [0, 0], sizes = [5, 64], strides = [1, 1]} : vector<5x320xf32> to vector<5x64xf32>
    %141 = vector.extract_strided_slice %139 {offsets = [0, 64], sizes = [5, 64], strides = [1, 1]} : vector<5x320xf32> to vector<5x64xf32>
    %142 = arith.maximumf %140, %141 : vector<5x64xf32>
    %143 = vector.extract_strided_slice %139 {offsets = [0, 128], sizes = [5, 64], strides = [1, 1]} : vector<5x320xf32> to vector<5x64xf32>
    %144 = arith.maximumf %142, %143 : vector<5x64xf32>
    %145 = vector.extract_strided_slice %139 {offsets = [0, 128], sizes = [5, 64], strides = [1, 1]} : vector<5x320xf32> to vector<5x64xf32>
    %146 = vector.extract_strided_slice %139 {offsets = [0, 192], sizes = [5, 64], strides = [1, 1]} : vector<5x320xf32> to vector<5x64xf32>
    %147 = arith.maximumf %145, %146 : vector<5x64xf32>
    %148 = vector.extract_strided_slice %139 {offsets = [0, 256], sizes = [5, 64], strides = [1, 1]} : vector<5x320xf32> to vector<5x64xf32>
    %149 = arith.maximumf %147, %148 : vector<5x64xf32>
    %150 = vector.extract_strided_slice %144 {offsets = [0, 0], sizes = [1, 64], strides = [1, 1]} : vector<5x64xf32> to vector<1x64xf32>
    %151 = vector.extract_strided_slice %144 {offsets = [1, 0], sizes = [1, 64], strides = [1, 1]} : vector<5x64xf32> to vector<1x64xf32>
    %152 = arith.maximumf %150, %151 : vector<1x64xf32>
    %153 = vector.extract_strided_slice %144 {offsets = [2, 0], sizes = [1, 64], strides = [1, 1]} : vector<5x64xf32> to vector<1x64xf32>
    %154 = arith.maximumf %152, %153 : vector<1x64xf32>
    %155 = vector.extract_strided_slice %149 {offsets = [0, 0], sizes = [1, 64], strides = [1, 1]} : vector<5x64xf32> to vector<1x64xf32>
    %156 = vector.extract_strided_slice %149 {offsets = [1, 0], sizes = [1, 64], strides = [1, 1]} : vector<5x64xf32> to vector<1x64xf32>
    %157 = arith.maximumf %155, %156 : vector<1x64xf32>
    %158 = vector.extract_strided_slice %149 {offsets = [2, 0], sizes = [1, 64], strides = [1, 1]} : vector<5x64xf32> to vector<1x64xf32>
    %159 = arith.maximumf %157, %158 : vector<1x64xf32>
    %160 = vector.extract_strided_slice %144 {offsets = [2, 0], sizes = [1, 64], strides = [1, 1]} : vector<5x64xf32> to vector<1x64xf32>
    %161 = vector.extract_strided_slice %144 {offsets = [3, 0], sizes = [1, 64], strides = [1, 1]} : vector<5x64xf32> to vector<1x64xf32>
    %162 = arith.maximumf %160, %161 : vector<1x64xf32>
    %163 = vector.extract_strided_slice %144 {offsets = [4, 0], sizes = [1, 64], strides = [1, 1]} : vector<5x64xf32> to vector<1x64xf32>
    %164 = arith.maximumf %162, %163 : vector<1x64xf32>
    %165 = vector.extract_strided_slice %149 {offsets = [2, 0], sizes = [1, 64], strides = [1, 1]} : vector<5x64xf32> to vector<1x64xf32>
    %166 = vector.extract_strided_slice %149 {offsets = [3, 0], sizes = [1, 64], strides = [1, 1]} : vector<5x64xf32> to vector<1x64xf32>
    %167 = arith.maximumf %165, %166 : vector<1x64xf32>
    %168 = vector.extract_strided_slice %149 {offsets = [4, 0], sizes = [1, 64], strides = [1, 1]} : vector<5x64xf32> to vector<1x64xf32>
    %169 = arith.maximumf %167, %168 : vector<1x64xf32>
    %c0_95 = arith.constant 0 : index
    %c0_96 = arith.constant 0 : index
    %c0_97 = arith.constant 0 : index
    %170 = vector.load %arg16[%c0_95, %c0_96, %c0_97] : memref<4x64x512xbf16, #tpu.memory_space<vmem>>, vector<1x64x512xbf16>
    %171 = vector.shape_cast %170 : vector<1x64x512xbf16> to vector<64x512xbf16>
    %172 = arith.truncf %154 : vector<1x64xf32> to vector<1x64xbf16>
    %cst_98 = arith.constant dense<0.000000e+00> : vector<1x512xf32>
    %173 = tpu.matmul %172, %171, %cst_98 {dimension_numbers = #tpu.dot_dimension_numbers<[1], [0], [0], [1], [0, 0, 1, 1], [], []>} : vector<1x64xbf16>, vector<64x512xbf16>, vector<1x512xf32> -> vector<1x512xf32>
    %c1_99 = arith.constant 1 : index
    %c0_100 = arith.constant 0 : index
    %c0_101 = arith.constant 0 : index
    %174 = vector.load %arg16[%c1_99, %c0_100, %c0_101] : memref<4x64x512xbf16, #tpu.memory_space<vmem>>, vector<1x64x512xbf16>
    %175 = vector.shape_cast %174 : vector<1x64x512xbf16> to vector<64x512xbf16>
    %176 = arith.truncf %159 : vector<1x64xf32> to vector<1x64xbf16>
    %cst_102 = arith.constant dense<0.000000e+00> : vector<1x512xf32>
    %177 = tpu.matmul %176, %175, %cst_102 {dimension_numbers = #tpu.dot_dimension_numbers<[1], [0], [0], [1], [0, 0, 1, 1], [], []>} : vector<1x64xbf16>, vector<64x512xbf16>, vector<1x512xf32> -> vector<1x512xf32>
    %178 = arith.addf %173, %177 : vector<1x512xf32>
    %c2_103 = arith.constant 2 : index
    %c0_104 = arith.constant 0 : index
    %c0_105 = arith.constant 0 : index
    %179 = vector.load %arg16[%c2_103, %c0_104, %c0_105] : memref<4x64x512xbf16, #tpu.memory_space<vmem>>, vector<1x64x512xbf16>
    %180 = vector.shape_cast %179 : vector<1x64x512xbf16> to vector<64x512xbf16>
    %181 = arith.truncf %164 : vector<1x64xf32> to vector<1x64xbf16>
    %cst_106 = arith.constant dense<0.000000e+00> : vector<1x512xf32>
    %182 = tpu.matmul %181, %180, %cst_106 {dimension_numbers = #tpu.dot_dimension_numbers<[1], [0], [0], [1], [0, 0, 1, 1], [], []>} : vector<1x64xbf16>, vector<64x512xbf16>, vector<1x512xf32> -> vector<1x512xf32>
    %183 = arith.addf %178, %182 : vector<1x512xf32>
    %c3 = arith.constant 3 : index
    %c0_107 = arith.constant 0 : index
    %c0_108 = arith.constant 0 : index
    %184 = vector.load %arg16[%c3, %c0_107, %c0_108] : memref<4x64x512xbf16, #tpu.memory_space<vmem>>, vector<1x64x512xbf16>
    %185 = vector.shape_cast %184 : vector<1x64x512xbf16> to vector<64x512xbf16>
    %186 = arith.truncf %169 : vector<1x64xf32> to vector<1x64xbf16>
    %cst_109 = arith.constant dense<0.000000e+00> : vector<1x512xf32>
    %187 = tpu.matmul %186, %185, %cst_109 {dimension_numbers = #tpu.dot_dimension_numbers<[1], [0], [0], [1], [0, 0, 1, 1], [], []>} : vector<1x64xbf16>, vector<64x512xbf16>, vector<1x512xf32> -> vector<1x512xf32>
    %188 = arith.addf %183, %187 : vector<1x512xf32>
    %c0_110 = arith.constant 0 : index
    %c0_111 = arith.constant 0 : index
    %189 = vector.load %arg17[%c0_110, %c0_111] : memref<1x512xf32, #tpu.memory_space<vmem>>, vector<1x512xf32>
    %190 = arith.addf %188, %189 : vector<1x512xf32>
    %cst_112 = arith.constant 0.000000e+00 : f32
    %191 = vector.broadcast %cst_112 : f32 to vector<1x512xf32>
    %192 = arith.maximumf %190, %191 : vector<1x512xf32>
    %c0_113 = arith.constant 0 : index
    %c0_114 = arith.constant 0 : index
    %193 = vector.load %arg18[%c0_113, %c0_114] : memref<512x256xbf16, #tpu.memory_space<vmem>>, vector<512x256xbf16>
    %194 = arith.truncf %192 : vector<1x512xf32> to vector<1x512xbf16>
    %cst_115 = arith.constant dense<0.000000e+00> : vector<1x256xf32>
    %195 = tpu.matmul %194, %193, %cst_115 {dimension_numbers = #tpu.dot_dimension_numbers<[1], [0], [0], [1], [0, 0, 1, 1], [], []>} : vector<1x512xbf16>, vector<512x256xbf16>, vector<1x256xf32> -> vector<1x256xf32>
    %c0_116 = arith.constant 0 : index
    %c0_117 = arith.constant 0 : index
    %196 = vector.load %arg19[%c0_116, %c0_117] : memref<1x256xf32, #tpu.memory_space<vmem>>, vector<1x256xf32>
    %197 = arith.addf %195, %196 : vector<1x256xf32>
    %c0_118 = arith.constant 0 : index
    %c0_119 = arith.constant 0 : index
    %198 = vector.load %arg20[%c0_118, %c0_119] : memref<256x128xbf16, #tpu.memory_space<vmem>>, vector<256x128xbf16>
    %199 = arith.truncf %197 : vector<1x256xf32> to vector<1x256xbf16>
    %cst_120 = arith.constant dense<0.000000e+00> : vector<1x128xf32>
    %200 = tpu.matmul %199, %198, %cst_120 {dimension_numbers = #tpu.dot_dimension_numbers<[1], [0], [0], [1], [0, 0, 1, 1], [], []>} : vector<1x256xbf16>, vector<256x128xbf16>, vector<1x128xf32> -> vector<1x128xf32>
    %c0_121 = arith.constant 0 : index
    %c0_122 = arith.constant 0 : index
    %201 = vector.load %arg21[%c0_121, %c0_122] : memref<1x128xf32, #tpu.memory_space<vmem>>, vector<1x128xf32>
    %202 = arith.addf %200, %201 : vector<1x128xf32>
    %c0_123 = arith.constant 0 : index
    %c0_124 = arith.constant 0 : index
    %c0_125 = arith.constant 0 : index
    %203 = vector.load %arg22[%c0_123, %c0_124, %c0_125] : memref<1x1x128xf32, #tpu.memory_space<vmem>>, vector<1x1x128xf32>
    %204 = vector.shape_cast %203 : vector<1x1x128xf32> to vector<1x128xf32>
    %205 = vector.shape_cast %202 : vector<1x128xf32> to vector<1x1x128xf32>
    tpu.vector_store %arg22[%c0_123, %c0_124, %c0_125], %205 {strides = array<i32>} : memref<1x1x128xf32, #tpu.memory_space<vmem>>, vector<1x1x128xf32>,
    return
  }
  func.func @transform_0(%arg0: i32) -> (i32, i32, i32) {
    %c0_i32 = arith.constant 0 : i32
    %c0_i32_0 = arith.constant 0 : i32
    %c0_i32_1 = arith.constant 0 : i32
    return %arg0, %c0_i32, %c0_i32_0 : i32, i32, i32
  }
  func.func @transform_1(%arg0: i32) -> (i32, i32, i32) {
    %c0_i32 = arith.constant 0 : i32
    %c0_i32_0 = arith.constant 0 : i32
    %c0_i32_1 = arith.constant 0 : i32
    %c0_i32_2 = arith.constant 0 : i32
    return %c0_i32, %c0_i32_0, %c0_i32_1 : i32, i32, i32
  }
  func.func @transform_2(%arg0: i32) -> (i32, i32, i32) {
    %c0_i32 = arith.constant 0 : i32
    %c0_i32_0 = arith.constant 0 : i32
    %c0_i32_1 = arith.constant 0 : i32
    %c0_i32_2 = arith.constant 0 : i32
    return %c0_i32, %c0_i32_0, %c0_i32_1 : i32, i32, i32
  }
  func.func @transform_3(%arg0: i32) -> (i32, i32) {
    %c0_i32 = arith.constant 0 : i32
    %c0_i32_0 = arith.constant 0 : i32
    %c0_i32_1 = arith.constant 0 : i32
    return %c0_i32, %c0_i32_0 : i32, i32
  }
  func.func @transform_4(%arg0: i32) -> (i32, i32) {
    %c0_i32 = arith.constant 0 : i32
    %c0_i32_0 = arith.constant 0 : i32
    %c0_i32_1 = arith.constant 0 : i32
    return %c0_i32, %c0_i32_0 : i32, i32
  }
  func.func @transform_5(%arg0: i32) -> (i32, i32) {
    %c0_i32 = arith.constant 0 : i32
    %c0_i32_0 = arith.constant 0 : i32
    %c0_i32_1 = arith.constant 0 : i32
    return %c0_i32, %c0_i32_0 : i32, i32
  }
  func.func @transform_6(%arg0: i32) -> (i32, i32, i32) {
    %c0_i32 = arith.constant 0 : i32
    %c0_i32_0 = arith.constant 0 : i32
    %c0_i32_1 = arith.constant 0 : i32
    %c0_i32_2 = arith.constant 0 : i32
    return %c0_i32, %c0_i32_0, %c0_i32_1 : i32, i32, i32
  }
  func.func @transform_7(%arg0: i32) -> (i32, i32, i32) {
    %c0_i32 = arith.constant 0 : i32
    %c0_i32_0 = arith.constant 0 : i32
    %c0_i32_1 = arith.constant 0 : i32
    %c0_i32_2 = arith.constant 0 : i32
    return %c0_i32, %c0_i32_0, %c0_i32_1 : i32, i32, i32
  }
  func.func @transform_8(%arg0: i32) -> (i32, i32) {
    %c0_i32 = arith.constant 0 : i32
    %c0_i32_0 = arith.constant 0 : i32
    %c0_i32_1 = arith.constant 0 : i32
    return %c0_i32, %c0_i32_0 : i32, i32
  }
  func.func @transform_9(%arg0: i32) -> (i32, i32) {
    %c0_i32 = arith.constant 0 : i32
    %c0_i32_0 = arith.constant 0 : i32
    %c0_i32_1 = arith.constant 0 : i32
    return %c0_i32, %c0_i32_0 : i32, i32
  }
  func.func @transform_10(%arg0: i32) -> (i32, i32) {
    %c0_i32 = arith.constant 0 : i32
    %c0_i32_0 = arith.constant 0 : i32
    %c0_i32_1 = arith.constant 0 : i32
    return %c0_i32, %c0_i32_0 : i32, i32
  }
  func.func @transform_11(%arg0: i32) -> (i32, i32, i32) {
    %c0_i32 = arith.constant 0 : i32
    %c0_i32_0 = arith.constant 0 : i32
    %c0_i32_1 = arith.constant 0 : i32
    %c0_i32_2 = arith.constant 0 : i32
    return %c0_i32, %c0_i32_0, %c0_i32_1 : i32, i32, i32
  }
  func.func @transform_12(%arg0: i32) -> (i32, i32) {
    %c0_i32 = arith.constant 0 : i32
    %c0_i32_0 = arith.constant 0 : i32
    %c0_i32_1 = arith.constant 0 : i32
    return %c0_i32, %c0_i32_0 : i32, i32
  }
  func.func @transform_13(%arg0: i32) -> (i32, i32, i32) {
    %c0_i32 = arith.constant 0 : i32
    %c0_i32_0 = arith.constant 0 : i32
    %c0_i32_1 = arith.constant 0 : i32
    %c0_i32_2 = arith.constant 0 : i32
    return %c0_i32, %c0_i32_0, %c0_i32_1 : i32, i32, i32
  }
  func.func @transform_14(%arg0: i32) -> (i32, i32) {
    %c0_i32 = arith.constant 0 : i32
    %c0_i32_0 = arith.constant 0 : i32
    %c0_i32_1 = arith.constant 0 : i32
    return %c0_i32, %c0_i32_0 : i32, i32
  }
  func.func @transform_15(%arg0: i32) -> (i32, i32, i32) {
    %c0_i32 = arith.constant 0 : i32
    %c0_i32_0 = arith.constant 0 : i32
    %c0_i32_1 = arith.constant 0 : i32
    %c0_i32_2 = arith.constant 0 : i32
    return %c0_i32, %c0_i32_0, %c0_i32_1 : i32, i32, i32
  }
  func.func @transform_16(%arg0: i32) -> (i32, i32) {
    %c0_i32 = arith.constant 0 : i32
    %c0_i32_0 = arith.constant 0 : i32
    %c0_i32_1 = arith.constant 0 : i32
    return %c0_i32, %c0_i32_0 : i32, i32
  }
  func.func @transform_17(%arg0: i32) -> (i32, i32) {
    %c0_i32 = arith.constant 0 : i32
    %c0_i32_0 = arith.constant 0 : i32
    %c0_i32_1 = arith.constant 0 : i32
    return %c0_i32, %c0_i32_0 : i32, i32
  }
  func.func @transform_18(%arg0: i32) -> (i32, i32) {
    %c0_i32 = arith.constant 0 : i32
    %c0_i32_0 = arith.constant 0 : i32
    %c0_i32_1 = arith.constant 0 : i32
    return %c0_i32, %c0_i32_0 : i32, i32
  }
  func.func @transform_19(%arg0: i32) -> (i32, i32) {
    %c0_i32 = arith.constant 0 : i32
    %c0_i32_0 = arith.constant 0 : i32
    %c0_i32_1 = arith.constant 0 : i32
    return %c0_i32, %c0_i32_0 : i32, i32
  }
  func.func @transform_20(%arg0: i32) -> (i32, i32) {
    %c0_i32 = arith.constant 0 : i32
    %c0_i32_0 = arith.constant 0 : i32
    %c0_i32_1 = arith.constant 0 : i32
    return %c0_i32, %c0_i32_0 : i32, i32
  }
  func.func @transform_21(%arg0: i32) -> (i32, i32, i32) {
    %c0_i32 = arith.constant 0 : i32
    %c0_i32_0 = arith.constant 0 : i32
    %c0_i32_1 = arith.constant 0 : i32
    return %arg0, %c0_i32, %c0_i32_0 : i32, i32, i32
  }
}

</mosaic_0001>

<bundles_post_ra>
// kernel: alexnet_light_forward.1
= control target key start
LH: loop header
LB: loop body
LE: loop exit
PB: predicated region body
PF: predicated region fallthrough
CT: control target
= control target key end

     0   :  { %s18598_s0 = inlined_call_operand.vmem [shape: f32[2,34,102], index: 0, kind: input, shape index: {}]   ;;  %s18599_s1 = inlined_call_operand.vmem [shape: bf16[3,102,512], index: 1, kind: input, shape index: {}]   ;;  %s18600_s2 = inlined_call_operand.vmem [shape: bf16[3,102,512], index: 2, kind: input, shape index: {}]   ;;  %s18601_s3 = inlined_call_operand.vmem [shape: f32[1,512], index: 3, kind: input, shape index: {}]   ;;  %s18602_s4 = inlined_call_operand.vmem [shape: bf16[16,32], index: 4, kind: input, shape index: {}]   ;;  %s18603_s5 = inlined_call_operand.vmem [shape: bf16[16,32], index: 5, kind: input, shape index: {}]   ;;  %s18604_s6 = inlined_call_operand.vmem [shape: bf16[3,512,224], index: 6, kind: input, shape index: {}]   ;;  %s18605_s7 = inlined_call_operand.vmem [shape: bf16[3,512,224], index: 7, kind: input, shape index: {}]   ;;  %s18606_s8 = inlined_call_operand.vmem [shape: f32[1,224], index: 8, kind: input, shape index: {}]   ;;  %s18607_s9 = inlined_call_operand.vmem [shape: bf16[9,14], index: 9, kind: input, shape index: {}]   ;;  %s18608_s10 = inlined_call_operand.vmem [shape: bf16[9,14], index: 10, kind: input, shape index: {}]   ;;  %s18609_s11 = inlined_call_operand.vmem [shape: bf16[3,224,448], index: 11, kind: input, shape index: {}]   ;;  %s18610_s12 = inlined_call_operand.vmem [shape: f32[1,448], index: 12, kind: input, shape index: {}]   ;;  %s18611_s13 = inlined_call_operand.vmem [shape: bf16[3,448,320], index: 13, kind: input, shape index: {}]   ;;  %s18612_s14 = inlined_call_operand.vmem [shape: f32[1,320], index: 14, kind: input, shape index: {}]   ;;  %s18613_s15 = inlined_call_operand.vmem [shape: bf16[4,64,512], index: 15, kind: input, shape index: {}]   ;;  %s18614_s16 = inlined_call_operand.vmem [shape: f32[1,512], index: 16, kind: input, shape index: {}]   ;;  %s18615_s17 = inlined_call_operand.vmem [shape: bf16[512,256], index: 17, kind: input, shape index: {}]   ;;  %s18616_s18 = inlined_call_operand.vmem [shape: f32[1,256], index: 18, kind: input, shape index: {}]   ;;  %s18617_s19 = inlined_call_operand.vmem [shape: bf16[256,128], index: 19, kind: input, shape index: {}]   ;;  %s18618_s20 = inlined_call_operand.vmem [shape: f32[1,128], index: 20, kind: input, shape index: {}]   ;;  %s18619_s21 = inlined_call_operand.hbm [shape: f32[2,1,128], index: 21, kind: output, shape index: {}]  }
   0x1   :  { %18632 = sst [smem:[#allocation12_spill]] %s18598_s0 }
   0x2   :  { %18633 = sst [smem:[#allocation13_spill]] %s18599_s1 }
   0x3   :  { %18634 = sst [smem:[#allocation14_spill]] %s18600_s2 }
   0x4   :  { %18635 = sst [smem:[#allocation15_spill]] %s18601_s3 }
   0x5   :  { %18636 = sst [smem:[#allocation16_spill]] %s18602_s4 }
   0x6   :  { %18637 = sst [smem:[#allocation17_spill]] %s18603_s5 }
   0x7   :  { %18638 = sst [smem:[#allocation18_spill]] %s18619_s21 }
   0x8   :  { %26 = vsyncpa [#allocation3], 0 }
   0x9   :  { %28 = vsyncpa [#allocation3 + $0x1], 0  ;;  %s14754_s2 = smov 0   ;;  %s14756_s25 = smov 0  }
   0xa   :  { %s14758_s26 = smov 0   ;;  %s14760_s27 = smov 0  }
   0xb LB: > { %18639 = sst [smem:[#allocation5_spill]] %s14627_s2  ;;  %s14775_s3 = sadd.s32 4294967295, %s14639_s27   ;;  %s14639_s27 = sphi %s14760_s27, %s18659_s27   ;;  %s14635_s26 = sphi %s14758_s26, %s18664_s26   ;;  %s14631_s25 = sphi %s14756_s25, %s18663_s25   ;;  %s14627_s2 = sphi %s14754_s2, %s18662_s2  }
   0xc   : > { %18640 = sst [smem:[#allocation6_spill]] %s14635_s26  ;;  %s10785_s28 = sadd.s32 4294967294, %s14639_s27  }
   0xd   : > { %18641 = sst [smem:[#allocation7_spill]] %s14639_s27  ;;  %s14779_s29 = sadd.s32 1, %s14639_s27  }
   0xe   : > { %18642 = sst [smem:[#allocation8_spill]] %s14779_s29  ;;  %s487_s0 = sadd.s32 1, %s14635_s26 }
   0xf   : > { %s484_s4 = ssub.s32 %s14639_s27, %s14779_s29  ;;  %p497_p0 = scmp.ne.s32.totalorder %s14635_s26, %s14631_s25 }
  0x10   : > { %p485_p1 = scmp.eq.s32.totalorder %s484_s4, 0  ;;  %p498_p2 = scmp.eq.s32.totalorder %s14775_s3, 1 }
  0x11   : > { %p503_p3 = scmp.ne.s32.totalorder %s14631_s25, %s14627_s2  ;;  %p504_p4 = scmp.eq.s32.totalorder %s10785_s28, 1 }
  0x12   : > { %s14790_s30 = scalar_select %p485_p1, %s14635_s26, %s487_s0  }
  0x13   : > { %p14792_p5 = por %p498_p2, %p497_p0  ;;  %p14796_p6 = por %p504_p4, %p503_p3 }
  0x14   : > { %18643 = sst [smem:[#allocation9_spill]] %s14790_s30  ;;  %p10788_p7 = scmp.ge.s32.totalorder %s14639_s27, 1 }
  0x15   : > { %s18644_s5 = scalar_select %p14792_p5, 1, 0 }
  0x16   : > { %s18646_s22 = scalar_select %p14796_p6, 1, 0 }
  0x17   : > { %18645 = sst [smem:[#allocation10_spill]] %s18644_s5  ;;  %p590_p8 = scmp.lt.s32.totalorder %s14639_s27, 3 }
  0x18   : > { %18647 = sst [smem:[#allocation11_spill]] %s18646_s22 }
  0x19   : > { %p591_p9 = pnand %p10788_p7, %p590_p8 }
  0x1a   : > { %s18648_s24 = sld [smem:[#allocation13_spill]] (!%p591_p9)  ;;  %v14641_v2 = vmov (!%p591_p9), 0   ;;  %p649_p10 = scmp.lt.s32.totalorder (!%p591_p9), %s14775_s3, 1  ;;  %vm874_vm0 = vcmask (!%p591_p9), 1042432   ;;  %vm716_vm1 = vsmask.f32 (!%p591_p9), 7424 }
  0x1b   : > { %594 = sbr.rel (%p591_p9) target bundleno = 3137 (0xc41), region = 104  ;;  %919 = vmatprep.mubr.bf16.mxu0 (!%p591_p9), %v14641_v2  ;;  %972 = vmatprep.mubr.bf16.mxu1 (!%p591_p9), %v14641_v2  ;;  %s18649_s4 = sld [smem:[#allocation12_spill]] (!%p591_p9)  ;;  %vm867_vm2 = vcmask (!%p591_p9), 834560   ;;  %vm1275_vm3 = vcmask (!%p591_p9), 1046528   ;;  %vm2476_vm4 = vcmask (!%p591_p9), 261120   ;;  %vm5583_vm5 = vcmask (!%p591_p9), 113664  }
  0x1c   : > { %s18651_s21 = sld [smem:[#allocation15_spill]] (!%p591_p9)  ;;  %s18652_s28 = sld [smem:[#allocation16_spill]] (!%p591_p9)  ;;  %vm6104_vm6 = vcmask (!%p591_p9), 785408   ;;  %vm7725_vm7 = vcmask (!%p591_p9), 523264  }
  0x1d   : > { %s18653_s26 = sld [smem:[#allocation17_spill]] (!%p591_p9)  ;;  %s12718_s1 = sshll.u32 (!%p591_p9), %s14775_s3, 4 }
  0x20   : > { %v12961_v0 = vld [vmem:[%s18648_s24 + $0xd4] ss:$16 sps:$4 sm:$0xff] (!%p591_p9)   ;;  %v12963_v1 = vld [vmem:[%s18648_s24 + $0xdc] ss:$16 sps:$4 sm:$0xff] (!%p591_p9)   ;;  %v12965_v3 = vld [vmem:[%s18648_s24 + $0xd0] ss:$16 sps:$4 sm:$0xff] (!%p591_p9)  }
  0x21   : > { %887 = vmatprep.subr.bf16.mxu0 (!%p591_p9), %v12961_v0  ;;  %v12966_v4 = vld [vmem:[%s18648_s24 + $0xd8] ss:$16 sps:$4 sm:$0xff] (!%p591_p9)   ;;  %940 = vmatprep.subr.bf16.mxu1 (!%p591_p9), %v12963_v1  ;;  %v12967_v5 = vld [vmem:[%s18648_s24 + $0xf4] ss:$16 sps:$4 sm:$0xff] (!%p591_p9)   ;;  %v12969_v6 = vld [vmem:[%s18648_s24 + $0xfc] ss:$16 sps:$4 sm:$0xff] (!%p591_p9)  }
  0x22   : > { %888 = vmatpush1.bf16.msra.mxu0 %v12965_v3  ;;  %941 = vmatpush1.bf16.msra.mxu1 %v12966_v4  ;;  %v12971_v7 = vld [vmem:[%s18648_s24 + $0xf0] ss:$16 sps:$4 sm:$0xff]   ;;  %v12972_v8 = vld [vmem:[%s18648_s24 + $0xf8] ss:$16 sps:$4 sm:$0xff]   ;;  %v12973_v9 = vld [vmem:[%s18648_s24 + $0x114] ss:$16 sps:$4 sm:$0xff]  }
  0x23   : > { %889 = vmatprep.subr.bf16.mxu0 %v12967_v5  ;;  %942 = vmatprep.subr.bf16.mxu1 %v12969_v6  ;;  %v12975_v10 = vld [vmem:[%s18648_s24 + $0x11c] ss:$16 sps:$4 sm:$0xff]   ;;  %v12977_v11 = vld [vmem:[%s18648_s24 + $0x110] ss:$16 sps:$4 sm:$0xff]   ;;  %v12978_v12 = vld [vmem:[%s18648_s24 + $0x118] ss:$16 sps:$4 sm:$0xff]  }
  0x24   : > { %v12979_v13 = vld [vmem:[%s18648_s24 + $0x134] ss:$16 sps:$4 sm:$0xff]   ;;  %s650_s30 = scalar_select %p649_p10, %s14775_s3, 1  ;;  %v12981_v14 = vld [vmem:[%s18648_s24 + $0x13c] ss:$16 sps:$4 sm:$0xff]  }
  0x25   : > { %v12983_v15 = vld [vmem:[%s18648_s24 + $0x130] ss:$16 sps:$4 sm:$0xff]   ;;  %v12984_v16 = vld [vmem:[%s18648_s24 + $0x138] ss:$16 sps:$4 sm:$0xff]   ;;  %v12985_v17 = vld [vmem:[%s18648_s24 + $0x154] ss:$16 sps:$4 sm:$0xff]  }
  0x26   : > { %890 = vmatpush1.bf16.msra.mxu0 %v12971_v7  ;;  %943 = vmatpush1.bf16.msra.mxu1 %v12972_v8  ;;  %s12919_s29 = smul.u32 40, %s650_s30  ;;  %v12987_v18 = vld [vmem:[%s18648_s24 + $0x15c] ss:$16 sps:$4 sm:$0xff]   ;;  %v12989_v19 = vld [vmem:[%s18648_s24 + $0x150] ss:$16 sps:$4 sm:$0xff]   ;;  %s18655_s30 = sld [smem:[#allocation18_spill]] }
  0x27   : > { %891 = vmatprep.subr.bf16.mxu0 %v12973_v9  ;;  %944 = vmatprep.subr.bf16.mxu1 %v12975_v10  ;;  %v12990_v20 = vld [vmem:[%s18648_s24 + $0x158] ss:$16 sps:$4 sm:$0xff]   ;;  %v12991_v21 = vld [vmem:[%s18648_s24 + $0x174] ss:$16 sps:$4 sm:$0xff]   ;;  %v12993_v22 = vld [vmem:[%s18648_s24 + $0x17c] ss:$16 sps:$4 sm:$0xff]  }
  0x28   : > { %s14875_s5 = scalar_lea.vmem %s18649_s4, %s12919_s29  ;;  %v10814_v23 = vld [vmem:[%s18648_s24 + $0x190] sm:$0x77]  ;;  %v10815_v24 = vld [vmem:[%s18648_s24 + $0x198] sm:$0x77]  ;;  %s18650_s4 = sld [smem:[#allocation14_spill]] }
  0x29   : > { %v12995_v25 = vld [vmem:[%s18648_s24 + $0x170] ss:$16 sps:$4 sm:$0xff]   ;;  %v12996_v26 = vld [vmem:[%s18648_s24 + $0x178] ss:$16 sps:$4 sm:$0xff]   ;;  %v10841_v29 = vcombine.high %v10814_v23, %v10814_v23  ;;  %v10843_v30 = vcombine.high %v10815_v24, %v10815_v24  ;;  %v10840_v34 = vcombine.low %v10814_v23, %v10814_v23  ;;  %v10842_v35 = vcombine.low %v10815_v24, %v10815_v24  ;;  %v13003_v40 = vld [vmem:[%s18648_s24 + $0x4] ss:$16 sps:$4 sm:$0xff]  }
  0x2a   : > { %892 = vmatpush1.bf16.msra.mxu0 %v12977_v11  ;;  %945 = vmatpush1.bf16.msra.mxu1 %v12978_v12  ;;  %v655_v27 = vld [vmem:[%s14875_s5] sm:$0xff]  ;;  %v656_v28 = vld [vmem:[%s14875_s5 + $0x8] sm:$0xff]  ;;  %v657_v31 = vld [vmem:[%s14875_s5 + $0x10] sm:$0xff]  ;;  %s14643_s3 = smov [#allocation2]  }
  0x2b   : > { %893 = vmatprep.subr.bf16.mxu0 %v12979_v13  ;;  %946 = vmatprep.subr.bf16.mxu1 %v12981_v14  ;;  %v658_v32 = vld [vmem:[%s14875_s5 + $0x18] sm:$0xff]  ;;  %v14893_v33 = vpack.c.bf16 %v656_v28, %v655_v27  ;;  %v876_v42 = vsel %vm874_vm0, %v10840_v34, 0  ;;  %v882_v43 = vsel %vm874_vm0, %v10842_v35, 0  ;;  %v13001_v47 = vld [vmem:[%s18648_s24] ss:$16 sps:$4 sm:$0xff]  }
  0x2c   : > { %v14895_v36 = vpack.c.bf16 %v658_v32, %v657_v31  ;;  %v13006_v44 = vld [vmem:[%s18648_s24 + $0xc] ss:$16 sps:$4 sm:$0xff]   ;;  %v13004_v48 = vld [vmem:[%s18648_s24 + $0x8] ss:$16 sps:$4 sm:$0xff]   ;;  %v13009_v50 = vld [vmem:[%s18648_s24 + $0x24] ss:$16 sps:$4 sm:$0xff]   ;;  %s18556_s22 = scalar_lea.hbm %s18655_s30, %s12718_s1 }
  0x2d   : > { %v718_v37 = vshrl.u32 %v14893_v33, 16  ;;  %v720_v38 = vshll.u32 %v14893_v33, 16  ;;  %v13012_v51 = vld [vmem:[%s18648_s24 + $0x2c] ss:$16 sps:$4 sm:$0xff]   ;;  %v13007_v52 = vld [vmem:[%s18648_s24 + $0x20] ss:$16 sps:$4 sm:$0xff]  }
  0x2e   : > { %894 = vmatpush1.bf16.msra.mxu0 %v12983_v15  ;;  %947 = vmatpush1.bf16.msra.mxu1 %v12984_v16  ;;  %v725_v39 = vshll.u32 %v14895_v36, 16  ;;  %v13010_v53 = vld [vmem:[%s18648_s24 + $0x28] ss:$16 sps:$4 sm:$0xff]   ;;  %v13015_v54 = vld [vmem:[%s18648_s24 + $0x44] ss:$16 sps:$4 sm:$0xff]   ;;  %v729_v56 = vshrl.u32 %v14895_v36, 16 }
  0x2f   : > { %895 = vmatprep.subr.bf16.mxu0 %v12985_v17  ;;  %948 = vmatprep.subr.bf16.mxu1 %v12987_v18  ;;  %v722_v41 = vrot.slane %v720_v38, 1  ;;  %v13018_v55 = vld [vmem:[%s18648_s24 + $0x4c] ss:$16 sps:$4 sm:$0xff]   ;;  %v659_v57 = vld [vmem:[%s14875_s5 + $0x20] sm:$0x3] }
  0x30   : > { %v727_v45 = vrot.slane %v725_v39, 1  ;;  %v13013_v58 = vld [vmem:[%s18648_s24 + $0x40] ss:$16 sps:$4 sm:$0xff]   ;;  %v14948_v59 = vpack.c.bf16 %v659_v57, %v659_v57  ;;  %v13016_v60 = vld [vmem:[%s18648_s24 + $0x48] ss:$16 sps:$4 sm:$0xff]  }
  0x31   : > { %v723_v46 = vor.u32 %v722_v41, %v718_v37  ;;  %v13021_v61 = vld [vmem:[%s18648_s24 + $0x64] ss:$16 sps:$4 sm:$0xff]   ;;  %v13024_v62 = vld [vmem:[%s18648_s24 + $0x6c] ss:$16 sps:$4 sm:$0xff]   ;;  %v13019_v3 = vld [vmem:[%s18648_s24 + $0x60] ss:$16 sps:$4 sm:$0xff]  }
  0x32   : > { %896 = vmatpush1.bf16.msra.mxu0 %v12989_v19  ;;  %949 = vmatpush1.bf16.msra.mxu1 %v12990_v20  ;;  %v731_v63 = vor.u32 %v729_v56, %v727_v45  ;;  %v733_v0 = vshll.u32 %v14948_v59, 16  ;;  %v13022_v4 = vld [vmem:[%s18648_s24 + $0x68] ss:$16 sps:$4 sm:$0xff]   ;;  %v13027_v5 = vld [vmem:[%s18648_s24 + $0x84] ss:$16 sps:$4 sm:$0xff]   ;;  %v1277_v56 = vrot.slane %v14895_v36, 1 }
  0x33   : > { %897 = vmatprep.subr.bf16.mxu0 %v12991_v21  ;;  %950 = vmatprep.subr.bf16.mxu1 %v12993_v22  ;;  %v14917_v49 = vsel %vm716_vm1, %v723_v46, %v727_v45  ;;  %v13030_v6 = vld [vmem:[%s18648_s24 + $0x8c] ss:$16 sps:$4 sm:$0xff]   ;;  %v13025_v8 = vld [vmem:[%s18648_s24 + $0x80] ss:$16 sps:$4 sm:$0xff]   ;;  %v13028_v9 = vld [vmem:[%s18648_s24 + $0x88] ss:$16 sps:$4 sm:$0xff]  }
  0x34   : > { %v735_v1 = vrot.slane %v733_v0, 1  ;;  %v13033_v10 = vld [vmem:[%s18648_s24 + $0xa4] ss:$16 sps:$4 sm:$0xff]   ;;  %v13036_v11 = vld [vmem:[%s18648_s24 + $0xac] ss:$16 sps:$4 sm:$0xff]  }
  0x35   : > { %v684_v12 = vld [vmem:[%s18648_s24 + $0xc0] sm:$0x77]  ;;  %v685_v13 = vld [vmem:[%s18648_s24 + $0xc8] sm:$0x77] }
  0x36   : > { %898 = vmatpush1.bf16.msra.mxu0 %v12995_v25  ;;  %951 = vmatpush1.bf16.msra.mxu1 %v12996_v26  ;;  %v14973_v7 = vsel %vm716_vm1, %v731_v63, %v735_v1  ;;  %v13031_v14 = vld [vmem:[%s18648_s24 + $0xa0] ss:$16 sps:$4 sm:$0xff]   ;;  %v13034_v15 = vld [vmem:[%s18648_s24 + $0xa8] ss:$16 sps:$4 sm:$0xff]   ;;  %v10875_v16 = vcombine.high %v684_v12, %v684_v12  ;;  %v10877_v17 = vcombine.high %v685_v13, %v685_v13  ;;  %v13043_v20 = vld [vmem:[%s18648_s24 + $0x1a4] ss:$16 sps:$4 sm:$0xff]  }
  0x37   : > { %10844 = vmatprep.subr.msk.bf16.mxu0 %vm874_vm0, %v10841_v29  ;;  %10847 = vmatprep.subr.msk.bf16.mxu1 %vm874_vm0, %v10843_v30  ;;  %v10874_v18 = vcombine.low %v684_v12, %v684_v12  ;;  %v10876_v19 = vcombine.low %v685_v13, %v685_v13  ;;  %v13046_v23 = vld [vmem:[%s18648_s24 + $0x1ac] ss:$16 sps:$4 sm:$0xff]   ;;  %v13041_v24 = vld [vmem:[%s18648_s24 + $0x1a0] ss:$16 sps:$4 sm:$0xff]   ;;  %v13044_v25 = vld [vmem:[%s18648_s24 + $0x1a8] ss:$16 sps:$4 sm:$0xff]  }
  0x38   : > { %v13049_v26 = vld [vmem:[%s18648_s24 + $0x1c4] ss:$16 sps:$4 sm:$0xff]   ;;  %v13052_v27 = vld [vmem:[%s18648_s24 + $0x1cc] ss:$16 sps:$4 sm:$0xff]   ;;  %v13047_v28 = vld [vmem:[%s18648_s24 + $0x1c0] ss:$16 sps:$4 sm:$0xff]  }
  0x39   : > { %v1128_v21 = vsel %vm874_vm0, %v10874_v18, 0  ;;  %v1134_v22 = vsel %vm874_vm0, %v10876_v19, 0  ;;  %v13050_v29 = vld [vmem:[%s18648_s24 + $0x1c8] ss:$16 sps:$4 sm:$0xff]   ;;  %v13055_v30 = vld [vmem:[%s18648_s24 + $0x1e4] ss:$16 sps:$4 sm:$0xff]  }
  0x3a   : > { %900 = vmatpush1.bf16.msra.mxu0 %v876_v42  ;;  %953 = vmatpush1.bf16.msra.mxu1 %v882_v43  ;;  %v13058_v31 = vld [vmem:[%s18648_s24 + $0x1ec] ss:$16 sps:$4 sm:$0xff]   ;;  %v13053_v32 = vld [vmem:[%s18648_s24 + $0x1e0] ss:$16 sps:$4 sm:$0xff]   ;;  %v13056_v34 = vld [vmem:[%s18648_s24 + $0x1e8] ss:$16 sps:$4 sm:$0xff]  }
  0x3b   : > { %1139 = vmatprep.subr.bf16.mxu0 %v13003_v40  ;;  %1192 = vmatprep.subr.bf16.mxu1 %v13006_v44  ;;  %v13061_v35 = vld [vmem:[%s18648_s24 + $0x204] ss:$16 sps:$4 sm:$0xff]   ;;  %v13064_v37 = vld [vmem:[%s18648_s24 + $0x20c] ss:$16 sps:$4 sm:$0xff]   ;;  %v13059_v38 = vld [vmem:[%s18648_s24 + $0x200] ss:$16 sps:$4 sm:$0xff]  }
  0x3c   : > { %v13062_v39 = vld [vmem:[%s18648_s24 + $0x208] ss:$16 sps:$4 sm:$0xff]   ;;  %v13067_v40 = vld [vmem:[%s18648_s24 + $0x224] ss:$16 sps:$4 sm:$0xff]   ;;  %v13070_v41 = vld [vmem:[%s18648_s24 + $0x22c] ss:$16 sps:$4 sm:$0xff]  }
  0x3d   : > { %10845 = vmatmul.mubr.msk.bf16.vlgmr.msra.gmra.mrb[0].mxu0 %vm867_vm2, %v14917_v49  ;;  %10848 = vmatmul.mubr.msk.bf16.vlgmr.msra.gmra.mrb[0].mxu1 %vm867_vm2, %v14917_v49  ;;  %v13065_v42 = vld [vmem:[%s18648_s24 + $0x220] ss:$16 sps:$4 sm:$0xff]   ;;  %v13068_v43 = vld [vmem:[%s18648_s24 + $0x228] ss:$16 sps:$4 sm:$0xff]   ;;  %v13073_v44 = vld [vmem:[%s18648_s24 + $0x244] ss:$16 sps:$4 sm:$0xff]  }
  0x3e   : > { %1140 = vmatpush1.bf16.msra.mxu0 %v13001_v47  ;;  %1193 = vmatpush1.bf16.msra.mxu1 %v13004_v48  ;;  %v13076_v45 = vld [vmem:[%s18648_s24 + $0x24c] ss:$16 sps:$4 sm:$0xff]   ;;  %v10908_v46 = vld [vmem:[%s18648_s24 + $0x260] sm:$0x77]  ;;  %v13084_v0 = vld [vmem:[%s18650_s4 + $0xd8] ss:$16 sps:$4 sm:$0xff]  }
  0x3f   : > { %1141 = vmatprep.subr.bf16.mxu0 %v13009_v50  ;;  %1194 = vmatprep.subr.bf16.mxu1 %v13012_v51  ;;  %v10909_v47 = vld [vmem:[%s18648_s24 + $0x268] sm:$0x77]  ;;  %v13071_v48 = vld [vmem:[%s18648_s24 + $0x240] ss:$16 sps:$4 sm:$0xff]   ;;  %v10935_v51 = vcombine.high %v10908_v46, %v10908_v46  ;;  %v13083_v57 = vld [vmem:[%s18650_s4 + $0xd4] ss:$16 sps:$4 sm:$0xff]  }
  0x40   : > { %929 = vmatprep.mubr.bf16.mxu0 %v14641_v2  ;;  %982 = vmatprep.mubr.bf16.mxu1 %v14641_v2  ;;  %v13074_v50 = vld [vmem:[%s18648_s24 + $0x248] ss:$16 sps:$4 sm:$0xff]   ;;  %v13081_v63 = vld [vmem:[%s18650_s4 + $0xd0] ss:$16 sps:$4 sm:$0xff]   ;;  %v13089_v1 = vld [vmem:[%s18650_s4 + $0xf4] ss:$16 sps:$4 sm:$0xff]  }
  0x41   : > { %v13101_v12 = vld [vmem:[%s18650_s4 + $0x134] ss:$16 sps:$4 sm:$0xff]   ;;  %v13104_v13 = vld [vmem:[%s18650_s4 + $0x13c] ss:$16 sps:$4 sm:$0xff]   ;;  %v13105_v18 = vld [vmem:[%s18650_s4 + $0x150] ss:$16 sps:$4 sm:$0xff]  }
  0x42   : > { %1142 = vmatpush1.bf16.msra.mxu0 %v13007_v52  ;;  %1195 = vmatpush1.bf16.msra.mxu1 %v13010_v53  ;;  %v10937_v52 = vcombine.high %v10909_v47, %v10909_v47  ;;  %v10934_v53 = vcombine.low %v10908_v46, %v10908_v46  ;;  %v13108_v19 = vld [vmem:[%s18650_s4 + $0x158] ss:$16 sps:$4 sm:$0xff]   ;;  %v13144_v46 = vld [vmem:[%s18650_s4 + $0x6c] ss:$16 sps:$4 sm:$0xff]  }
  0x43   : > { %1143 = vmatprep.subr.bf16.mxu0 %v13015_v54  ;;  %1196 = vmatprep.subr.bf16.mxu1 %v13018_v55  ;;  %v10936_v54 = vcombine.low %v10909_v47, %v10909_v47  ;;  %v1276_v55 = vrot.slane %v14893_v33, 1  ;;  %v13139_v47 = vld [vmem:[%s18650_s4 + $0x60] ss:$16 sps:$4 sm:$0xff]  }
  0x45   : > { %10846 = vmatmul.mubr.msk.bf16.gmra.mrb[4].mxu0 %vm867_vm2, %v14973_v7  ;;  %10849 = vmatmul.mubr.msk.bf16.gmra.mrb[4].mxu1 %vm867_vm2, %v14973_v7 }
  0x46   : > { %1144 = vmatpush1.bf16.msra.mxu0 %v13013_v58  ;;  %1197 = vmatpush1.bf16.msra.mxu1 %v13016_v60  ;;  %v1418_v58 = vsel %vm874_vm0, %v10934_v53, 0  ;;  %v1424_v60 = vsel %vm874_vm0, %v10936_v54, 0  ;;  %v13148_v53 = vld [vmem:[%s18650_s4 + $0x88] ss:$16 sps:$4 sm:$0xff]   ;;  %v13156_v54 = vld [vmem:[%s18650_s4 + $0xac] ss:$16 sps:$4 sm:$0xff]  }
  0x47   : > { %1145 = vmatprep.subr.bf16.mxu0 %v13021_v61  ;;  %1198 = vmatprep.subr.bf16.mxu1 %v13024_v62  ;;  %v13086_v61 = vld [vmem:[%s18650_s4 + $0xdc] ss:$16 sps:$4 sm:$0xff]   ;;  %v15112_v62 = vsel %vm1275_vm3, %v1276_v55, %v1277_v56  ;;  %v1575_v55 = vld [vmem:[%s18650_s4 + $0xc0] sm:$0x77] }
  0x48   : > { %1171 = vmatprep.mubr.bf16.mxu0 %v14641_v2  ;;  %1224 = vmatprep.mubr.bf16.mxu1 %v14641_v2 }
  0x4a   : > { %1146 = vmatpush1.bf16.msra.mxu0 %v13019_v3  ;;  %1199 = vmatpush1.bf16.msra.mxu1 %v13022_v4  ;;  %v13092_v3 = vld [vmem:[%s18650_s4 + $0xfc] ss:$16 sps:$4 sm:$0xff]   ;;  %v13087_v4 = vld [vmem:[%s18650_s4 + $0xf0] ss:$16 sps:$4 sm:$0xff]  }
  0x4b   : > { %1147 = vmatprep.subr.bf16.mxu0 %v13027_v5  ;;  %1200 = vmatprep.subr.bf16.mxu1 %v13030_v6  ;;  %v13090_v5 = vld [vmem:[%s18650_s4 + $0xf8] ss:$16 sps:$4 sm:$0xff]   ;;  %v1279_v6 = vrot.slane %v14948_v59, 1 }
  0x4c   : > { %v13096_v59 = vld [vmem:[%s18650_s4 + $0x118] ss:$16 sps:$4 sm:$0xff]  }
  0x4e   : > { %1148 = vmatpush1.bf16.msra.mxu0 %v13025_v8  ;;  %1201 = vmatpush1.bf16.msra.mxu1 %v13028_v9  ;;  %v13095_v8 = vld [vmem:[%s18650_s4 + $0x114] ss:$16 sps:$4 sm:$0xff]   ;;  %v13098_v9 = vld [vmem:[%s18650_s4 + $0x11c] ss:$16 sps:$4 sm:$0xff]  }
  0x4f   : > { %1149 = vmatprep.subr.bf16.mxu0 %v13033_v10  ;;  %1202 = vmatprep.subr.bf16.mxu1 %v13036_v11  ;;  %v13093_v10 = vld [vmem:[%s18650_s4 + $0x110] ss:$16 sps:$4 sm:$0xff]   ;;  %v15152_v11 = vsel %vm1275_vm3, %v1277_v56, %v1279_v6  ;;  %v1576_v56 = vld [vmem:[%s18650_s4 + $0xc8] sm:$0x77] }
  0x50   : > { %v13161_v6 = vld [vmem:[%s18650_s4 + $0x1a0] ss:$16 sps:$4 sm:$0xff]  }
  0x52   : > { %1150 = vmatpush1.bf16.msra.mxu0 %v13031_v14  ;;  %1203 = vmatpush1.bf16.msra.mxu1 %v13034_v15  ;;  %v13099_v14 = vld [vmem:[%s18650_s4 + $0x130] ss:$16 sps:$4 sm:$0xff]   ;;  %v13102_v15 = vld [vmem:[%s18650_s4 + $0x138] ss:$16 sps:$4 sm:$0xff]  }
  0x53   : > { %10878 = vmatprep.subr.msk.bf16.mxu0 %vm874_vm0, %v10875_v16  ;;  %10881 = vmatprep.subr.msk.bf16.mxu1 %vm874_vm0, %v10877_v17  ;;  %v13107_v16 = vld [vmem:[%s18650_s4 + $0x154] ss:$16 sps:$4 sm:$0xff]   ;;  %v13110_v17 = vld [vmem:[%s18650_s4 + $0x15c] ss:$16 sps:$4 sm:$0xff]  }
  0x56   : > { %1152 = vmatpush1.bf16.msra.mxu0 %v1128_v21  ;;  %1205 = vmatpush1.bf16.msra.mxu1 %v1134_v22  ;;  %v13116_v21 = vld [vmem:[%s18650_s4 + $0x17c] ss:$16 sps:$4 sm:$0xff]   ;;  %v10968_v22 = vld [vmem:[%s18650_s4 + $0x190] sm:$0x77] }
  0x57   : > { %1429 = vmatprep.subr.bf16.mxu0 %v13043_v20  ;;  %1482 = vmatprep.subr.bf16.mxu1 %v13046_v23  ;;  %v13113_v20 = vld [vmem:[%s18650_s4 + $0x174] ss:$16 sps:$4 sm:$0xff]   ;;  %v10969_v23 = vld [vmem:[%s18650_s4 + $0x198] sm:$0x77] }
  0x59   : > { %10879 = vmatmul.mubr.msk.bf16.vlgmr.msra.gmra.mrb[0].mxu0 %vm867_vm2, %v14893_v33  ;;  %10882 = vmatmul.mubr.msk.bf16.vlgmr.msra.gmra.mrb[0].mxu1 %vm867_vm2, %v14893_v33 }
  0x5a   : > { %1430 = vmatpush1.bf16.msra.mxu0 %v13041_v24  ;;  %1483 = vmatpush1.bf16.msra.mxu1 %v13044_v25  ;;  %v13111_v24 = vld [vmem:[%s18650_s4 + $0x170] ss:$16 sps:$4 sm:$0xff]   ;;  %v13114_v25 = vld [vmem:[%s18650_s4 + $0x178] ss:$16 sps:$4 sm:$0xff]  }
  0x5b   : > { %1431 = vmatprep.subr.bf16.mxu0 %v13049_v26  ;;  %1484 = vmatprep.subr.bf16.mxu1 %v13052_v27  ;;  %v10995_v26 = vcombine.high %v10968_v22, %v10968_v22  ;;  %v10997_v27 = vcombine.high %v10969_v23, %v10969_v23 }
  0x5c   : > { %1181 = vmatprep.mubr.bf16.mxu0 %v14641_v2  ;;  %1234 = vmatprep.mubr.bf16.mxu1 %v14641_v2 }
  0x5e   : > { %1432 = vmatpush1.bf16.msra.mxu0 %v13047_v28  ;;  %1485 = vmatpush1.bf16.msra.mxu1 %v13050_v29  ;;  %v10994_v28 = vcombine.low %v10968_v22, %v10968_v22  ;;  %v10996_v29 = vcombine.low %v10969_v23, %v10969_v23  ;;  %v13185_v22 = vld [vmem:[%s18650_s4 + $0x220] ss:$16 sps:$4 sm:$0xff]   ;;  %v13188_v23 = vld [vmem:[%s18650_s4 + $0x228] ss:$16 sps:$4 sm:$0xff]  }
  0x5f   : > { %1433 = vmatprep.subr.bf16.mxu0 %v13055_v30  ;;  %1486 = vmatprep.subr.bf16.mxu1 %v13058_v31  ;;  %v13123_v30 = vld [vmem:[%s18650_s4 + $0x4] ss:$16 sps:$4 sm:$0xff]   ;;  %v13126_v31 = vld [vmem:[%s18650_s4 + $0xc] ss:$16 sps:$4 sm:$0xff]  }
  0x61   : > { %10880 = vmatmul.mubr.msk.bf16.gmra.mrb[4].mxu0 %vm867_vm2, %v14895_v36  ;;  %10883 = vmatmul.mubr.msk.bf16.gmra.mrb[4].mxu1 %vm867_vm2, %v14895_v36 }
  0x62   : > { %1434 = vmatpush1.bf16.msra.mxu0 %v13053_v32  ;;  %1487 = vmatpush1.bf16.msra.mxu1 %v13056_v34  ;;  %v1735_v32 = vsel %vm874_vm0, %v10994_v28, 0  ;;  %v1741_v34 = vsel %vm874_vm0, %v10996_v29, 0  ;;  %v13194_v28 = vld [vmem:[%s18650_s4 + $0x248] ss:$16 sps:$4 sm:$0xff]  }
  0x63   : > { %1435 = vmatprep.subr.bf16.mxu0 %v13061_v35  ;;  %1488 = vmatprep.subr.bf16.mxu1 %v13064_v37  ;;  %v13121_v35 = vld [vmem:[%s18650_s4] ss:$16 sps:$4 sm:$0xff]   ;;  %v13124_v37 = vld [vmem:[%s18650_s4 + $0x8] ss:$16 sps:$4 sm:$0xff]  }
  0x64   : > { %1461 = vmatprep.mubr.bf16.mxu0 %v14641_v2  ;;  %1514 = vmatprep.mubr.bf16.mxu1 %v14641_v2 }
  0x66   : > { %1436 = vmatpush1.bf16.msra.mxu0 %v13059_v38  ;;  %1489 = vmatpush1.bf16.msra.mxu1 %v13062_v39  ;;  %v13129_v38 = vld [vmem:[%s18650_s4 + $0x24] ss:$16 sps:$4 sm:$0xff]   ;;  %v13132_v39 = vld [vmem:[%s18650_s4 + $0x2c] ss:$16 sps:$4 sm:$0xff]  }
  0x67   : > { %1437 = vmatprep.subr.bf16.mxu0 %v13067_v40  ;;  %1490 = vmatprep.subr.bf16.mxu1 %v13070_v41  ;;  %v13127_v40 = vld [vmem:[%s18650_s4 + $0x20] ss:$16 sps:$4 sm:$0xff]   ;;  %v13130_v41 = vld [vmem:[%s18650_s4 + $0x28] ss:$16 sps:$4 sm:$0xff]  }
  0x6a   : > { %1438 = vmatpush1.bf16.msra.mxu0 %v13065_v42  ;;  %1491 = vmatpush1.bf16.msra.mxu1 %v13068_v43  ;;  %v13135_v42 = vld [vmem:[%s18650_s4 + $0x44] ss:$16 sps:$4 sm:$0xff]   ;;  %v13138_v43 = vld [vmem:[%s18650_s4 + $0x4c] ss:$16 sps:$4 sm:$0xff]  }
  0x6b   : > { %1439 = vmatprep.subr.bf16.mxu0 %v13073_v44  ;;  %1492 = vmatprep.subr.bf16.mxu1 %v13076_v45  ;;  %v13133_v44 = vld [vmem:[%s18650_s4 + $0x40] ss:$16 sps:$4 sm:$0xff]   ;;  %v13141_v45 = vld [vmem:[%s18650_s4 + $0x64] ss:$16 sps:$4 sm:$0xff]  }
  0x6e   : > { %1440 = vmatpush1.bf16.msra.mxu0 %v13071_v48  ;;  %1493 = vmatpush1.bf16.msra.mxu1 %v13074_v50  ;;  %v13142_v48 = vld [vmem:[%s18650_s4 + $0x68] ss:$16 sps:$4 sm:$0xff]   ;;  %v13147_v50 = vld [vmem:[%s18650_s4 + $0x84] ss:$16 sps:$4 sm:$0xff]  }
  0x6f   : > { %10938 = vmatprep.subr.msk.bf16.mxu0 %vm874_vm0, %v10935_v51  ;;  %10941 = vmatprep.subr.msk.bf16.mxu1 %vm874_vm0, %v10937_v52  ;;  %v13150_v51 = vld [vmem:[%s18650_s4 + $0x8c] ss:$16 sps:$4 sm:$0xff]   ;;  %v13145_v52 = vld [vmem:[%s18650_s4 + $0x80] ss:$16 sps:$4 sm:$0xff]  }
  0x72   : > { %1442 = vmatpush1.bf16.msra.mxu0 %v1418_v58  ;;  %1495 = vmatpush1.bf16.msra.mxu1 %v1424_v60  ;;  %v13154_v58 = vld [vmem:[%s18650_s4 + $0xa8] ss:$16 sps:$4 sm:$0xff]   ;;  %v11029_v60 = vcombine.high %v1575_v55, %v1575_v55 }
  0x73   : > { %1746 = vmatprep.subr.bf16.mxu0 %v13083_v57  ;;  %1799 = vmatprep.subr.bf16.mxu1 %v13086_v61  ;;  %v13151_v57 = vld [vmem:[%s18650_s4 + $0xa0] ss:$16 sps:$4 sm:$0xff]   ;;  %v11031_v61 = vcombine.high %v1576_v56, %v1576_v56 }
  0x75   : > { %10939 = vmatmul.mubr.msk.bf16.vlgmr.msra.gmra.mrb[0].mxu0 %vm867_vm2, %v15112_v62  ;;  %10942 = vmatmul.mubr.msk.bf16.vlgmr.msra.gmra.mrb[0].mxu1 %vm867_vm2, %v15112_v62 }
  0x76   : > { %1747 = vmatpush1.bf16.msra.mxu0 %v13081_v63  ;;  %1800 = vmatpush1.bf16.msra.mxu1 %v13084_v0  ;;  %v11028_v63 = vcombine.low %v1575_v55, %v1575_v55  ;;  %v11030_v0 = vcombine.low %v1576_v56, %v1576_v56 }
  0x77   : > { %1748 = vmatprep.subr.bf16.mxu0 %v13089_v1  ;;  %1801 = vmatprep.subr.bf16.mxu1 %v13092_v3  ;;  %v13163_v1 = vld [vmem:[%s18650_s4 + $0x1a4] ss:$16 sps:$4 sm:$0xff]   ;;  %v13166_v3 = vld [vmem:[%s18650_s4 + $0x1ac] ss:$16 sps:$4 sm:$0xff]  }
  0x78   : > { %1471 = vmatprep.mubr.bf16.mxu0 %v14641_v2  ;;  %1524 = vmatprep.mubr.bf16.mxu1 %v14641_v2 }
  0x7a   : > { %1749 = vmatpush1.bf16.msra.mxu0 %v13087_v4  ;;  %1802 = vmatpush1.bf16.msra.mxu1 %v13090_v5  ;;  %v1983_v4 = vsel %vm874_vm0, %v11028_v63, 0  ;;  %v1989_v5 = vsel %vm874_vm0, %v11030_v0, 0 }
  0x7b   : > { %1750 = vmatprep.subr.bf16.mxu0 %v13095_v8  ;;  %1803 = vmatprep.subr.bf16.mxu1 %v13098_v9  ;;  %v13164_v8 = vld [vmem:[%s18650_s4 + $0x1a8] ss:$16 sps:$4 sm:$0xff]   ;;  %v13169_v9 = vld [vmem:[%s18650_s4 + $0x1c4] ss:$16 sps:$4 sm:$0xff]  }
  0x7d   : > { %10940 = vmatmul.mubr.msk.bf16.gmra.mrb[4].mxu0 %vm867_vm2, %v15152_v11  ;;  %10943 = vmatmul.mubr.msk.bf16.gmra.mrb[4].mxu1 %vm867_vm2, %v15152_v11 }
  0x7e   : > { %1751 = vmatpush1.bf16.msra.mxu0 %v13093_v10  ;;  %1804 = vmatpush1.bf16.msra.mxu1 %v13096_v59  ;;  %v13172_v10 = vld [vmem:[%s18650_s4 + $0x1cc] ss:$16 sps:$4 sm:$0xff]   ;;  %v13167_v59 = vld [vmem:[%s18650_s4 + $0x1c0] ss:$16 sps:$4 sm:$0xff]  }
  0x7f   : > { %1752 = vmatprep.subr.bf16.mxu0 %v13101_v12  ;;  %1805 = vmatprep.subr.bf16.mxu1 %v13104_v13  ;;  %v13170_v12 = vld [vmem:[%s18650_s4 + $0x1c8] ss:$16 sps:$4 sm:$0xff]   ;;  %v13175_v13 = vld [vmem:[%s18650_s4 + $0x1e4] ss:$16 sps:$4 sm:$0xff]  }
  0x80   : > { %1778 = vmatprep.mubr.bf16.mxu0 %v14641_v2  ;;  %1831 = vmatprep.mubr.bf16.mxu1 %v14641_v2 }
  0x82   : > { %1753 = vmatpush1.bf16.msra.mxu0 %v13099_v14  ;;  %1806 = vmatpush1.bf16.msra.mxu1 %v13102_v15  ;;  %v13178_v14 = vld [vmem:[%s18650_s4 + $0x1ec] ss:$16 sps:$4 sm:$0xff]   ;;  %v13173_v15 = vld [vmem:[%s18650_s4 + $0x1e0] ss:$16 sps:$4 sm:$0xff]  }
  0x83   : > { %1754 = vmatprep.subr.bf16.mxu0 %v13107_v16  ;;  %1807 = vmatprep.subr.bf16.mxu1 %v13110_v17  ;;  %v13181_v16 = vld [vmem:[%s18650_s4 + $0x204] ss:$16 sps:$4 sm:$0xff]   ;;  %v13184_v17 = vld [vmem:[%s18650_s4 + $0x20c] ss:$16 sps:$4 sm:$0xff]  }
  0x86   : > { %1755 = vmatpush1.bf16.msra.mxu0 %v13105_v18  ;;  %1808 = vmatpush1.bf16.msra.mxu1 %v13108_v19  ;;  %v13179_v18 = vld [vmem:[%s18650_s4 + $0x200] ss:$16 sps:$4 sm:$0xff]   ;;  %v13182_v19 = vld [vmem:[%s18650_s4 + $0x208] ss:$16 sps:$4 sm:$0xff]  }
  0x87   : > { %1756 = vmatprep.subr.bf16.mxu0 %v13113_v20  ;;  %1809 = vmatprep.subr.bf16.mxu1 %v13116_v21  ;;  %v13187_v20 = vld [vmem:[%s18650_s4 + $0x224] ss:$16 sps:$4 sm:$0xff]   ;;  %v13190_v21 = vld [vmem:[%s18650_s4 + $0x22c] ss:$16 sps:$4 sm:$0xff]  }
  0x8a   : > { %1757 = vmatpush1.bf16.msra.mxu0 %v13111_v24  ;;  %1810 = vmatpush1.bf16.msra.mxu1 %v13114_v25  ;;  %v13196_v24 = vld [vmem:[%s18650_s4 + $0x24c] ss:$16 sps:$4 sm:$0xff]   ;;  %v11062_v25 = vld [vmem:[%s18650_s4 + $0x260] sm:$0x77] }
  0x8b   : > { %10998 = vmatprep.subr.msk.bf16.mxu0 %vm874_vm0, %v10995_v26  ;;  %11001 = vmatprep.subr.msk.bf16.mxu1 %vm874_vm0, %v10997_v27  ;;  %v11063_v26 = vld [vmem:[%s18650_s4 + $0x268] sm:$0x77]  ;;  %v13191_v27 = vld [vmem:[%s18650_s4 + $0x240] ss:$16 sps:$4 sm:$0xff]   ;;  %v11089_v29 = vcombine.high %v11062_v25, %v11062_v25 }
  0x8e   : > { %1759 = vmatpush1.bf16.msra.mxu0 %v1735_v32  ;;  %1812 = vmatpush1.bf16.msra.mxu1 %v1741_v34  ;;  %v11090_v32 = vcombine.low %v11063_v26, %v11063_v26 }
  0x8f   : > { %1994 = vmatprep.subr.bf16.mxu0 %v13123_v30  ;;  %2047 = vmatprep.subr.bf16.mxu1 %v13126_v31  ;;  %v11091_v30 = vcombine.high %v11063_v26, %v11063_v26  ;;  %v11088_v31 = vcombine.low %v11062_v25, %v11062_v25 }
  0x91   : > { %10999 = vmatmul.mubr.msk.bf16.vlgmr.msra.gmra.mrb[8].mxu0 %vm867_vm2, %v14917_v49  ;;  %11002 = vmatmul.mubr.msk.bf16.vlgmr.msra.gmra.mrb[8].mxu1 %vm867_vm2, %v14917_v49  ;;  %v13136_v49 = vld [vmem:[%s18650_s4 + $0x48] ss:$16 sps:$4 sm:$0xff]   ;;  %v2258_v34 = vsel %vm874_vm0, %v11088_v31, 0 }
  0x92   : > { %1995 = vmatpush1.bf16.msra.mxu0 %v13121_v35  ;;  %2048 = vmatpush1.bf16.msra.mxu1 %v13124_v37  ;;  %v2264_v35 = vsel %vm874_vm0, %v11090_v32, 0 }
  0x93   : > { %1996 = vmatprep.subr.bf16.mxu0 %v13129_v38  ;;  %2049 = vmatprep.subr.bf16.mxu1 %v13132_v39 }
  0x94   : > { %1788 = vmatprep.mubr.bf16.mxu0 %v14641_v2  ;;  %1841 = vmatprep.mubr.bf16.mxu1 %v14641_v2 }
  0x96   : > { %1997 = vmatpush1.bf16.msra.mxu0 %v13127_v40  ;;  %2050 = vmatpush1.bf16.msra.mxu1 %v13130_v41 }
  0x97   : > { %1998 = vmatprep.subr.bf16.mxu0 %v13135_v42  ;;  %2051 = vmatprep.subr.bf16.mxu1 %v13138_v43 }
  0x99   : > { %11000 = vmatmul.mubr.msk.bf16.gmra.mrb[12].mxu0 %vm867_vm2, %v14973_v7  ;;  %11003 = vmatmul.mubr.msk.bf16.gmra.mrb[12].mxu1 %vm867_vm2, %v14973_v7  ;;  %v13153_v7 = vld [vmem:[%s18650_s4 + $0xa4] ss:$16 sps:$4 sm:$0xff]  }
  0x9a   : > { %1999 = vmatpush1.bf16.msra.mxu0 %v13133_v44  ;;  %2052 = vmatpush1.bf16.msra.mxu1 %v13136_v49 }
  0x9b   : > { %2000 = vmatprep.subr.bf16.mxu0 %v13141_v45  ;;  %2053 = vmatprep.subr.bf16.mxu1 %v13144_v46 }
  0x9c   : > { %2026 = vmatprep.mubr.bf16.mxu0 %v14641_v2  ;;  %2079 = vmatprep.mubr.bf16.mxu1 %v14641_v2 }
  0x9e   : > { %2001 = vmatpush1.bf16.msra.mxu0 %v13139_v47  ;;  %2054 = vmatpush1.bf16.msra.mxu1 %v13142_v48 }
  0x9f   : > { %2002 = vmatprep.subr.bf16.mxu0 %v13147_v50  ;;  %2055 = vmatprep.subr.bf16.mxu1 %v13150_v51  ;;  %v2409_v51 = vlaneseq }
  0xa2   : > { %2003 = vmatpush1.bf16.msra.mxu0 %v13145_v52  ;;  %2056 = vmatpush1.bf16.msra.mxu1 %v13148_v53  ;;  %v2410_v52 = vshrl.u32 %v2409_v51, 7  ;;  %v2407_v53 = vld [vmem:[%s18651_s21] sm:$0xf]  ;;  %s14581_s21 = sshll.u32 %s14643_s3, 4  ;;  %s14582_s21 = int_to_ptr.vmem [resolvable:$false] %s14581_s21 }
  0xa3   : > { %2004 = vmatprep.subr.bf16.mxu0 %v13153_v7  ;;  %2057 = vmatprep.subr.bf16.mxu1 %v13156_v54 }
  0xa4   : > { %v15425_v7 = vsub.s32 0, %v2410_v52  ;;  %v15427_v54 = vsub.s32 2, %v2410_v52  ;;  %v15429_v55 = vsub.s32 1, %v2410_v52  ;;  %v15431_v56 = vsub.s32 3, %v2410_v52 }
  0xa6   : > { %2005 = vmatpush1.bf16.msra.mxu0 %v13151_v57  ;;  %2058 = vmatpush1.bf16.msra.mxu1 %v13154_v58  ;;  %v15434_v57 = vrot.slane %v2407_v53, %v15425_v7  ;;  %v15437_v58 = vrot.slane %v2407_v53, %v15427_v54  ;;  %v15440_v63 = vrot.slane %v2407_v53, %v15429_v55 }
  0xa7   : > { %11032 = vmatprep.subr.msk.bf16.mxu0 %vm874_vm0, %v11029_v60  ;;  %11035 = vmatprep.subr.msk.bf16.mxu1 %vm874_vm0, %v11031_v61  ;;  %v15443_v0 = vrot.slane %v2407_v53, %v15431_v56 }
  0xaa   : > { %2007 = vmatpush1.bf16.msra.mxu0 %v1983_v4  ;;  %2060 = vmatpush1.bf16.msra.mxu1 %v1989_v5 }
  0xab   : > { %2269 = vmatprep.subr.bf16.mxu0 %v13163_v1  ;;  %2322 = vmatprep.subr.bf16.mxu1 %v13166_v3 }
  0xad   : > { %11033 = vmatmul.mubr.msk.bf16.vlgmr.msra.gmra.mrb[8].mxu0 %vm867_vm2, %v14893_v33  ;;  %11036 = vmatmul.mubr.msk.bf16.vlgmr.msra.gmra.mrb[8].mxu1 %vm867_vm2, %v14893_v33  ;;  %v13176_v33 = vld [vmem:[%s18650_s4 + $0x1e8] ss:$16 sps:$4 sm:$0xff]  }
  0xae   : > { %2270 = vmatpush1.bf16.msra.mxu0 %v13161_v6  ;;  %2323 = vmatpush1.bf16.msra.mxu1 %v13164_v8 }
  0xaf   : > { %2271 = vmatprep.subr.bf16.mxu0 %v13169_v9  ;;  %2324 = vmatprep.subr.bf16.mxu1 %v13172_v10 }
  0xb0   : > { %2036 = vmatprep.mubr.bf16.mxu0 %v14641_v2  ;;  %2089 = vmatprep.mubr.bf16.mxu1 %v14641_v2 }
  0xb2   : > { %2272 = vmatpush1.bf16.msra.mxu0 %v13167_v59  ;;  %2325 = vmatpush1.bf16.msra.mxu1 %v13170_v12 }
  0xb3   : > { %2273 = vmatprep.subr.bf16.mxu0 %v13175_v13  ;;  %2326 = vmatprep.subr.bf16.mxu1 %v13178_v14 }
  0xb5   : > { %11034 = vmatmul.mubr.msk.bf16.gmra.mrb[12].mxu0 %vm867_vm2, %v14895_v36  ;;  %11037 = vmatmul.mubr.msk.bf16.gmra.mrb[12].mxu1 %vm867_vm2, %v14895_v36  ;;  %v13193_v36 = vld [vmem:[%s18650_s4 + $0x244] ss:$16 sps:$4 sm:$0xff]   ;;  %s14583_s4 = scalar_lea.vmem %s14582_s21, 32 }
  0xb6   : > { %2274 = vmatpush1.bf16.msra.mxu0 %v13173_v15  ;;  %2327 = vmatpush1.bf16.msra.mxu1 %v13176_v33 }
  0xb7   : > { %2275 = vmatprep.subr.bf16.mxu0 %v13181_v16  ;;  %2328 = vmatprep.subr.bf16.mxu1 %v13184_v17 }
  0xb8   : > { %2301 = vmatprep.mubr.bf16.mxu0 %v14641_v2  ;;  %2354 = vmatprep.mubr.bf16.mxu1 %v14641_v2 }
  0xba   : > { %2276 = vmatpush1.bf16.msra.mxu0 %v13179_v18  ;;  %2329 = vmatpush1.bf16.msra.mxu1 %v13182_v19 }
  0xbb   : > { %2277 = vmatprep.subr.bf16.mxu0 %v13187_v20  ;;  %2330 = vmatprep.subr.bf16.mxu1 %v13190_v21 }
  0xbe   : > { %2278 = vmatpush1.bf16.msra.mxu0 %v13185_v22  ;;  %2331 = vmatpush1.bf16.msra.mxu1 %v13188_v23 }
  0xbf   : > { %2279 = vmatprep.subr.bf16.mxu0 %v13193_v36  ;;  %2332 = vmatprep.subr.bf16.mxu1 %v13196_v24 }
  0xc2   : > { %2280 = vmatpush1.bf16.msra.mxu0 %v13191_v27  ;;  %2333 = vmatpush1.bf16.msra.mxu1 %v13194_v28 }
  0xc3   : > { %11092 = vmatprep.subr.msk.bf16.mxu0 %vm874_vm0, %v11089_v29  ;;  %11095 = vmatprep.subr.msk.bf16.mxu1 %vm874_vm0, %v11091_v30 }
  0xc6   : > { %2282 = vmatpush1.bf16.msra.mxu0 %v2258_v34  ;;  %2335 = vmatpush1.bf16.msra.mxu1 %v2264_v35 }
  0xc9   : > { %11093 = vmatmul.mubr.msk.bf16.vlgmr.msra.gmra.mrb[8].mxu0 %vm867_vm2, %v15112_v62  ;;  %11096 = vmatmul.mubr.msk.bf16.vlgmr.msra.gmra.mrb[8].mxu1 %vm867_vm2, %v15112_v62 }
  0xca   : > { %2311 = vmatprep.mubr.bf16.mxu0 %v14641_v2  ;;  %2364 = vmatprep.mubr.bf16.mxu1 %v14641_v2 }
  0xd1   : > { %11094 = vmatmul.mubr.msk.bf16.gmra.mrb[12].mxu0 %vm867_vm2, %v15152_v11  ;;  %11097 = vmatmul.mubr.msk.bf16.gmra.mrb[12].mxu1 %vm867_vm2, %v15152_v11 }
  0xd2   : > { %2512 = vmatprep.mubr.bf16.mxu0 %v14641_v2  ;;  %2555 = vmatprep.mubr.bf16.mxu1 %v14641_v2 }
 0x148   : > { %v1463_v37 = vpop.f32.mrb[0].mxu0  ;;  %v1516_v38 = vpop.f32.mrb[0].mxu1 }
 0x149   : > { %v1465_v39 = vpop.f32.mrb[1].mxu0  ;;  %v1518_v40 = vpop.f32.mrb[1].mxu1 }
 0x14a   : > { %v1467_v41 = vpop.f32.mrb[2].mxu0  ;;  %v1520_v62 = vpop.f32.mrb[2].mxu1 }
 0x14b   : > { %v1469_v42 = vpop.f32.mrb[3].mxu0  ;;  %v1522_v43 = vpop.f32.mrb[3].mxu1 }
 0x150   : > { %v15406_v44 = vpop.f32.mrb[4].mxu0  ;;  %v15408_v49 = vpop.f32.mrb[4].mxu1 }
 0x151   : > { %v15410_v45 = vpop.f32.mrb[5].mxu0  ;;  %v15412_v46 = vpop.f32.mrb[5].mxu1 }
 0x152   : > { %v15414_v11 = vpop.f32.mrb[6].mxu0  ;;  %v15416_v47 = vpop.f32.mrb[6].mxu1 }
 0x153   : > { %v15418_v48 = vpop.f32.mrb[7].mxu0  ;;  %v15420_v50 = vpop.f32.mrb[7].mxu1 }
 0x19c   : > { %v2303_v60 = vpop.f32.mrb[8].mxu0  ;;  %v2356_v61 = vpop.f32.mrb[8].mxu1 }
 0x19d   : > { %v2391_v1 = vmax.f32 %v1463_v37, %v2303_v60  ;;  %v2393_v3 = vmax.f32 %v1516_v38, %v2356_v61  ;;  %v2305_v4 = vpop.f32.mrb[9].mxu0  ;;  %v2358_v5 = vpop.f32.mrb[9].mxu1 }
 0x19e   : > { %v2392_v6 = vmax.f32 %v1465_v39, %v2305_v4  ;;  %v2394_v8 = vmax.f32 %v1518_v40, %v2358_v5  ;;  %v2307_v9 = vpop.f32.mrb[10].mxu0  ;;  %v2360_v10 = vpop.f32.mrb[10].mxu1 }
 0x19f   : > { %v2429_v59 = vadd.f32 %v15434_v57, %v2391_v1  ;;  %v2431_v12 = vadd.f32 %v15437_v58, %v2393_v3  ;;  %v2395_v13 = vmax.f32 %v1467_v41, %v2307_v9  ;;  %v2397_v14 = vmax.f32 %v1520_v62, %v2360_v10  ;;  %v2309_v15 = vpop.f32.mrb[11].mxu0  ;;  %v2362_v33 = vpop.f32.mrb[11].mxu1 }
 0x1a0   : > { %v2430_v16 = vadd.f32 %v15440_v63, %v2392_v6  ;;  %v2432_v17 = vadd.f32 %v15443_v0, %v2394_v8  ;;  %v2396_v18 = vmax.f32 %v1469_v42, %v2309_v15  ;;  %v2398_v19 = vmax.f32 %v1522_v43, %v2362_v33 }
 0x1a1   : > { %v2445_v20 = vmax.f32 %v2429_v59, 0.0  ;;  %v2447_v21 = vmax.f32 %v2431_v12, 0.0  ;;  %v2433_v22 = vadd.f32 %v15434_v57, %v2395_v13  ;;  %v2435_v23 = vadd.f32 %v15437_v58, %v2397_v14 }
 0x1a2   : > { %v2446_v36 = vmax.f32 %v2430_v16, 0.0  ;;  %v2448_v24 = vmax.f32 %v2432_v17, 0.0  ;;  %v2434_v25 = vadd.f32 %v15440_v63, %v2396_v18  ;;  %v2436_v26 = vadd.f32 %v15443_v0, %v2398_v19  ;;  %v13203_v17 = vld [vmem:[%s18604_s6 + $0x200] ss:$8 sps:$4 sm:$0xff]   ;;  %v13211_v19 = vld [vmem:[%s18604_s6 + $0x214] ss:$8 sps:$4 sm:$0xff]  }
 0x1a3   : > { %v2449_v27 = vmax.f32 %v2433_v22, 0.0  ;;  %v2451_v28 = vmax.f32 %v2435_v23, 0.0  ;;  %v13206_v18 = vld [vmem:[%s18605_s7 + $0x200] ss:$8 sps:$4 sm:$0xff]   ;;  %v13212_v22 = vld [vmem:[%s18605_s7 + $0x210] ss:$8 sps:$4 sm:$0xff]  }
 0x1a4   : > { %v2450_v29 = vmax.f32 %v2434_v25, 0.0  ;;  %v2452_v30 = vmax.f32 %v2436_v26, 0.0  ;;  %v2313_v31 = vpop.f32.mrb[12].mxu0  ;;  %v2366_v32 = vpop.f32.mrb[12].mxu1  ;;  %v13217_v23 = vld [vmem:[%s18604_s6 + $0x224] ss:$8 sps:$4 sm:$0xff]  }
 0x1a5   : > { %v2463_v34 = vpack.c.bf16 %v2449_v27, %v2445_v20  ;;  %v2465_v35 = vpack.c.bf16 %v2451_v28, %v2447_v21  ;;  %v2399_v37 = vmax.f32 %v15406_v44, %v2313_v31  ;;  %v2401_v38 = vmax.f32 %v15408_v49, %v2366_v32  ;;  %v2315_v39 = vpop.f32.mrb[13].mxu0  ;;  %v2368_v40 = vpop.f32.mrb[13].mxu1  ;;  %v13214_v20 = vld [vmem:[%s18605_s7 + $0x214] ss:$8 sps:$4 sm:$0xff]   ;;  %v13209_v21 = vld [vmem:[%s18604_s6 + $0x210] ss:$8 sps:$4 sm:$0xff]  }
 0x1a6   : > { %v2400_v41 = vmax.f32 %v15410_v45, %v2315_v39  ;;  %v2402_v62 = vmax.f32 %v15412_v46, %v2368_v40  ;;  %v2317_v42 = vpop.f32.mrb[14].mxu0  ;;  %v2370_v43 = vpop.f32.mrb[14].mxu1  ;;  %v2464_v51 = vpack.c.bf16 %v2450_v29, %v2446_v36  ;;  %v2466_v52 = vpack.c.bf16 %v2452_v30, %v2448_v24  ;;  %v13220_v36 = vld [vmem:[%s18605_s7 + $0x224] ss:$8 sps:$4 sm:$0xff]   ;;  %v13215_v24 = vld [vmem:[%s18604_s6 + $0x220] ss:$8 sps:$4 sm:$0xff]  }
 0x1a7   : > { %v2437_v53 = vadd.f32 %v15434_v57, %v2399_v37  ;;  %v2439_v60 = vadd.f32 %v15437_v58, %v2401_v38  ;;  %v2403_v61 = vmax.f32 %v15414_v11, %v2317_v42  ;;  %v2405_v44 = vmax.f32 %v15416_v47, %v2370_v43  ;;  %v2319_v1 = vpop.f32.mrb[15].mxu0  ;;  %v2372_v49 = vpop.f32.mrb[15].mxu1  ;;  %v13218_v25 = vld [vmem:[%s18605_s7 + $0x220] ss:$8 sps:$4 sm:$0xff]   ;;  %v13223_v26 = vld [vmem:[%s18604_s6 + $0x234] ss:$8 sps:$4 sm:$0xff]  }
 0x1a8   : > { %v2438_v3 = vadd.f32 %v15440_v63, %v2400_v41  ;;  %v2440_v45 = vadd.f32 %v15443_v0, %v2402_v62  ;;  %v2404_v46 = vmax.f32 %v15418_v48, %v2319_v1  ;;  %v2406_v4 = vmax.f32 %v15420_v50, %v2372_v49  ;;  %2480 = vmatprep.subr.bf16.mxu0 %v2464_v51  ;;  %v13226_v27 = vld [vmem:[%s18605_s7 + $0x234] ss:$8 sps:$4 sm:$0xff]   ;;  %v13221_v28 = vld [vmem:[%s18604_s6 + $0x230] ss:$8 sps:$4 sm:$0xff]   ;;  %v13229_v30 = vld [vmem:[%s18604_s6 + $0x244] ss:$8 sps:$4 sm:$0xff]  }
 0x1a9   : > { %v2453_v5 = vmax.f32 %v2437_v53, 0.0  ;;  %v2455_v6 = vmax.f32 %v2439_v60, 0.0  ;;  %v2441_v8 = vadd.f32 %v15434_v57, %v2403_v61  ;;  %v2443_v9 = vadd.f32 %v15437_v58, %v2405_v44  ;;  %2523 = vmatprep.subr.bf16.mxu1 %v2466_v52  ;;  %2481 = vmatpush1.bf16.msra.mxu0 %v2463_v34  ;;  %v13201_v57 = vld [vmem:[%s18652_s28] sm:$0xff]   ;;  %v13224_v29 = vld [vmem:[%s18605_s7 + $0x230] ss:$8 sps:$4 sm:$0xff]   ;;  %s14642_s28 = smov 64  }
 0x1aa   : > { %v2454_v11 = vmax.f32 %v2438_v3, 0.0  ;;  %v2456_v47 = vmax.f32 %v2440_v45, 0.0  ;;  %v2442_v10 = vadd.f32 %v15440_v63, %v2404_v46  ;;  %v2444_v59 = vadd.f32 %v15443_v0, %v2406_v4  ;;  %2524 = vmatpush1.bf16.msra.mxu1 %v2465_v35  ;;  %v13205_v58 = vld [vmem:[%s18604_s6 + $0x204] ss:$8 sps:$4 sm:$0xff]   ;;  %v13227_v32 = vld [vmem:[%s18604_s6 + $0x240] ss:$8 sps:$4 sm:$0xff]  }
 0x1ab   : > { %v2457_v12 = vmax.f32 %v2441_v8, 0.0  ;;  %v2459_v48 = vmax.f32 %v2443_v9, 0.0  ;;  %v13208_v63 = vld [vmem:[%s18605_s7 + $0x204] ss:$8 sps:$4 sm:$0xff]   ;;  %v13238_v37 = vld [vmem:[%s18605_s7 + $0x254] ss:$8 sps:$4 sm:$0xff]  }
 0x1ac   : > { %v2458_v13 = vmax.f32 %v2442_v10, 0.0  ;;  %v2460_v50 = vmax.f32 %v2444_v59, 0.0  ;;  %v13202_v0 = vld [vmem:[%s18653_s26] sm:$0xff]   ;;  %v13233_v38 = vld [vmem:[%s18604_s6 + $0x250] ss:$8 sps:$4 sm:$0xff]   ;;  %s647_s26 = sand.u32 1, %s14631_s25  }
 0x1ad   : > { %v2467_v14 = vpack.c.bf16 %v2457_v12, %v2453_v5  ;;  %v2469_v15 = vpack.c.bf16 %v2459_v48, %v2455_v6  ;;  %v13232_v31 = vld [vmem:[%s18605_s7 + $0x244] ss:$8 sps:$4 sm:$0xff]   ;;  %v13236_v39 = vld [vmem:[%s18605_s7 + $0x250] ss:$8 sps:$4 sm:$0xff]   ;;  %v13239_v62 = vld [vmem:[%s18604_s6 + $0x260] ss:$8 sps:$4 sm:$0xff]  }
 0x1ae   : > { %v2468_v33 = vpack.c.bf16 %v2458_v13, %v2454_v11  ;;  %v2470_v16 = vpack.c.bf16 %v2460_v50, %v2456_v47  ;;  %v13241_v40 = vld [vmem:[%s18604_s6 + $0x264] ss:$8 sps:$4 sm:$0xff]   ;;  %v13242_v42 = vld [vmem:[%s18605_s7 + $0x260] ss:$8 sps:$4 sm:$0xff]   ;;  %v13247_v43 = vld [vmem:[%s18604_s6 + $0x274] ss:$8 sps:$4 sm:$0xff]  }
 0x1af   : > { %v13244_v41 = vld [vmem:[%s18605_s7 + $0x264] ss:$8 sps:$4 sm:$0xff]   ;;  %v13248_v53 = vld [vmem:[%s18605_s7 + $0x270] ss:$8 sps:$4 sm:$0xff]   ;;  %v13251_v44 = vld [vmem:[%s18604_s6 + $0x280] ss:$8 sps:$4 sm:$0xff]  }
 0x1b0   : > { %2482 = vmatprep.subr.bf16.mxu0 %v2468_v33  ;;  %2525 = vmatprep.subr.bf16.mxu1 %v2470_v16  ;;  %v13253_v60 = vld [vmem:[%s18604_s6 + $0x284] ss:$8 sps:$4 sm:$0xff]   ;;  %v13254_v1 = vld [vmem:[%s18605_s7 + $0x280] ss:$8 sps:$4 sm:$0xff]   ;;  %v13259_v49 = vld [vmem:[%s18604_s6 + $0x294] ss:$8 sps:$4 sm:$0xff]  }
 0x1b1   : > { %2483 = vmatpush1.bf16.msra.mxu0 %v2467_v14  ;;  %2526 = vmatpush1.bf16.msra.mxu1 %v2469_v15  ;;  %v13256_v61 = vld [vmem:[%s18605_s7 + $0x284] ss:$8 sps:$4 sm:$0xff]   ;;  %v13262_v3 = vld [vmem:[%s18605_s7 + $0x294] ss:$8 sps:$4 sm:$0xff]   ;;  %v13257_v45 = vld [vmem:[%s18604_s6 + $0x290] ss:$8 sps:$4 sm:$0xff]  }
 0x1b2   : > { %2576 = vmatprep.subr.bf16.mxu0 %v2464_v51  ;;  %2619 = vmatprep.subr.bf16.mxu1 %v2466_v52  ;;  %v13250_v51 = vld [vmem:[%s18605_s7 + $0x274] ss:$8 sps:$4 sm:$0xff]   ;;  %v13245_v52 = vld [vmem:[%s18604_s6 + $0x270] ss:$8 sps:$4 sm:$0xff]   ;;  %v13265_v4 = vld [vmem:[%s18604_s6 + $0x2a4] ss:$8 sps:$4 sm:$0xff]  }
 0x1b3   : > { %v13260_v46 = vld [vmem:[%s18605_s7 + $0x290] ss:$8 sps:$4 sm:$0xff]   ;;  %v13268_v5 = vld [vmem:[%s18605_s7 + $0x2a4] ss:$8 sps:$4 sm:$0xff]   ;;  %v13263_v6 = vld [vmem:[%s18604_s6 + $0x2a0] ss:$8 sps:$4 sm:$0xff]  }
 0x1b4   : > { %11099 = vmatmul.mubr.msk.bf16.vlgmr.msra.gmra.mrb[16].mxu0 %vm2476_vm4, %v13201_v57  ;;  %11100 = vmatmul.mubr.msk.bf16.vlgmr.msra.gmra.mrb[16].mxu1 %vm2476_vm4, %v13201_v57  ;;  %v13266_v8 = vld [vmem:[%s18605_s7 + $0x2a0] ss:$8 sps:$4 sm:$0xff]   ;;  %v13271_v9 = vld [vmem:[%s18604_s6 + $0x2b4] ss:$8 sps:$4 sm:$0xff]   ;;  %v13269_v47 = vld [vmem:[%s18604_s6 + $0x2b0] ss:$8 sps:$4 sm:$0xff]  }
 0x1b5   : > { %2577 = vmatpush1.bf16.msra.mxu0 %v2463_v34  ;;  %2620 = vmatpush1.bf16.msra.mxu1 %v2465_v35  ;;  %v13230_v34 = vld [vmem:[%s18605_s7 + $0x240] ss:$8 sps:$4 sm:$0xff]   ;;  %v13235_v35 = vld [vmem:[%s18604_s6 + $0x254] ss:$8 sps:$4 sm:$0xff]   ;;  %v13272_v10 = vld [vmem:[%s18605_s7 + $0x2b0] ss:$8 sps:$4 sm:$0xff]  }
 0x1b6   : > { %2578 = vmatprep.subr.bf16.mxu0 %v2468_v33  ;;  %2621 = vmatprep.subr.bf16.mxu1 %v2470_v16  ;;  %v13274_v11 = vld [vmem:[%s18605_s7 + $0x2b4] ss:$8 sps:$4 sm:$0xff]   ;;  %v13277_v59 = vld [vmem:[%s18604_s6 + $0x2c4] ss:$8 sps:$4 sm:$0xff]   ;;  %v13275_v12 = vld [vmem:[%s18604_s6 + $0x2c0] ss:$8 sps:$4 sm:$0xff]  }
 0x1b7   : > { %2608 = vmatprep.mubr.bf16.mxu0 %v14641_v2  ;;  %2651 = vmatprep.mubr.bf16.mxu1 %v14641_v2  ;;  %v13278_v48 = vld [vmem:[%s18605_s7 + $0x2c0] ss:$8 sps:$4 sm:$0xff]   ;;  %v13280_v13 = vld [vmem:[%s18605_s7 + $0x2c4] ss:$8 sps:$4 sm:$0xff]   ;;  %v13283_v50 = vld [vmem:[%s18604_s6 + $0x2d4] ss:$8 sps:$4 sm:$0xff]  }
 0x1b8   : > { %v13284_v33 = vld [vmem:[%s18605_s7 + $0x2d0] ss:$8 sps:$4 sm:$0xff]   ;;  %v13289_v16 = vld [vmem:[%s18604_s6 + $0x2e4] ss:$8 sps:$4 sm:$0xff]   ;;  %s10718_s27 = scalar_lea.sflag [#allocation3], %s647_s26 }
 0x1b9   : > { %2579 = vmatpush1.bf16.msra.mxu0 %v2467_v14  ;;  %2622 = vmatpush1.bf16.msra.mxu1 %v2469_v15  ;;  %v13286_v14 = vld [vmem:[%s18605_s7 + $0x2d4] ss:$8 sps:$4 sm:$0xff]   ;;  %v13281_v15 = vld [vmem:[%s18604_s6 + $0x2d0] ss:$8 sps:$4 sm:$0xff]   ;;  %v13292_v57 = vld [vmem:[%s18605_s7 + $0x2e4] ss:$8 sps:$4 sm:$0xff]  }
 0x1ba   : > { %3155 = vmatprep.subr.bf16.mxu0 %v13205_v58  ;;  %4583 = vmatprep.subr.bf16.mxu1 %v13208_v63  ;;  %v13287_v58 = vld [vmem:[%s18604_s6 + $0x2e0] ss:$8 sps:$4 sm:$0xff]  }
 0x1bb   : > { %v13290_v63 = vld [vmem:[%s18605_s7 + $0x2e0] ss:$8 sps:$4 sm:$0xff]  }
 0x1bc   : > { %11102 = vmatmul.mubr.msk.bf16.vlgmr.msra.gmra.mrb[20].mxu0 %vm2476_vm4, %v13202_v0  ;;  %11103 = vmatmul.mubr.msk.bf16.vlgmr.msra.gmra.mrb[20].mxu1 %vm2476_vm4, %v13202_v0  ;;  %v13295_v0 = vld [vmem:[%s18604_s6 + $0x2f4] ss:$8 sps:$4 sm:$0xff]  }
 0x1bd   : > { %3156 = vmatpush1.bf16.msra.mxu0 %v13203_v17  ;;  %4584 = vmatpush1.bf16.msra.mxu1 %v13206_v18  ;;  %v13298_v17 = vld [vmem:[%s18605_s7 + $0x2f4] ss:$8 sps:$4 sm:$0xff]   ;;  %v13293_v18 = vld [vmem:[%s18604_s6 + $0x2f0] ss:$8 sps:$4 sm:$0xff]  }
 0x1be   : > { %3157 = vmatprep.subr.bf16.mxu0 %v13211_v19  ;;  %4585 = vmatprep.subr.bf16.mxu1 %v13214_v20  ;;  %v13296_v19 = vld [vmem:[%s18605_s7 + $0x2f0] ss:$8 sps:$4 sm:$0xff]   ;;  %v13301_v20 = vld [vmem:[%s18604_s6 + $0x304] ss:$8 sps:$4 sm:$0xff]  }
 0x1c1   : > { %3158 = vmatpush1.bf16.msra.mxu0 %v13209_v21  ;;  %4586 = vmatpush1.bf16.msra.mxu1 %v13212_v22  ;;  %v13304_v21 = vld [vmem:[%s18605_s7 + $0x304] ss:$8 sps:$4 sm:$0xff]  }
 0x1c2   : > { %3159 = vmatprep.subr.bf16.mxu0 %v13217_v23  ;;  %4587 = vmatprep.subr.bf16.mxu1 %v13220_v36 }
 0x1c5   : > { %3160 = vmatpush1.bf16.msra.mxu0 %v13215_v24  ;;  %4588 = vmatpush1.bf16.msra.mxu1 %v13218_v25 }
 0x1c6   : > { %3161 = vmatprep.subr.bf16.mxu0 %v13223_v26  ;;  %4589 = vmatprep.subr.bf16.mxu1 %v13226_v27 }
 0x1c9   : > { %3162 = vmatpush1.bf16.msra.mxu0 %v13221_v28  ;;  %4590 = vmatpush1.bf16.msra.mxu1 %v13224_v29 }
 0x1ca   : > { %3163 = vmatprep.subr.bf16.mxu0 %v13229_v30  ;;  %4591 = vmatprep.subr.bf16.mxu1 %v13232_v31 }
 0x1cd   : > { %3164 = vmatpush1.bf16.msra.mxu0 %v13227_v32  ;;  %4592 = vmatpush1.bf16.msra.mxu1 %v13230_v34 }
 0x1ce   : > { %3165 = vmatprep.subr.bf16.mxu0 %v13235_v35  ;;  %4593 = vmatprep.subr.bf16.mxu1 %v13238_v37 }
 0x1d1   : > { %3166 = vmatpush1.bf16.msra.mxu0 %v13233_v38  ;;  %4594 = vmatpush1.bf16.msra.mxu1 %v13236_v39 }
 0x1d2   : > { %3167 = vmatprep.subr.bf16.mxu0 %v13241_v40  ;;  %4595 = vmatprep.subr.bf16.mxu1 %v13244_v41 }
 0x1d5   : > { %3168 = vmatpush1.bf16.msra.mxu0 %v13239_v62  ;;  %4596 = vmatpush1.bf16.msra.mxu1 %v13242_v42 }
 0x1d6   : > { %3169 = vmatprep.subr.bf16.mxu0 %v13247_v43  ;;  %4597 = vmatprep.subr.bf16.mxu1 %v13250_v51 }
 0x1d9   : > { %3170 = vmatpush1.bf16.msra.mxu0 %v13245_v52  ;;  %4598 = vmatpush1.bf16.msra.mxu1 %v13248_v53 }
 0x1da   : > { %3171 = vmatprep.subr.bf16.mxu0 %v13253_v60  ;;  %4599 = vmatprep.subr.bf16.mxu1 %v13256_v61 }
 0x1dd   : > { %3172 = vmatpush1.bf16.msra.mxu0 %v13251_v44  ;;  %4600 = vmatpush1.bf16.msra.mxu1 %v13254_v1 }
 0x1de   : > { %3173 = vmatprep.subr.bf16.mxu0 %v13259_v49  ;;  %4601 = vmatprep.subr.bf16.mxu1 %v13262_v3 }
 0x1e1   : > { %3174 = vmatpush1.bf16.msra.mxu0 %v13257_v45  ;;  %4602 = vmatpush1.bf16.msra.mxu1 %v13260_v46 }
 0x1e2   : > { %3175 = vmatprep.subr.bf16.mxu0 %v13265_v4  ;;  %4603 = vmatprep.subr.bf16.mxu1 %v13268_v5 }
 0x1e5   : > { %3176 = vmatpush1.bf16.msra.mxu0 %v13263_v6  ;;  %4604 = vmatpush1.bf16.msra.mxu1 %v13266_v8 }
 0x1e6   : > { %3177 = vmatprep.subr.bf16.mxu0 %v13271_v9  ;;  %4605 = vmatprep.subr.bf16.mxu1 %v13274_v11  ;;  %v13299_v11 = vld [vmem:[%s18604_s6 + $0x300] ss:$8 sps:$4 sm:$0xff]  }
 0x1e9   : > { %3178 = vmatpush1.bf16.msra.mxu0 %v13269_v47  ;;  %4606 = vmatpush1.bf16.msra.mxu1 %v13272_v10  ;;  %v13302_v47 = vld [vmem:[%s18605_s7 + $0x300] ss:$8 sps:$4 sm:$0xff]  }
 0x1ea   : > { %3179 = vmatprep.subr.bf16.mxu0 %v13277_v59  ;;  %4607 = vmatprep.subr.bf16.mxu1 %v13280_v13  ;;  %v13307_v59 = vld [vmem:[%s18604_s6 + $0x314] ss:$8 sps:$4 sm:$0xff]   ;;  %v13305_v13 = vld [vmem:[%s18604_s6 + $0x310] ss:$8 sps:$4 sm:$0xff]  }
 0x1ed   : > { %3180 = vmatpush1.bf16.msra.mxu0 %v13275_v12  ;;  %4608 = vmatpush1.bf16.msra.mxu1 %v13278_v48  ;;  %v13310_v12 = vld [vmem:[%s18605_s7 + $0x314] ss:$8 sps:$4 sm:$0xff]  }
 0x1ee   : > { %3181 = vmatprep.subr.bf16.mxu0 %v13283_v50  ;;  %4609 = vmatprep.subr.bf16.mxu1 %v13286_v14  ;;  %v13308_v50 = vld [vmem:[%s18605_s7 + $0x310] ss:$8 sps:$4 sm:$0xff]   ;;  %v13313_v14 = vld [vmem:[%s18604_s6 + $0x324] ss:$8 sps:$4 sm:$0xff]  }
 0x1f1   : > { %3182 = vmatpush1.bf16.msra.mxu0 %v13281_v15  ;;  %4610 = vmatpush1.bf16.msra.mxu1 %v13284_v33  ;;  %v13316_v15 = vld [vmem:[%s18605_s7 + $0x324] ss:$8 sps:$4 sm:$0xff]   ;;  %v13311_v33 = vld [vmem:[%s18604_s6 + $0x320] ss:$8 sps:$4 sm:$0xff]  }
 0x1f2   : > { %3183 = vmatprep.subr.bf16.mxu0 %v13289_v16  ;;  %4611 = vmatprep.subr.bf16.mxu1 %v13292_v57  ;;  %v13314_v16 = vld [vmem:[%s18605_s7 + $0x320] ss:$8 sps:$4 sm:$0xff]   ;;  %v13319_v57 = vld [vmem:[%s18604_s6 + $0x334] ss:$8 sps:$4 sm:$0xff]  }
 0x1f5   : > { %3184 = vmatpush1.bf16.msra.mxu0 %v13287_v58  ;;  %4612 = vmatpush1.bf16.msra.mxu1 %v13290_v63  ;;  %v13322_v58 = vld [vmem:[%s18605_s7 + $0x334] ss:$8 sps:$4 sm:$0xff]   ;;  %v13317_v63 = vld [vmem:[%s18604_s6 + $0x330] ss:$8 sps:$4 sm:$0xff]  }
 0x1f6   : > { %3185 = vmatprep.subr.bf16.mxu0 %v13295_v0  ;;  %4613 = vmatprep.subr.bf16.mxu1 %v13298_v17  ;;  %v13320_v0 = vld [vmem:[%s18605_s7 + $0x330] ss:$8 sps:$4 sm:$0xff]   ;;  %v13325_v17 = vld [vmem:[%s18604_s6 + $0x344] ss:$8 sps:$4 sm:$0xff]  }
 0x1f9   : > { %3186 = vmatpush1.bf16.msra.mxu0 %v13293_v18  ;;  %4614 = vmatpush1.bf16.msra.mxu1 %v13296_v19  ;;  %v13328_v18 = vld [vmem:[%s18605_s7 + $0x344] ss:$8 sps:$4 sm:$0xff]   ;;  %v13323_v19 = vld [vmem:[%s18604_s6 + $0x340] ss:$8 sps:$4 sm:$0xff]  }
 0x1fa   : > { %3198 = vmatprep.subr.bf16.mxu0 %v13301_v20  ;;  %4626 = vmatprep.subr.bf16.mxu1 %v13304_v21  ;;  %v13326_v20 = vld [vmem:[%s18605_s7 + $0x340] ss:$8 sps:$4 sm:$0xff]   ;;  %v13331_v21 = vld [vmem:[%s18604_s6 + $0x354] ss:$8 sps:$4 sm:$0xff]  }
 0x287   : > { %v2514_v22 = vpop.f32.mrb[16].mxu0  ;;  %v2557_v23 = vpop.f32.mrb[16].mxu1 }
 0x288   : > { %v2516_v36 = vpop.f32.mrb[17].mxu0  ;;  %v2559_v24 = vpop.f32.mrb[17].mxu1 }
 0x289   : > { %v2518_v25 = vpop.f32.mrb[18].mxu0  ;;  %v2561_v26 = vpop.f32.mrb[18].mxu1 }
 0x28a   : > { %v2520_v27 = vpop.f32.mrb[19].mxu0  ;;  %v2563_v28 = vpop.f32.mrb[19].mxu1 }
 0x28f   : > { %v2610_v29 = vpop.f32.mrb[20].mxu0  ;;  %v2653_v30 = vpop.f32.mrb[20].mxu1 }
 0x290   : > { %v2662_v31 = vmax.f32 %v2514_v22, %v2610_v29  ;;  %v2612_v32 = vpop.f32.mrb[21].mxu0  ;;  %v2664_v34 = vmax.f32 %v2557_v23, %v2653_v30  ;;  %v2655_v35 = vpop.f32.mrb[21].mxu1  ;;  %v13334_v22 = vld [vmem:[%s18605_s7 + $0x354] ss:$8 sps:$4 sm:$0xff]   ;;  %v13329_v23 = vld [vmem:[%s18604_s6 + $0x350] ss:$8 sps:$4 sm:$0xff]  }
 0x291   : > { %v2663_v37 = vmax.f32 %v2516_v36, %v2612_v32  ;;  %v2614_v38 = vpop.f32.mrb[22].mxu0  ;;  %v2665_v39 = vmax.f32 %v2559_v24, %v2655_v35  ;;  %v2657_v40 = vpop.f32.mrb[22].mxu1  ;;  %v13332_v36 = vld [vmem:[%s18605_s7 + $0x350] ss:$8 sps:$4 sm:$0xff]   ;;  %v13337_v24 = vld [vmem:[%s18604_s6 + $0x364] ss:$8 sps:$4 sm:$0xff]  }
 0x292   : > { %v2666_v41 = vmax.f32 %v2518_v25, %v2614_v38  ;;  %v2616_v62 = vpop.f32.mrb[23].mxu0  ;;  %v2668_v42 = vmax.f32 %v2561_v26, %v2657_v40  ;;  %v2659_v43 = vpop.f32.mrb[23].mxu1  ;;  %v13340_v25 = vld [vmem:[%s18605_s7 + $0x364] ss:$8 sps:$4 sm:$0xff]   ;;  %v13335_v26 = vld [vmem:[%s18604_s6 + $0x360] ss:$8 sps:$4 sm:$0xff]  }
 0x293   : > { %v2667_v51 = vmax.f32 %v2520_v27, %v2616_v62  ;;  %v2669_v52 = vmax.f32 %v2563_v28, %v2659_v43  ;;  %v13338_v27 = vld [vmem:[%s18605_s7 + $0x360] ss:$8 sps:$4 sm:$0xff]   ;;  %v13343_v28 = vld [vmem:[%s18604_s6 + $0x374] ss:$8 sps:$4 sm:$0xff]   ;;  %v13341_v30 = vld [vmem:[%s18604_s6 + $0x370] ss:$8 sps:$4 sm:$0xff]  }
 0x294   : > { %v15679_v53 = vpack.c.bf16 %v2666_v41, %v2662_v31  ;;  %v15681_v60 = vpack.c.bf16 %v2668_v42, %v2664_v34  ;;  %v13346_v29 = vld [vmem:[%s18605_s7 + $0x374] ss:$8 sps:$4 sm:$0xff]   ;;  %v13344_v31 = vld [vmem:[%s18605_s7 + $0x370] ss:$8 sps:$4 sm:$0xff]   ;;  %v13349_v32 = vld [vmem:[%s18604_s6 + $0x384] ss:$8 sps:$4 sm:$0xff]  }
 0x295   : > { %v15683_v61 = vpack.c.bf16 %v2667_v51, %v2663_v37  ;;  %v15685_v44 = vpack.c.bf16 %v2669_v52, %v2665_v39  ;;  %v13352_v34 = vld [vmem:[%s18605_s7 + $0x384] ss:$8 sps:$4 sm:$0xff]   ;;  %v13347_v35 = vld [vmem:[%s18604_s6 + $0x380] ss:$8 sps:$4 sm:$0xff]   ;;  %v13355_v38 = vld [vmem:[%s18604_s6 + $0x394] ss:$8 sps:$4 sm:$0xff]  }
 0x296   : > { %v2806_v1 = vshll.u32 %v15679_v53, 16  ;;  %v2804_v8 = vshrl.u32 %v15679_v53, 16  ;;  %v13350_v37 = vld [vmem:[%s18605_s7 + $0x380] ss:$8 sps:$4 sm:$0xff]   ;;  %v13358_v39 = vld [vmem:[%s18605_s7 + $0x394] ss:$8 sps:$4 sm:$0xff]  }
 0x297   : > { %v2813_v49 = vshll.u32 %v15683_v61, 16  ;;  %v2827_v3 = vshll.u32 %v15685_v44, 16  ;;  %v2811_v46 = vshrl.u32 %v15683_v61, 16  ;;  %v2825_v5 = vshrl.u32 %v15685_v44, 16  ;;  %v13353_v40 = vld [vmem:[%s18604_s6 + $0x390] ss:$8 sps:$4 sm:$0xff]  }
 0x298   : > { %v2808_v45 = vrot.slane %v2806_v1, 1  ;;  %v13356_v41 = vld [vmem:[%s18605_s7 + $0x390] ss:$8 sps:$4 sm:$0xff]   ;;  %v13361_v62 = vld [vmem:[%s18604_s6 + $0x3a4] ss:$8 sps:$4 sm:$0xff]  }
 0x299   : > { %v2815_v4 = vrot.slane %v2813_v49, 1  ;;  %v2829_v6 = vrot.slane %v2827_v3, 1  ;;  %v13364_v42 = vld [vmem:[%s18605_s7 + $0x3a4] ss:$8 sps:$4 sm:$0xff]   ;;  %v13359_v43 = vld [vmem:[%s18604_s6 + $0x3a0] ss:$8 sps:$4 sm:$0xff]  }
 0x29a   : > { %v2809_v10 = vor.u32 %v2808_v45, %v2804_v8  ;;  %v13362_v51 = vld [vmem:[%s18605_s7 + $0x3a0] ss:$8 sps:$4 sm:$0xff]   ;;  %v13367_v52 = vld [vmem:[%s18604_s6 + $0x3b4] ss:$8 sps:$4 sm:$0xff]   ;;  %v13365_v49 = vld [vmem:[%s18604_s6 + $0x3b0] ss:$8 sps:$4 sm:$0xff]  }
 0x29b   : > { %v2816_v9 = vor.u32 %v2815_v4, %v2811_v46  ;;  %v2830_v48 = vor.u32 %v2829_v6, %v2825_v5  ;;  %v13370_v1 = vld [vmem:[%s18605_s7 + $0x3b4] ss:$8 sps:$4 sm:$0xff]   ;;  %v13368_v3 = vld [vmem:[%s18605_s7 + $0x3b0] ss:$8 sps:$4 sm:$0xff]   ;;  %v13373_v45 = vld [vmem:[%s18604_s6 + $0x3c4] ss:$8 sps:$4 sm:$0xff]  }
 0x29c   : > { %v13376_v46 = vld [vmem:[%s18605_s7 + $0x3c4] ss:$8 sps:$4 sm:$0xff]   ;;  %v13371_v4 = vld [vmem:[%s18604_s6 + $0x3c0] ss:$8 sps:$4 sm:$0xff]   ;;  %v13379_v6 = vld [vmem:[%s18604_s6 + $0x3d4] ss:$8 sps:$4 sm:$0xff]  }
 0x29d   : > { %3187 = vmatprep.mubr.bf16.mxu0 %v2816_v9  ;;  %4615 = vmatprep.mubr.bf16.mxu1 %v2816_v9  ;;  %v13374_v5 = vld [vmem:[%s18605_s7 + $0x3c0] ss:$8 sps:$4 sm:$0xff]   ;;  %v13382_v8 = vld [vmem:[%s18605_s7 + $0x3d4] ss:$8 sps:$4 sm:$0xff]   ;;  %v13377_v9 = vld [vmem:[%s18604_s6 + $0x3d0] ss:$8 sps:$4 sm:$0xff]  }
 0x29e   : > { %3188 = vmatmul.mubr.bf16.vlgmr.msra.gmra.mrb[24].mxu0 %v2809_v10  ;;  %4616 = vmatmul.mubr.bf16.vlgmr.msra.gmra.mrb[24].mxu1 %v2809_v10  ;;  %v13388_v10 = vld [vmem:[%s18605_s7 + $0x3e4] ss:$8 sps:$4 sm:$0xff]  }
 0x29f   : > { %3199 = vmatpush1.bf16.msra.mxu0 %v13299_v11  ;;  %4627 = vmatpush1.bf16.msra.mxu1 %v13302_v47  ;;  %v13380_v11 = vld [vmem:[%s18605_s7 + $0x3d0] ss:$8 sps:$4 sm:$0xff]   ;;  %v13385_v47 = vld [vmem:[%s18604_s6 + $0x3e4] ss:$8 sps:$4 sm:$0xff]  }
 0x2a0   : > { %3200 = vmatprep.subr.bf16.mxu0 %v13307_v59  ;;  %4628 = vmatprep.subr.bf16.mxu1 %v13310_v12  ;;  %v13383_v59 = vld [vmem:[%s18604_s6 + $0x3e0] ss:$8 sps:$4 sm:$0xff]  }
 0x2a1   : > { %3230 = vmatprep.mubr.bf16.mxu0 %v2830_v48  ;;  %4658 = vmatprep.mubr.bf16.mxu1 %v2830_v48  ;;  %v13386_v12 = vld [vmem:[%s18605_s7 + $0x3e0] ss:$8 sps:$4 sm:$0xff]   ;;  %v13391_v48 = vld [vmem:[%s18604_s6 + $0x3f4] ss:$8 sps:$4 sm:$0xff]  }
 0x2a3   : > { %3201 = vmatpush1.bf16.msra.mxu0 %v13305_v13  ;;  %4629 = vmatpush1.bf16.msra.mxu1 %v13308_v50  ;;  %v13394_v13 = vld [vmem:[%s18605_s7 + $0x3f4] ss:$8 sps:$4 sm:$0xff]   ;;  %v2820_v50 = vshll.u32 %v15681_v60, 16 }
 0x2a4   : > { %3202 = vmatprep.subr.bf16.mxu0 %v13313_v14  ;;  %4630 = vmatprep.subr.bf16.mxu1 %v13316_v15  ;;  %v13389_v14 = vld [vmem:[%s18604_s6 + $0x3f0] ss:$8 sps:$4 sm:$0xff]  }
 0x2a5   : > { %v13392_v15 = vld [vmem:[%s18605_s7 + $0x3f0] ss:$8 sps:$4 sm:$0xff]  }
 0x2a7   : > { %3203 = vmatpush1.bf16.msra.mxu0 %v13311_v33  ;;  %4631 = vmatpush1.bf16.msra.mxu1 %v13314_v16  ;;  %v2818_v33 = vshrl.u32 %v15681_v60, 16  ;;  %v2822_v16 = vrot.slane %v2820_v50, 1  ;;  %v13472_v50 = vld [vmem:[%s18605_s7 + $0xc4] ss:$8 sps:$4 sm:$0xff]  }
 0x2a8   : > { %3204 = vmatprep.subr.bf16.mxu0 %v13319_v57  ;;  %4632 = vmatprep.subr.bf16.mxu1 %v13322_v58  ;;  %v13397_v57 = vld [vmem:[%s18604_s6 + $0x4] ss:$8 sps:$4 sm:$0xff]  }
 0x2a9   : > { %v13400_v58 = vld [vmem:[%s18605_s7 + $0x4] ss:$8 sps:$4 sm:$0xff]  }
 0x2ab   : > { %3205 = vmatpush1.bf16.msra.mxu0 %v13317_v63  ;;  %4633 = vmatpush1.bf16.msra.mxu1 %v13320_v0  ;;  %v13395_v63 = vld [vmem:[%s18604_s6] ss:$8 sps:$4 sm:$0xff]   ;;  %v2823_v0 = vor.u32 %v2822_v16, %v2818_v33  ;;  %v13475_v33 = vld [vmem:[%s18604_s6 + $0xd4] ss:$8 sps:$4 sm:$0xff]  }
 0x2ac   : > { %3206 = vmatprep.subr.bf16.mxu0 %v13325_v17  ;;  %4634 = vmatprep.subr.bf16.mxu1 %v13328_v18  ;;  %v13398_v17 = vld [vmem:[%s18605_s7] ss:$8 sps:$4 sm:$0xff]   ;;  %v13403_v18 = vld [vmem:[%s18604_s6 + $0x14] ss:$8 sps:$4 sm:$0xff]  }
 0x2ad   : > { %v13478_v16 = vld [vmem:[%s18605_s7 + $0xd4] ss:$8 sps:$4 sm:$0xff]  }
 0x2af   : > { %3207 = vmatpush1.bf16.msra.mxu0 %v13323_v19  ;;  %4635 = vmatpush1.bf16.msra.mxu1 %v13326_v20  ;;  %v13406_v19 = vld [vmem:[%s18605_s7 + $0x14] ss:$8 sps:$4 sm:$0xff]   ;;  %v13401_v20 = vld [vmem:[%s18604_s6 + $0x10] ss:$8 sps:$4 sm:$0xff]  }
 0x2b0   : > { %3208 = vmatprep.subr.bf16.mxu0 %v13331_v21  ;;  %4636 = vmatprep.subr.bf16.mxu1 %v13334_v22  ;;  %v13404_v21 = vld [vmem:[%s18605_s7 + $0x10] ss:$8 sps:$4 sm:$0xff]   ;;  %v13409_v22 = vld [vmem:[%s18604_s6 + $0x24] ss:$8 sps:$4 sm:$0xff]  }
 0x2b3   : > { %3209 = vmatpush1.bf16.msra.mxu0 %v13329_v23  ;;  %4637 = vmatpush1.bf16.msra.mxu1 %v13332_v36  ;;  %v13412_v23 = vld [vmem:[%s18605_s7 + $0x24] ss:$8 sps:$4 sm:$0xff]   ;;  %v13407_v36 = vld [vmem:[%s18604_s6 + $0x20] ss:$8 sps:$4 sm:$0xff]  }
 0x2b4   : > { %3210 = vmatprep.subr.bf16.mxu0 %v13337_v24  ;;  %4638 = vmatprep.subr.bf16.mxu1 %v13340_v25  ;;  %v13410_v24 = vld [vmem:[%s18605_s7 + $0x20] ss:$8 sps:$4 sm:$0xff]   ;;  %v13415_v25 = vld [vmem:[%s18604_s6 + $0x34] ss:$8 sps:$4 sm:$0xff]  }
 0x2b7   : > { %3211 = vmatpush1.bf16.msra.mxu0 %v13335_v26  ;;  %4639 = vmatpush1.bf16.msra.mxu1 %v13338_v27  ;;  %v13418_v26 = vld [vmem:[%s18605_s7 + $0x34] ss:$8 sps:$4 sm:$0xff]   ;;  %v13413_v27 = vld [vmem:[%s18604_s6 + $0x30] ss:$8 sps:$4 sm:$0xff]  }
 0x2b8   : > { %3212 = vmatprep.subr.bf16.mxu0 %v13343_v28  ;;  %4640 = vmatprep.subr.bf16.mxu1 %v13346_v29  ;;  %v13416_v28 = vld [vmem:[%s18605_s7 + $0x30] ss:$8 sps:$4 sm:$0xff]   ;;  %v13421_v29 = vld [vmem:[%s18604_s6 + $0x44] ss:$8 sps:$4 sm:$0xff]  }
 0x2bb   : > { %3213 = vmatpush1.bf16.msra.mxu0 %v13341_v30  ;;  %4641 = vmatpush1.bf16.msra.mxu1 %v13344_v31  ;;  %v13424_v30 = vld [vmem:[%s18605_s7 + $0x44] ss:$8 sps:$4 sm:$0xff]   ;;  %v13419_v31 = vld [vmem:[%s18604_s6 + $0x40] ss:$8 sps:$4 sm:$0xff]  }
 0x2bc   : > { %3214 = vmatprep.subr.bf16.mxu0 %v13349_v32  ;;  %4642 = vmatprep.subr.bf16.mxu1 %v13352_v34  ;;  %v13422_v32 = vld [vmem:[%s18605_s7 + $0x40] ss:$8 sps:$4 sm:$0xff]   ;;  %v13427_v34 = vld [vmem:[%s18604_s6 + $0x54] ss:$8 sps:$4 sm:$0xff]  }
 0x2bf   : > { %3215 = vmatpush1.bf16.msra.mxu0 %v13347_v35  ;;  %4643 = vmatpush1.bf16.msra.mxu1 %v13350_v37  ;;  %v13430_v35 = vld [vmem:[%s18605_s7 + $0x54] ss:$8 sps:$4 sm:$0xff]   ;;  %v13425_v37 = vld [vmem:[%s18604_s6 + $0x50] ss:$8 sps:$4 sm:$0xff]  }
 0x2c0   : > { %3216 = vmatprep.subr.bf16.mxu0 %v13355_v38  ;;  %4644 = vmatprep.subr.bf16.mxu1 %v13358_v39  ;;  %v13428_v38 = vld [vmem:[%s18605_s7 + $0x50] ss:$8 sps:$4 sm:$0xff]   ;;  %v13433_v39 = vld [vmem:[%s18604_s6 + $0x64] ss:$8 sps:$4 sm:$0xff]  }
 0x2c3   : > { %3217 = vmatpush1.bf16.msra.mxu0 %v13353_v40  ;;  %4645 = vmatpush1.bf16.msra.mxu1 %v13356_v41  ;;  %v13436_v40 = vld [vmem:[%s18605_s7 + $0x64] ss:$8 sps:$4 sm:$0xff]   ;;  %v13431_v41 = vld [vmem:[%s18604_s6 + $0x60] ss:$8 sps:$4 sm:$0xff]  }
 0x2c4   : > { %3218 = vmatprep.subr.bf16.mxu0 %v13361_v62  ;;  %4646 = vmatprep.subr.bf16.mxu1 %v13364_v42  ;;  %v13434_v62 = vld [vmem:[%s18605_s7 + $0x60] ss:$8 sps:$4 sm:$0xff]   ;;  %v13439_v42 = vld [vmem:[%s18604_s6 + $0x74] ss:$8 sps:$4 sm:$0xff]  }
 0x2c7   : > { %3219 = vmatpush1.bf16.msra.mxu0 %v13359_v43  ;;  %4647 = vmatpush1.bf16.msra.mxu1 %v13362_v51  ;;  %v13442_v43 = vld [vmem:[%s18605_s7 + $0x74] ss:$8 sps:$4 sm:$0xff]   ;;  %v13437_v51 = vld [vmem:[%s18604_s6 + $0x70] ss:$8 sps:$4 sm:$0xff]  }
 0x2c8   : > { %3220 = vmatprep.subr.bf16.mxu0 %v13367_v52  ;;  %4648 = vmatprep.subr.bf16.mxu1 %v13370_v1  ;;  %v13440_v52 = vld [vmem:[%s18605_s7 + $0x70] ss:$8 sps:$4 sm:$0xff]   ;;  %v13445_v1 = vld [vmem:[%s18604_s6 + $0x84] ss:$8 sps:$4 sm:$0xff]  }
 0x2cb   : > { %3221 = vmatpush1.bf16.msra.mxu0 %v13365_v49  ;;  %4649 = vmatpush1.bf16.msra.mxu1 %v13368_v3  ;;  %v13448_v49 = vld [vmem:[%s18605_s7 + $0x84] ss:$8 sps:$4 sm:$0xff]   ;;  %v13443_v3 = vld [vmem:[%s18604_s6 + $0x80] ss:$8 sps:$4 sm:$0xff]  }
 0x2cc   : > { %3222 = vmatprep.subr.bf16.mxu0 %v13373_v45  ;;  %4650 = vmatprep.subr.bf16.mxu1 %v13376_v46  ;;  %v13446_v45 = vld [vmem:[%s18605_s7 + $0x80] ss:$8 sps:$4 sm:$0xff]   ;;  %v13451_v46 = vld [vmem:[%s18604_s6 + $0x94] ss:$8 sps:$4 sm:$0xff]  }
 0x2cf   : > { %3223 = vmatpush1.bf16.msra.mxu0 %v13371_v4  ;;  %4651 = vmatpush1.bf16.msra.mxu1 %v13374_v5  ;;  %v13454_v4 = vld [vmem:[%s18605_s7 + $0x94] ss:$8 sps:$4 sm:$0xff]   ;;  %v13449_v5 = vld [vmem:[%s18604_s6 + $0x90] ss:$8 sps:$4 sm:$0xff]  }
 0x2d0   : > { %3224 = vmatprep.subr.bf16.mxu0 %v13379_v6  ;;  %4652 = vmatprep.subr.bf16.mxu1 %v13382_v8  ;;  %v13452_v6 = vld [vmem:[%s18605_s7 + $0x90] ss:$8 sps:$4 sm:$0xff]   ;;  %v13457_v8 = vld [vmem:[%s18604_s6 + $0xa4] ss:$8 sps:$4 sm:$0xff]  }
 0x2d3   : > { %3225 = vmatpush1.bf16.msra.mxu0 %v13377_v9  ;;  %4653 = vmatpush1.bf16.msra.mxu1 %v13380_v11  ;;  %v13460_v9 = vld [vmem:[%s18605_s7 + $0xa4] ss:$8 sps:$4 sm:$0xff]   ;;  %v13455_v11 = vld [vmem:[%s18604_s6 + $0xa0] ss:$8 sps:$4 sm:$0xff]  }
 0x2d4   : > { %3226 = vmatprep.subr.bf16.mxu0 %v13385_v47  ;;  %4654 = vmatprep.subr.bf16.mxu1 %v13388_v10  ;;  %v13458_v47 = vld [vmem:[%s18605_s7 + $0xa0] ss:$8 sps:$4 sm:$0xff]   ;;  %v13463_v10 = vld [vmem:[%s18604_s6 + $0xb4] ss:$8 sps:$4 sm:$0xff]  }
 0x2d7   : > { %3227 = vmatpush1.bf16.msra.mxu0 %v13383_v59  ;;  %4655 = vmatpush1.bf16.msra.mxu1 %v13386_v12  ;;  %v13466_v59 = vld [vmem:[%s18605_s7 + $0xb4] ss:$8 sps:$4 sm:$0xff]   ;;  %v13461_v12 = vld [vmem:[%s18604_s6 + $0xb0] ss:$8 sps:$4 sm:$0xff]  }
 0x2d8   : > { %3228 = vmatprep.subr.bf16.mxu0 %v13391_v48  ;;  %4656 = vmatprep.subr.bf16.mxu1 %v13394_v13  ;;  %v13464_v48 = vld [vmem:[%s18605_s7 + $0xb0] ss:$8 sps:$4 sm:$0xff]   ;;  %v13469_v13 = vld [vmem:[%s18604_s6 + $0xc4] ss:$8 sps:$4 sm:$0xff]  }
 0x2db   : > { %3229 = vmatpush1.bf16.msra.mxu0 %v13389_v14  ;;  %4657 = vmatpush1.bf16.msra.mxu1 %v13392_v15  ;;  %v13467_v14 = vld [vmem:[%s18604_s6 + $0xc0] ss:$8 sps:$4 sm:$0xff]  }
 0x2dc   : > { %3561 = vmatprep.subr.bf16.mxu0 %v13397_v57  ;;  %4989 = vmatprep.subr.bf16.mxu1 %v13400_v58  ;;  %v13470_v15 = vld [vmem:[%s18605_s7 + $0xc0] ss:$8 sps:$4 sm:$0xff]   ;;  %v13473_v57 = vld [vmem:[%s18604_s6 + $0xd0] ss:$8 sps:$4 sm:$0xff]  }
 0x2dd   : > { %v13476_v58 = vld [vmem:[%s18605_s7 + $0xd0] ss:$8 sps:$4 sm:$0xff]  }
 0x2de   : > { %3231 = vmatmul.mubr.bf16.vlgmr.msra.gmra.mrb[24].mxu0 %v2823_v0  ;;  %4659 = vmatmul.mubr.bf16.vlgmr.msra.gmra.mrb[24].mxu1 %v2823_v0  ;;  %v13484_v0 = vld [vmem:[%s18605_s7 + $0xe4] ss:$8 sps:$4 sm:$0xff]  }
 0x2df   : > { %3562 = vmatpush1.bf16.msra.mxu0 %v13395_v63  ;;  %3593 = vmatprep.mubr.bf16.mxu0 %v15683_v61  ;;  %v13481_v63 = vld [vmem:[%s18604_s6 + $0xe4] ss:$8 sps:$4 sm:$0xff]  }
 0x2e0   : > { %4990 = vmatpush1.bf16.msra.mxu1 %v13398_v17  ;;  %5021 = vmatprep.mubr.bf16.mxu1 %v15683_v61  ;;  %v13479_v17 = vld [vmem:[%s18604_s6 + $0xe0] ss:$8 sps:$4 sm:$0xff]  }
 0x2e1   : > { %3563 = vmatprep.subr.bf16.mxu0 %v13403_v18  ;;  %4991 = vmatprep.subr.bf16.mxu1 %v13406_v19  ;;  %v13482_v18 = vld [vmem:[%s18605_s7 + $0xe0] ss:$8 sps:$4 sm:$0xff]   ;;  %v13487_v19 = vld [vmem:[%s18604_s6 + $0xf4] ss:$8 sps:$4 sm:$0xff]  }
 0x2e3   : > { %3564 = vmatpush1.bf16.msra.mxu0 %v13401_v20  ;;  %v13490_v20 = vld [vmem:[%s18605_s7 + $0xf4] ss:$8 sps:$4 sm:$0xff]  }
 0x2e4   : > { %4992 = vmatpush1.bf16.msra.mxu1 %v13404_v21  ;;  %3565 = vmatprep.subr.bf16.mxu0 %v13409_v22  ;;  %v13485_v21 = vld [vmem:[%s18604_s6 + $0xf0] ss:$8 sps:$4 sm:$0xff]  }
 0x2e5   : > { %4993 = vmatprep.subr.bf16.mxu1 %v13412_v23  ;;  %v13488_v22 = vld [vmem:[%s18605_s7 + $0xf0] ss:$8 sps:$4 sm:$0xff]   ;;  %v13493_v23 = vld [vmem:[%s18604_s6 + $0x104] ss:$8 sps:$4 sm:$0xff]  }
 0x2e7   : > { %3566 = vmatpush1.bf16.msra.mxu0 %v13407_v36  ;;  %v13496_v36 = vld [vmem:[%s18605_s7 + $0x104] ss:$8 sps:$4 sm:$0xff]  }
 0x2e8   : > { %4994 = vmatpush1.bf16.msra.mxu1 %v13410_v24  ;;  %3567 = vmatprep.subr.bf16.mxu0 %v13415_v25  ;;  %v13491_v24 = vld [vmem:[%s18604_s6 + $0x100] ss:$8 sps:$4 sm:$0xff]  }
 0x2e9   : > { %4995 = vmatprep.subr.bf16.mxu1 %v13418_v26  ;;  %v13494_v25 = vld [vmem:[%s18605_s7 + $0x100] ss:$8 sps:$4 sm:$0xff]   ;;  %v13499_v26 = vld [vmem:[%s18604_s6 + $0x114] ss:$8 sps:$4 sm:$0xff]  }
 0x2eb   : > { %3568 = vmatpush1.bf16.msra.mxu0 %v13413_v27  ;;  %v13502_v27 = vld [vmem:[%s18605_s7 + $0x114] ss:$8 sps:$4 sm:$0xff]  }
 0x2ec   : > { %4996 = vmatpush1.bf16.msra.mxu1 %v13416_v28  ;;  %3569 = vmatprep.subr.bf16.mxu0 %v13421_v29  ;;  %v13497_v28 = vld [vmem:[%s18604_s6 + $0x110] ss:$8 sps:$4 sm:$0xff]  }
 0x2ed   : > { %4997 = vmatprep.subr.bf16.mxu1 %v13424_v30  ;;  %v13500_v29 = vld [vmem:[%s18605_s7 + $0x110] ss:$8 sps:$4 sm:$0xff]   ;;  %v13505_v30 = vld [vmem:[%s18604_s6 + $0x124] ss:$8 sps:$4 sm:$0xff]  }
 0x2ef   : > { %3570 = vmatpush1.bf16.msra.mxu0 %v13419_v31  ;;  %v13508_v31 = vld [vmem:[%s18605_s7 + $0x124] ss:$8 sps:$4 sm:$0xff]  }
 0x2f0   : > { %4998 = vmatpush1.bf16.msra.mxu1 %v13422_v32  ;;  %3571 = vmatprep.subr.bf16.mxu0 %v13427_v34  ;;  %v13503_v32 = vld [vmem:[%s18604_s6 + $0x120] ss:$8 sps:$4 sm:$0xff]  }
 0x2f1   : > { %4999 = vmatprep.subr.bf16.mxu1 %v13430_v35  ;;  %v13506_v34 = vld [vmem:[%s18605_s7 + $0x120] ss:$8 sps:$4 sm:$0xff]   ;;  %v13511_v35 = vld [vmem:[%s18604_s6 + $0x134] ss:$8 sps:$4 sm:$0xff]  }
 0x2f3   : > { %3572 = vmatpush1.bf16.msra.mxu0 %v13425_v37  ;;  %v13514_v37 = vld [vmem:[%s18605_s7 + $0x134] ss:$8 sps:$4 sm:$0xff]  }
 0x2f4   : > { %5000 = vmatpush1.bf16.msra.mxu1 %v13428_v38  ;;  %3573 = vmatprep.subr.bf16.mxu0 %v13433_v39  ;;  %v13509_v38 = vld [vmem:[%s18604_s6 + $0x130] ss:$8 sps:$4 sm:$0xff]  }
 0x2f5   : > { %5001 = vmatprep.subr.bf16.mxu1 %v13436_v40  ;;  %v13512_v39 = vld [vmem:[%s18605_s7 + $0x130] ss:$8 sps:$4 sm:$0xff]   ;;  %v13517_v40 = vld [vmem:[%s18604_s6 + $0x144] ss:$8 sps:$4 sm:$0xff]  }
 0x2f7   : > { %3574 = vmatpush1.bf16.msra.mxu0 %v13431_v41  ;;  %v13520_v41 = vld [vmem:[%s18605_s7 + $0x144] ss:$8 sps:$4 sm:$0xff]  }
 0x2f8   : > { %5002 = vmatpush1.bf16.msra.mxu1 %v13434_v62  ;;  %3575 = vmatprep.subr.bf16.mxu0 %v13439_v42  ;;  %v13515_v62 = vld [vmem:[%s18604_s6 + $0x140] ss:$8 sps:$4 sm:$0xff]  }
 0x2f9   : > { %5003 = vmatprep.subr.bf16.mxu1 %v13442_v43  ;;  %v13518_v42 = vld [vmem:[%s18605_s7 + $0x140] ss:$8 sps:$4 sm:$0xff]   ;;  %v13523_v43 = vld [vmem:[%s18604_s6 + $0x154] ss:$8 sps:$4 sm:$0xff]  }
 0x2fb   : > { %3576 = vmatpush1.bf16.msra.mxu0 %v13437_v51  ;;  %v13526_v51 = vld [vmem:[%s18605_s7 + $0x154] ss:$8 sps:$4 sm:$0xff]  }
 0x2fc   : > { %5004 = vmatpush1.bf16.msra.mxu1 %v13440_v52  ;;  %3577 = vmatprep.subr.bf16.mxu0 %v13445_v1  ;;  %v13521_v52 = vld [vmem:[%s18604_s6 + $0x150] ss:$8 sps:$4 sm:$0xff]  }
 0x2fd   : > { %5005 = vmatprep.subr.bf16.mxu1 %v13448_v49  ;;  %v13524_v1 = vld [vmem:[%s18605_s7 + $0x150] ss:$8 sps:$4 sm:$0xff]   ;;  %v13529_v49 = vld [vmem:[%s18604_s6 + $0x164] ss:$8 sps:$4 sm:$0xff]  }
 0x2ff   : > { %3578 = vmatpush1.bf16.msra.mxu0 %v13443_v3  ;;  %v13532_v3 = vld [vmem:[%s18605_s7 + $0x164] ss:$8 sps:$4 sm:$0xff]  }
 0x300   : > { %5006 = vmatpush1.bf16.msra.mxu1 %v13446_v45  ;;  %3579 = vmatprep.subr.bf16.mxu0 %v13451_v46  ;;  %v13527_v45 = vld [vmem:[%s18604_s6 + $0x160] ss:$8 sps:$4 sm:$0xff]  }
 0x301   : > { %5007 = vmatprep.subr.bf16.mxu1 %v13454_v4  ;;  %v13530_v46 = vld [vmem:[%s18605_s7 + $0x160] ss:$8 sps:$4 sm:$0xff]   ;;  %v13535_v4 = vld [vmem:[%s18604_s6 + $0x174] ss:$8 sps:$4 sm:$0xff]  }
 0x303   : > { %3580 = vmatpush1.bf16.msra.mxu0 %v13449_v5  ;;  %v13538_v5 = vld [vmem:[%s18605_s7 + $0x174] ss:$8 sps:$4 sm:$0xff]  }
 0x304   : > { %5008 = vmatpush1.bf16.msra.mxu1 %v13452_v6  ;;  %3581 = vmatprep.subr.bf16.mxu0 %v13457_v8  ;;  %v13533_v6 = vld [vmem:[%s18604_s6 + $0x170] ss:$8 sps:$4 sm:$0xff]  }
 0x305   : > { %5009 = vmatprep.subr.bf16.mxu1 %v13460_v9  ;;  %v13536_v8 = vld [vmem:[%s18605_s7 + $0x170] ss:$8 sps:$4 sm:$0xff]   ;;  %v13541_v9 = vld [vmem:[%s18604_s6 + $0x184] ss:$8 sps:$4 sm:$0xff]  }
 0x307   : > { %3582 = vmatpush1.bf16.msra.mxu0 %v13455_v11  ;;  %v13544_v11 = vld [vmem:[%s18605_s7 + $0x184] ss:$8 sps:$4 sm:$0xff]  }
 0x308   : > { %5010 = vmatpush1.bf16.msra.mxu1 %v13458_v47  ;;  %3583 = vmatprep.subr.bf16.mxu0 %v13463_v10  ;;  %v13539_v47 = vld [vmem:[%s18604_s6 + $0x180] ss:$8 sps:$4 sm:$0xff]  }
 0x309   : > { %5011 = vmatprep.subr.bf16.mxu1 %v13466_v59  ;;  %v13542_v10 = vld [vmem:[%s18605_s7 + $0x180] ss:$8 sps:$4 sm:$0xff]   ;;  %v13547_v59 = vld [vmem:[%s18604_s6 + $0x194] ss:$8 sps:$4 sm:$0xff]  }
 0x30b   : > { %3584 = vmatpush1.bf16.msra.mxu0 %v13461_v12  ;;  %v13550_v12 = vld [vmem:[%s18605_s7 + $0x194] ss:$8 sps:$4 sm:$0xff]  }
 0x30c   : > { %5012 = vmatpush1.bf16.msra.mxu1 %v13464_v48  ;;  %3585 = vmatprep.subr.bf16.mxu0 %v13469_v13  ;;  %v13545_v48 = vld [vmem:[%s18604_s6 + $0x190] ss:$8 sps:$4 sm:$0xff]  }
 0x30d   : > { %5013 = vmatprep.subr.bf16.mxu1 %v13472_v50  ;;  %v13548_v13 = vld [vmem:[%s18605_s7 + $0x190] ss:$8 sps:$4 sm:$0xff]   ;;  %v13553_v50 = vld [vmem:[%s18604_s6 + $0x1a4] ss:$8 sps:$4 sm:$0xff]  }
 0x30f   : > { %3586 = vmatpush1.bf16.msra.mxu0 %v13467_v14  ;;  %v13556_v14 = vld [vmem:[%s18605_s7 + $0x1a4] ss:$8 sps:$4 sm:$0xff]  }
 0x310   : > { %5014 = vmatpush1.bf16.msra.mxu1 %v13470_v15  ;;  %3587 = vmatprep.subr.bf16.mxu0 %v13475_v33  ;;  %v13551_v15 = vld [vmem:[%s18604_s6 + $0x1a0] ss:$8 sps:$4 sm:$0xff]  }
 0x311   : > { %5015 = vmatprep.subr.bf16.mxu1 %v13478_v16  ;;  %v13554_v33 = vld [vmem:[%s18605_s7 + $0x1a0] ss:$8 sps:$4 sm:$0xff]   ;;  %v13559_v16 = vld [vmem:[%s18604_s6 + $0x1b4] ss:$8 sps:$4 sm:$0xff]  }
 0x313   : > { %3588 = vmatpush1.bf16.msra.mxu0 %v13473_v57  ;;  %v13562_v57 = vld [vmem:[%s18605_s7 + $0x1b4] ss:$8 sps:$4 sm:$0xff]  }
 0x314   : > { %5016 = vmatpush1.bf16.msra.mxu1 %v13476_v58  ;;  %3589 = vmatprep.subr.bf16.mxu0 %v13481_v63  ;;  %v13557_v58 = vld [vmem:[%s18604_s6 + $0x1b0] ss:$8 sps:$4 sm:$0xff]  }
 0x315   : > { %5017 = vmatprep.subr.bf16.mxu1 %v13484_v0  ;;  %v13560_v63 = vld [vmem:[%s18605_s7 + $0x1b0] ss:$8 sps:$4 sm:$0xff]   ;;  %v13565_v0 = vld [vmem:[%s18604_s6 + $0x1c4] ss:$8 sps:$4 sm:$0xff]  }
 0x317   : > { %3590 = vmatpush1.bf16.msra.mxu0 %v13479_v17  ;;  %v13568_v17 = vld [vmem:[%s18605_s7 + $0x1c4] ss:$8 sps:$4 sm:$0xff]  }
 0x318   : > { %5018 = vmatpush1.bf16.msra.mxu1 %v13482_v18  ;;  %3591 = vmatprep.subr.bf16.mxu0 %v13487_v19  ;;  %v13563_v18 = vld [vmem:[%s18604_s6 + $0x1c0] ss:$8 sps:$4 sm:$0xff]  }
 0x319   : > { %5019 = vmatprep.subr.bf16.mxu1 %v13490_v20  ;;  %v13566_v19 = vld [vmem:[%s18605_s7 + $0x1c0] ss:$8 sps:$4 sm:$0xff]   ;;  %v13571_v20 = vld [vmem:[%s18604_s6 + $0x1d4] ss:$8 sps:$4 sm:$0xff]  }
 0x31b   : > { %3592 = vmatpush1.bf16.msra.mxu0 %v13485_v21  ;;  %v13574_v21 = vld [vmem:[%s18605_s7 + $0x1d4] ss:$8 sps:$4 sm:$0xff]  }
 0x31c   : > { %5020 = vmatpush1.bf16.msra.mxu1 %v13488_v22  ;;  %3604 = vmatprep.subr.bf16.mxu0 %v13493_v23  ;;  %v13569_v22 = vld [vmem:[%s18604_s6 + $0x1d0] ss:$8 sps:$4 sm:$0xff]  }
 0x31d   : > { %5032 = vmatprep.subr.bf16.mxu1 %v13496_v36  ;;  %v13572_v23 = vld [vmem:[%s18605_s7 + $0x1d0] ss:$8 sps:$4 sm:$0xff]   ;;  %v13577_v36 = vld [vmem:[%s18604_s6 + $0x1e4] ss:$8 sps:$4 sm:$0xff]  }
 0x31e   : > { %3594 = vmatmul.mubr.bf16.vlgmr.msra.gmra.mrb[24].mxu0 %v15679_v53 }
 0x31f   : > { %5022 = vmatmul.mubr.bf16.vlgmr.msra.gmra.mrb[24].mxu1 %v15679_v53  ;;  %3605 = vmatpush1.bf16.msra.mxu0 %v13491_v24  ;;  %v13580_v24 = vld [vmem:[%s18605_s7 + $0x1e4] ss:$8 sps:$4 sm:$0xff]  }
 0x320   : > { %3636 = vmatprep.mubr.bf16.mxu0 %v15685_v44  ;;  %5033 = vmatpush1.bf16.msra.mxu1 %v13494_v25  ;;  %v13575_v25 = vld [vmem:[%s18604_s6 + $0x1e0] ss:$8 sps:$4 sm:$0xff]  }
 0x321   : > { %5064 = vmatprep.mubr.bf16.mxu1 %v15685_v44  ;;  %3606 = vmatprep.subr.bf16.mxu0 %v13499_v26  ;;  %v13578_v26 = vld [vmem:[%s18605_s7 + $0x1e0] ss:$8 sps:$4 sm:$0xff]  }
 0x322   : > { %5034 = vmatprep.subr.bf16.mxu1 %v13502_v27  ;;  %v13583_v27 = vld [vmem:[%s18604_s6 + $0x1f4] ss:$8 sps:$4 sm:$0xff]  }
 0x323   : > { %3607 = vmatpush1.bf16.msra.mxu0 %v13497_v28  ;;  %v13586_v28 = vld [vmem:[%s18605_s7 + $0x1f4] ss:$8 sps:$4 sm:$0xff]  }
 0x324   : > { %5035 = vmatpush1.bf16.msra.mxu1 %v13500_v29  ;;  %3608 = vmatprep.subr.bf16.mxu0 %v13505_v30  ;;  %v13581_v29 = vld [vmem:[%s18604_s6 + $0x1f0] ss:$8 sps:$4 sm:$0xff]  }
 0x325   : > { %5036 = vmatprep.subr.bf16.mxu1 %v13508_v31  ;;  %v13584_v30 = vld [vmem:[%s18605_s7 + $0x1f0] ss:$8 sps:$4 sm:$0xff]   ;;  %v13589_v31 = vld [vmem:[%s18604_s6 + $0x404] ss:$8 sps:$4 sm:$0xff]  }
 0x327   : > { %3609 = vmatpush1.bf16.msra.mxu0 %v13503_v32  ;;  %v13592_v32 = vld [vmem:[%s18605_s7 + $0x404] ss:$8 sps:$4 sm:$0xff]  }
 0x328   : > { %5037 = vmatpush1.bf16.msra.mxu1 %v13506_v34  ;;  %3610 = vmatprep.subr.bf16.mxu0 %v13511_v35  ;;  %v13587_v34 = vld [vmem:[%s18604_s6 + $0x400] ss:$8 sps:$4 sm:$0xff]  }
 0x329   : > { %5038 = vmatprep.subr.bf16.mxu1 %v13514_v37  ;;  %v13590_v35 = vld [vmem:[%s18605_s7 + $0x400] ss:$8 sps:$4 sm:$0xff]   ;;  %v13595_v37 = vld [vmem:[%s18604_s6 + $0x414] ss:$8 sps:$4 sm:$0xff]  }
 0x32b   : > { %3611 = vmatpush1.bf16.msra.mxu0 %v13509_v38  ;;  %v3717_v38 = vrot.slane %v15683_v61, 1  ;;  %v13601_v61 = vld [vmem:[%s18604_s6 + $0x424] ss:$8 sps:$4 sm:$0xff]  }
 0x32c   : > { %5039 = vmatpush1.bf16.msra.mxu1 %v13512_v39  ;;  %3612 = vmatprep.subr.bf16.mxu0 %v13517_v40  ;;  %v13598_v39 = vld [vmem:[%s18605_s7 + $0x414] ss:$8 sps:$4 sm:$0xff]   ;;  %v13593_v40 = vld [vmem:[%s18604_s6 + $0x410] ss:$8 sps:$4 sm:$0xff]  }
 0x32d   : > { %5040 = vmatprep.subr.bf16.mxu1 %v13520_v41  ;;  %v13596_v41 = vld [vmem:[%s18605_s7 + $0x410] ss:$8 sps:$4 sm:$0xff]  }
 0x32f   : > { %3613 = vmatpush1.bf16.msra.mxu0 %v13515_v62  ;;  %v13604_v62 = vld [vmem:[%s18605_s7 + $0x424] ss:$8 sps:$4 sm:$0xff]  }
 0x330   : > { %5041 = vmatpush1.bf16.msra.mxu1 %v13518_v42  ;;  %3614 = vmatprep.subr.bf16.mxu0 %v13523_v43  ;;  %v13599_v42 = vld [vmem:[%s18604_s6 + $0x420] ss:$8 sps:$4 sm:$0xff]  }
 0x331   : > { %5042 = vmatprep.subr.bf16.mxu1 %v13526_v51  ;;  %v13602_v43 = vld [vmem:[%s18605_s7 + $0x420] ss:$8 sps:$4 sm:$0xff]   ;;  %v13607_v51 = vld [vmem:[%s18604_s6 + $0x434] ss:$8 sps:$4 sm:$0xff]  }
 0x333   : > { %3615 = vmatpush1.bf16.msra.mxu0 %v13521_v52  ;;  %v13610_v52 = vld [vmem:[%s18605_s7 + $0x434] ss:$8 sps:$4 sm:$0xff]  }
 0x334   : > { %5043 = vmatpush1.bf16.msra.mxu1 %v13524_v1  ;;  %3616 = vmatprep.subr.bf16.mxu0 %v13529_v49  ;;  %v13605_v1 = vld [vmem:[%s18604_s6 + $0x430] ss:$8 sps:$4 sm:$0xff]  }
 0x335   : > { %5044 = vmatprep.subr.bf16.mxu1 %v13532_v3  ;;  %v13608_v49 = vld [vmem:[%s18605_s7 + $0x430] ss:$8 sps:$4 sm:$0xff]   ;;  %v13613_v3 = vld [vmem:[%s18604_s6 + $0x444] ss:$8 sps:$4 sm:$0xff]  }
 0x337   : > { %3617 = vmatpush1.bf16.msra.mxu0 %v13527_v45  ;;  %v13616_v45 = vld [vmem:[%s18605_s7 + $0x444] ss:$8 sps:$4 sm:$0xff]  }
 0x338   : > { %5045 = vmatpush1.bf16.msra.mxu1 %v13530_v46  ;;  %3618 = vmatprep.subr.bf16.mxu0 %v13535_v4  ;;  %v13611_v46 = vld [vmem:[%s18604_s6 + $0x440] ss:$8 sps:$4 sm:$0xff]  }
 0x339   : > { %5046 = vmatprep.subr.bf16.mxu1 %v13538_v5  ;;  %v13614_v4 = vld [vmem:[%s18605_s7 + $0x440] ss:$8 sps:$4 sm:$0xff]   ;;  %v13619_v5 = vld [vmem:[%s18604_s6 + $0x454] ss:$8 sps:$4 sm:$0xff]  }
 0x33b   : > { %3619 = vmatpush1.bf16.msra.mxu0 %v13533_v6  ;;  %v13622_v6 = vld [vmem:[%s18605_s7 + $0x454] ss:$8 sps:$4 sm:$0xff]  }
 0x33c   : > { %5047 = vmatpush1.bf16.msra.mxu1 %v13536_v8  ;;  %3620 = vmatprep.subr.bf16.mxu0 %v13541_v9  ;;  %v13617_v8 = vld [vmem:[%s18604_s6 + $0x450] ss:$8 sps:$4 sm:$0xff]  }
 0x33d   : > { %5048 = vmatprep.subr.bf16.mxu1 %v13544_v11  ;;  %v13620_v9 = vld [vmem:[%s18605_s7 + $0x450] ss:$8 sps:$4 sm:$0xff]   ;;  %v13625_v11 = vld [vmem:[%s18604_s6 + $0x464] ss:$8 sps:$4 sm:$0xff]  }
 0x33f   : > { %3621 = vmatpush1.bf16.msra.mxu0 %v13539_v47  ;;  %v13628_v47 = vld [vmem:[%s18605_s7 + $0x464] ss:$8 sps:$4 sm:$0xff]  }
 0x340   : > { %5049 = vmatpush1.bf16.msra.mxu1 %v13542_v10  ;;  %3622 = vmatprep.subr.bf16.mxu0 %v13547_v59  ;;  %v13623_v10 = vld [vmem:[%s18604_s6 + $0x460] ss:$8 sps:$4 sm:$0xff]  }
 0x341   : > { %5050 = vmatprep.subr.bf16.mxu1 %v13550_v12  ;;  %v13626_v59 = vld [vmem:[%s18605_s7 + $0x460] ss:$8 sps:$4 sm:$0xff]   ;;  %v13631_v12 = vld [vmem:[%s18604_s6 + $0x474] ss:$8 sps:$4 sm:$0xff]  }
 0x343   : > { %3623 = vmatpush1.bf16.msra.mxu0 %v13545_v48  ;;  %v13634_v48 = vld [vmem:[%s18605_s7 + $0x474] ss:$8 sps:$4 sm:$0xff]  }
 0x344   : > { %5051 = vmatpush1.bf16.msra.mxu1 %v13548_v13  ;;  %3624 = vmatprep.subr.bf16.mxu0 %v13553_v50  ;;  %v13629_v13 = vld [vmem:[%s18604_s6 + $0x470] ss:$8 sps:$4 sm:$0xff]  }
 0x345   : > { %5052 = vmatprep.subr.bf16.mxu1 %v13556_v14  ;;  %v13632_v50 = vld [vmem:[%s18605_s7 + $0x470] ss:$8 sps:$4 sm:$0xff]   ;;  %v13637_v14 = vld [vmem:[%s18604_s6 + $0x484] ss:$8 sps:$4 sm:$0xff]  }
 0x347   : > { %3625 = vmatpush1.bf16.msra.mxu0 %v13551_v15  ;;  %v13640_v15 = vld [vmem:[%s18605_s7 + $0x484] ss:$8 sps:$4 sm:$0xff]  }
 0x348   : > { %5053 = vmatpush1.bf16.msra.mxu1 %v13554_v33  ;;  %3626 = vmatprep.subr.bf16.mxu0 %v13559_v16  ;;  %v13635_v33 = vld [vmem:[%s18604_s6 + $0x480] ss:$8 sps:$4 sm:$0xff]  }
 0x349   : > { %5054 = vmatprep.subr.bf16.mxu1 %v13562_v57  ;;  %v13638_v16 = vld [vmem:[%s18605_s7 + $0x480] ss:$8 sps:$4 sm:$0xff]   ;;  %v13643_v57 = vld [vmem:[%s18604_s6 + $0x494] ss:$8 sps:$4 sm:$0xff]  }
 0x34b   : > { %3627 = vmatpush1.bf16.msra.mxu0 %v13557_v58  ;;  %v13646_v58 = vld [vmem:[%s18605_s7 + $0x494] ss:$8 sps:$4 sm:$0xff]  }
 0x34c   : > { %5055 = vmatpush1.bf16.msra.mxu1 %v13560_v63  ;;  %3628 = vmatprep.subr.bf16.mxu0 %v13565_v0  ;;  %v13641_v63 = vld [vmem:[%s18604_s6 + $0x490] ss:$8 sps:$4 sm:$0xff]  }
 0x34d   : > { %5056 = vmatprep.subr.bf16.mxu1 %v13568_v17  ;;  %v13644_v0 = vld [vmem:[%s18605_s7 + $0x490] ss:$8 sps:$4 sm:$0xff]   ;;  %v13649_v17 = vld [vmem:[%s18604_s6 + $0x4a4] ss:$8 sps:$4 sm:$0xff]  }
 0x34f   : > { %3629 = vmatpush1.bf16.msra.mxu0 %v13563_v18  ;;  %v13652_v18 = vld [vmem:[%s18605_s7 + $0x4a4] ss:$8 sps:$4 sm:$0xff]  }
 0x350   : > { %5057 = vmatpush1.bf16.msra.mxu1 %v13566_v19  ;;  %3630 = vmatprep.subr.bf16.mxu0 %v13571_v20  ;;  %v13647_v19 = vld [vmem:[%s18604_s6 + $0x4a0] ss:$8 sps:$4 sm:$0xff]  }
 0x351   : > { %5058 = vmatprep.subr.bf16.mxu1 %v13574_v21  ;;  %v13650_v20 = vld [vmem:[%s18605_s7 + $0x4a0] ss:$8 sps:$4 sm:$0xff]   ;;  %v13655_v21 = vld [vmem:[%s18604_s6 + $0x4b4] ss:$8 sps:$4 sm:$0xff]  }
 0x353   : > { %3631 = vmatpush1.bf16.msra.mxu0 %v13569_v22  ;;  %v13658_v22 = vld [vmem:[%s18605_s7 + $0x4b4] ss:$8 sps:$4 sm:$0xff]  }
 0x354   : > { %5059 = vmatpush1.bf16.msra.mxu1 %v13572_v23  ;;  %3632 = vmatprep.subr.bf16.mxu0 %v13577_v36  ;;  %v13653_v23 = vld [vmem:[%s18604_s6 + $0x4b0] ss:$8 sps:$4 sm:$0xff]  }
 0x355   : > { %5060 = vmatprep.subr.bf16.mxu1 %v13580_v24  ;;  %v13656_v36 = vld [vmem:[%s18605_s7 + $0x4b0] ss:$8 sps:$4 sm:$0xff]   ;;  %v13661_v24 = vld [vmem:[%s18604_s6 + $0x4c4] ss:$8 sps:$4 sm:$0xff]  }
 0x357   : > { %3633 = vmatpush1.bf16.msra.mxu0 %v13575_v25  ;;  %v13664_v25 = vld [vmem:[%s18605_s7 + $0x4c4] ss:$8 sps:$4 sm:$0xff]  }
 0x358   : > { %5061 = vmatpush1.bf16.msra.mxu1 %v13578_v26  ;;  %3634 = vmatprep.subr.bf16.mxu0 %v13583_v27  ;;  %v13659_v26 = vld [vmem:[%s18604_s6 + $0x4c0] ss:$8 sps:$4 sm:$0xff]  }
 0x359   : > { %5062 = vmatprep.subr.bf16.mxu1 %v13586_v28  ;;  %v13662_v27 = vld [vmem:[%s18605_s7 + $0x4c0] ss:$8 sps:$4 sm:$0xff]   ;;  %v13667_v28 = vld [vmem:[%s18604_s6 + $0x4d4] ss:$8 sps:$4 sm:$0xff]  }
 0x35b   : > { %3635 = vmatpush1.bf16.msra.mxu0 %v13581_v29  ;;  %v13670_v29 = vld [vmem:[%s18605_s7 + $0x4d4] ss:$8 sps:$4 sm:$0xff]  }
 0x35c   : > { %5063 = vmatpush1.bf16.msra.mxu1 %v13584_v30  ;;  %4044 = vmatprep.subr.bf16.mxu0 %v13589_v31  ;;  %v13665_v30 = vld [vmem:[%s18604_s6 + $0x4d0] ss:$8 sps:$4 sm:$0xff]  }
 0x35d   : > { %5460 = vmatprep.subr.bf16.mxu1 %v13592_v32  ;;  %v13668_v31 = vld [vmem:[%s18605_s7 + $0x4d0] ss:$8 sps:$4 sm:$0xff]   ;;  %v13673_v32 = vld [vmem:[%s18604_s6 + $0x4e4] ss:$8 sps:$4 sm:$0xff]  }
 0x35e   : > { %3637 = vmatmul.mubr.bf16.vlgmr.msra.gmra.mrb[24].mxu0 %v15681_v60 }
 0x35f   : > { %5065 = vmatmul.mubr.bf16.vlgmr.msra.gmra.mrb[24].mxu1 %v15681_v60  ;;  %4045 = vmatpush1.bf16.msra.mxu0 %v13587_v34  ;;  %v13676_v34 = vld [vmem:[%s18605_s7 + $0x4e4] ss:$8 sps:$4 sm:$0xff]  }
 0x360   : > { %4076 = vmatprep.mubr.bf16.mxu0 %v3717_v38  ;;  %5461 = vmatpush1.bf16.msra.mxu1 %v13590_v35  ;;  %v13671_v35 = vld [vmem:[%s18604_s6 + $0x4e0] ss:$8 sps:$4 sm:$0xff]  }
 0x361   : > { %5492 = vmatprep.mubr.bf16.mxu1 %v3717_v38  ;;  %4046 = vmatprep.subr.bf16.mxu0 %v13595_v37  ;;  %v13674_v37 = vld [vmem:[%s18605_s7 + $0x4e0] ss:$8 sps:$4 sm:$0xff]   ;;  %v13679_v38 = vld [vmem:[%s18604_s6 + $0x4f4] ss:$8 sps:$4 sm:$0xff]  }
 0x362   : > { %5462 = vmatprep.subr.bf16.mxu1 %v13598_v39  ;;  %v13682_v39 = vld [vmem:[%s18605_s7 + $0x4f4] ss:$8 sps:$4 sm:$0xff]  }
 0x363   : > { %4047 = vmatpush1.bf16.msra.mxu0 %v13593_v40  ;;  %v13677_v40 = vld [vmem:[%s18604_s6 + $0x4f0] ss:$8 sps:$4 sm:$0xff]  }
 0x364   : > { %5463 = vmatpush1.bf16.msra.mxu1 %v13596_v41  ;;  %4048 = vmatprep.subr.bf16.mxu0 %v13601_v61  ;;  %v13680_v41 = vld [vmem:[%s18605_s7 + $0x4f0] ss:$8 sps:$4 sm:$0xff]   ;;  %v13685_v61 = vld [vmem:[%s18604_s6 + $0x504] ss:$8 sps:$4 sm:$0xff]  }
 0x365   : > { %5464 = vmatprep.subr.bf16.mxu1 %v13604_v62  ;;  %v13688_v62 = vld [vmem:[%s18605_s7 + $0x504] ss:$8 sps:$4 sm:$0xff]  }
 0x367   : > { %4049 = vmatpush1.bf16.msra.mxu0 %v13599_v42  ;;  %v13683_v42 = vld [vmem:[%s18604_s6 + $0x500] ss:$8 sps:$4 sm:$0xff]  }
 0x368   : > { %5465 = vmatpush1.bf16.msra.mxu1 %v13602_v43  ;;  %4050 = vmatprep.subr.bf16.mxu0 %v13607_v51  ;;  %v3716_v43 = vrot.slane %v15679_v53, 1  ;;  %v13686_v51 = vld [vmem:[%s18605_s7 + $0x500] ss:$8 sps:$4 sm:$0xff]   ;;  %v13689_v53 = vld [vmem:[%s18604_s6 + $0x510] ss:$8 sps:$4 sm:$0xff]  }
 0x369   : > { %5466 = vmatprep.subr.bf16.mxu1 %v13610_v52  ;;  %v13691_v52 = vld [vmem:[%s18604_s6 + $0x514] ss:$8 sps:$4 sm:$0xff]  }
 0x36b   : > { %4051 = vmatpush1.bf16.msra.mxu0 %v13605_v1  ;;  %v3719_v1 = vrot.slane %v15685_v44, 1  ;;  %v13697_v44 = vld [vmem:[%s18604_s6 + $0x524] ss:$8 sps:$4 sm:$0xff]  }
 0x36c   : > { %5467 = vmatpush1.bf16.msra.mxu1 %v13608_v49  ;;  %4052 = vmatprep.subr.bf16.mxu0 %v13613_v3  ;;  %v13694_v49 = vld [vmem:[%s18605_s7 + $0x514] ss:$8 sps:$4 sm:$0xff]   ;;  %v13692_v3 = vld [vmem:[%s18605_s7 + $0x510] ss:$8 sps:$4 sm:$0xff]  }
 0x36d   : > { %5468 = vmatprep.subr.bf16.mxu1 %v13616_v45  ;;  %v13700_v45 = vld [vmem:[%s18605_s7 + $0x524] ss:$8 sps:$4 sm:$0xff]  }
 0x36f   : > { %4053 = vmatpush1.bf16.msra.mxu0 %v13611_v46  ;;  %v13695_v46 = vld [vmem:[%s18604_s6 + $0x520] ss:$8 sps:$4 sm:$0xff]  }
 0x370   : > { %5469 = vmatpush1.bf16.msra.mxu1 %v13614_v4  ;;  %4054 = vmatprep.subr.bf16.mxu0 %v13619_v5  ;;  %v13698_v4 = vld [vmem:[%s18605_s7 + $0x520] ss:$8 sps:$4 sm:$0xff]   ;;  %v13703_v5 = vld [vmem:[%s18604_s6 + $0x534] ss:$8 sps:$4 sm:$0xff]  }
 0x371   : > { %5470 = vmatprep.subr.bf16.mxu1 %v13622_v6  ;;  %v13706_v6 = vld [vmem:[%s18605_s7 + $0x534] ss:$8 sps:$4 sm:$0xff]  }
 0x373   : > { %4055 = vmatpush1.bf16.msra.mxu0 %v13617_v8  ;;  %v13701_v8 = vld [vmem:[%s18604_s6 + $0x530] ss:$8 sps:$4 sm:$0xff]  }
 0x374   : > { %5471 = vmatpush1.bf16.msra.mxu1 %v13620_v9  ;;  %4056 = vmatprep.subr.bf16.mxu0 %v13625_v11  ;;  %v13704_v9 = vld [vmem:[%s18605_s7 + $0x530] ss:$8 sps:$4 sm:$0xff]   ;;  %v13709_v11 = vld [vmem:[%s18604_s6 + $0x544] ss:$8 sps:$4 sm:$0xff]  }
 0x375   : > { %5472 = vmatprep.subr.bf16.mxu1 %v13628_v47  ;;  %v13712_v47 = vld [vmem:[%s18605_s7 + $0x544] ss:$8 sps:$4 sm:$0xff]  }
 0x377   : > { %4057 = vmatpush1.bf16.msra.mxu0 %v13623_v10  ;;  %v13707_v10 = vld [vmem:[%s18604_s6 + $0x540] ss:$8 sps:$4 sm:$0xff]  }
 0x378   : > { %5473 = vmatpush1.bf16.msra.mxu1 %v13626_v59  ;;  %4058 = vmatprep.subr.bf16.mxu0 %v13631_v12  ;;  %v13710_v59 = vld [vmem:[%s18605_s7 + $0x540] ss:$8 sps:$4 sm:$0xff]   ;;  %v13715_v12 = vld [vmem:[%s18604_s6 + $0x554] ss:$8 sps:$4 sm:$0xff]  }
 0x379   : > { %5474 = vmatprep.subr.bf16.mxu1 %v13634_v48  ;;  %v13718_v48 = vld [vmem:[%s18605_s7 + $0x554] ss:$8 sps:$4 sm:$0xff]  }
 0x37b   : > { %4059 = vmatpush1.bf16.msra.mxu0 %v13629_v13  ;;  %v13713_v13 = vld [vmem:[%s18604_s6 + $0x550] ss:$8 sps:$4 sm:$0xff]  }
 0x37c   : > { %5475 = vmatpush1.bf16.msra.mxu1 %v13632_v50  ;;  %4060 = vmatprep.subr.bf16.mxu0 %v13637_v14  ;;  %v13716_v50 = vld [vmem:[%s18605_s7 + $0x550] ss:$8 sps:$4 sm:$0xff]   ;;  %v13721_v14 = vld [vmem:[%s18604_s6 + $0x564] ss:$8 sps:$4 sm:$0xff]  }
 0x37d   : > { %5476 = vmatprep.subr.bf16.mxu1 %v13640_v15  ;;  %v13724_v15 = vld [vmem:[%s18605_s7 + $0x564] ss:$8 sps:$4 sm:$0xff]  }
 0x37f   : > { %4061 = vmatpush1.bf16.msra.mxu0 %v13635_v33  ;;  %v13719_v33 = vld [vmem:[%s18604_s6 + $0x560] ss:$8 sps:$4 sm:$0xff]  }
 0x380   : > { %5477 = vmatpush1.bf16.msra.mxu1 %v13638_v16  ;;  %4062 = vmatprep.subr.bf16.mxu0 %v13643_v57  ;;  %v13722_v16 = vld [vmem:[%s18605_s7 + $0x560] ss:$8 sps:$4 sm:$0xff]   ;;  %v13727_v57 = vld [vmem:[%s18604_s6 + $0x574] ss:$8 sps:$4 sm:$0xff]  }
 0x381   : > { %5478 = vmatprep.subr.bf16.mxu1 %v13646_v58  ;;  %v13730_v58 = vld [vmem:[%s18605_s7 + $0x574] ss:$8 sps:$4 sm:$0xff]  }
 0x383   : > { %4063 = vmatpush1.bf16.msra.mxu0 %v13641_v63  ;;  %v13725_v63 = vld [vmem:[%s18604_s6 + $0x570] ss:$8 sps:$4 sm:$0xff]  }
 0x384   : > { %5479 = vmatpush1.bf16.msra.mxu1 %v13644_v0  ;;  %4064 = vmatprep.subr.bf16.mxu0 %v13649_v17  ;;  %v13728_v0 = vld [vmem:[%s18605_s7 + $0x570] ss:$8 sps:$4 sm:$0xff]   ;;  %v13733_v17 = vld [vmem:[%s18604_s6 + $0x584] ss:$8 sps:$4 sm:$0xff]  }
 0x385   : > { %5480 = vmatprep.subr.bf16.mxu1 %v13652_v18  ;;  %v13736_v18 = vld [vmem:[%s18605_s7 + $0x584] ss:$8 sps:$4 sm:$0xff]  }
 0x387   : > { %4065 = vmatpush1.bf16.msra.mxu0 %v13647_v19  ;;  %v13731_v19 = vld [vmem:[%s18604_s6 + $0x580] ss:$8 sps:$4 sm:$0xff]  }
 0x388   : > { %5481 = vmatpush1.bf16.msra.mxu1 %v13650_v20  ;;  %4066 = vmatprep.subr.bf16.mxu0 %v13655_v21  ;;  %v13734_v20 = vld [vmem:[%s18605_s7 + $0x580] ss:$8 sps:$4 sm:$0xff]   ;;  %v13739_v21 = vld [vmem:[%s18604_s6 + $0x594] ss:$8 sps:$4 sm:$0xff]  }
 0x389   : > { %5482 = vmatprep.subr.bf16.mxu1 %v13658_v22  ;;  %v13742_v22 = vld [vmem:[%s18605_s7 + $0x594] ss:$8 sps:$4 sm:$0xff]  }
 0x38b   : > { %4067 = vmatpush1.bf16.msra.mxu0 %v13653_v23  ;;  %v13737_v23 = vld [vmem:[%s18604_s6 + $0x590] ss:$8 sps:$4 sm:$0xff]  }
 0x38c   : > { %5483 = vmatpush1.bf16.msra.mxu1 %v13656_v36  ;;  %4068 = vmatprep.subr.bf16.mxu0 %v13661_v24  ;;  %v13740_v36 = vld [vmem:[%s18605_s7 + $0x590] ss:$8 sps:$4 sm:$0xff]   ;;  %v13745_v24 = vld [vmem:[%s18604_s6 + $0x5a4] ss:$8 sps:$4 sm:$0xff]  }
 0x38d   : > { %5484 = vmatprep.subr.bf16.mxu1 %v13664_v25  ;;  %v13748_v25 = vld [vmem:[%s18605_s7 + $0x5a4] ss:$8 sps:$4 sm:$0xff]  }
 0x38f   : > { %4069 = vmatpush1.bf16.msra.mxu0 %v13659_v26  ;;  %v13743_v26 = vld [vmem:[%s18604_s6 + $0x5a0] ss:$8 sps:$4 sm:$0xff]  }
 0x390   : > { %5485 = vmatpush1.bf16.msra.mxu1 %v13662_v27  ;;  %4070 = vmatprep.subr.bf16.mxu0 %v13667_v28  ;;  %v13746_v27 = vld [vmem:[%s18605_s7 + $0x5a0] ss:$8 sps:$4 sm:$0xff]   ;;  %v13751_v28 = vld [vmem:[%s18604_s6 + $0x5b4] ss:$8 sps:$4 sm:$0xff]  }
 0x391   : > { %5486 = vmatprep.subr.bf16.mxu1 %v13670_v29  ;;  %v13754_v29 = vld [vmem:[%s18605_s7 + $0x5b4] ss:$8 sps:$4 sm:$0xff]  }
 0x393   : > { %4071 = vmatpush1.bf16.msra.mxu0 %v13665_v30  ;;  %v13749_v30 = vld [vmem:[%s18604_s6 + $0x5b0] ss:$8 sps:$4 sm:$0xff]  }
 0x394   : > { %5487 = vmatpush1.bf16.msra.mxu1 %v13668_v31  ;;  %4072 = vmatprep.subr.bf16.mxu0 %v13673_v32  ;;  %v13752_v31 = vld [vmem:[%s18605_s7 + $0x5b0] ss:$8 sps:$4 sm:$0xff]   ;;  %v13757_v32 = vld [vmem:[%s18604_s6 + $0x5c4] ss:$8 sps:$4 sm:$0xff]  }
 0x395   : > { %5488 = vmatprep.subr.bf16.mxu1 %v13676_v34  ;;  %v13760_v34 = vld [vmem:[%s18605_s7 + $0x5c4] ss:$8 sps:$4 sm:$0xff]  }
 0x397   : > { %4073 = vmatpush1.bf16.msra.mxu0 %v13671_v35  ;;  %v13755_v35 = vld [vmem:[%s18604_s6 + $0x5c0] ss:$8 sps:$4 sm:$0xff]  }
 0x398   : > { %5489 = vmatpush1.bf16.msra.mxu1 %v13674_v37  ;;  %4074 = vmatprep.subr.bf16.mxu0 %v13679_v38  ;;  %v13758_v37 = vld [vmem:[%s18605_s7 + $0x5c0] ss:$8 sps:$4 sm:$0xff]   ;;  %v13763_v38 = vld [vmem:[%s18604_s6 + $0x5d4] ss:$8 sps:$4 sm:$0xff]  }
 0x399   : > { %5490 = vmatprep.subr.bf16.mxu1 %v13682_v39  ;;  %v13766_v39 = vld [vmem:[%s18605_s7 + $0x5d4] ss:$8 sps:$4 sm:$0xff]  }
 0x39b   : > { %4075 = vmatpush1.bf16.msra.mxu0 %v13677_v40  ;;  %v13761_v40 = vld [vmem:[%s18604_s6 + $0x5d0] ss:$8 sps:$4 sm:$0xff]  }
 0x39c   : > { %5491 = vmatpush1.bf16.msra.mxu1 %v13680_v41  ;;  %4087 = vmatprep.subr.bf16.mxu0 %v13685_v61  ;;  %v13764_v41 = vld [vmem:[%s18605_s7 + $0x5d0] ss:$8 sps:$4 sm:$0xff]   ;;  %v13769_v61 = vld [vmem:[%s18604_s6 + $0x5e4] ss:$8 sps:$4 sm:$0xff]  }
 0x39d   : > { %5503 = vmatprep.subr.bf16.mxu1 %v13688_v62  ;;  %v13772_v62 = vld [vmem:[%s18605_s7 + $0x5e4] ss:$8 sps:$4 sm:$0xff]  }
 0x39e   : > { %4077 = vmatmul.mubr.bf16.vlgmr.msra.gmra.mrb[24].mxu0 %v3716_v43 }
 0x39f   : > { %5493 = vmatmul.mubr.bf16.vlgmr.msra.gmra.mrb[24].mxu1 %v3716_v43  ;;  %4088 = vmatpush1.bf16.msra.mxu0 %v13683_v42  ;;  %v13767_v42 = vld [vmem:[%s18604_s6 + $0x5e0] ss:$8 sps:$4 sm:$0xff]  }
 0x3a0   : > { %4119 = vmatprep.mubr.bf16.mxu0 %v3719_v1  ;;  %5504 = vmatpush1.bf16.msra.mxu1 %v13686_v51  ;;  %v13770_v43 = vld [vmem:[%s18605_s7 + $0x5e0] ss:$8 sps:$4 sm:$0xff]   ;;  %v13775_v51 = vld [vmem:[%s18604_s6 + $0x5f4] ss:$8 sps:$4 sm:$0xff]  }
 0x3a1   : > { %5535 = vmatprep.mubr.bf16.mxu1 %v3719_v1  ;;  %4089 = vmatprep.subr.bf16.mxu0 %v13691_v52  ;;  %v13778_v52 = vld [vmem:[%s18605_s7 + $0x5f4] ss:$8 sps:$4 sm:$0xff]   ;;  %v13773_v1 = vld [vmem:[%s18604_s6 + $0x5f0] ss:$8 sps:$4 sm:$0xff]  }
 0x3a2   : > { %5505 = vmatprep.subr.bf16.mxu1 %v13694_v49  ;;  %v13776_v49 = vld [vmem:[%s18605_s7 + $0x5f0] ss:$8 sps:$4 sm:$0xff]  }
 0x3a3   : > { %4090 = vmatpush1.bf16.msra.mxu0 %v13689_v53  ;;  %v3718_v53 = vrot.slane %v15681_v60, 1 }
 0x3a4   : > { %5506 = vmatpush1.bf16.msra.mxu1 %v13692_v3  ;;  %4091 = vmatprep.subr.bf16.mxu0 %v13697_v44  ;;  %v5554_v3 = vld [vmem:[%s18606_s8] sm:$0x3] }
 0x3a5   : > { %5507 = vmatprep.subr.bf16.mxu1 %v13700_v45  ;;  %v5559_v45 = vrot.slane %v5554_v3, %v15425_v7 }
 0x3a7   : > { %4092 = vmatpush1.bf16.msra.mxu0 %v13695_v46 }
 0x3a8   : > { %5508 = vmatpush1.bf16.msra.mxu1 %v13698_v4  ;;  %4093 = vmatprep.subr.bf16.mxu0 %v13703_v5  ;;  %v5563_v5 = vrot.slane %v5554_v3, %v15429_v55  ;;  %v13826_v3 = vld [vmem:[%s18609_s11 + $0x2a8] ss:$16 sps:$4 sm:$0xff]  }
 0x3a9   : > { %5509 = vmatprep.subr.bf16.mxu1 %v13706_v6 }
 0x3ab   : > { %4094 = vmatpush1.bf16.msra.mxu0 %v13701_v8 }
 0x3ac   : > { %5510 = vmatpush1.bf16.msra.mxu1 %v13704_v9  ;;  %4095 = vmatprep.subr.bf16.mxu0 %v13709_v11 }
 0x3ad   : > { %5511 = vmatprep.subr.bf16.mxu1 %v13712_v47 }
 0x3af   : > { %4096 = vmatpush1.bf16.msra.mxu0 %v13707_v10 }
 0x3b0   : > { %5512 = vmatpush1.bf16.msra.mxu1 %v13710_v59  ;;  %4097 = vmatprep.subr.bf16.mxu0 %v13715_v12 }
 0x3b1   : > { %5513 = vmatprep.subr.bf16.mxu1 %v13718_v48 }
 0x3b3   : > { %4098 = vmatpush1.bf16.msra.mxu0 %v13713_v13 }
 0x3b4   : > { %5514 = vmatpush1.bf16.msra.mxu1 %v13716_v50  ;;  %4099 = vmatprep.subr.bf16.mxu0 %v13721_v14 }
 0x3b5   : > { %5515 = vmatprep.subr.bf16.mxu1 %v13724_v15 }
 0x3b7   : > { %4100 = vmatpush1.bf16.msra.mxu0 %v13719_v33 }
 0x3b8   : > { %5516 = vmatpush1.bf16.msra.mxu1 %v13722_v16  ;;  %4101 = vmatprep.subr.bf16.mxu0 %v13727_v57 }
 0x3b9   : > { %5517 = vmatprep.subr.bf16.mxu1 %v13730_v58 }
 0x3bb   : > { %4102 = vmatpush1.bf16.msra.mxu0 %v13725_v63 }
 0x3bc   : > { %5518 = vmatpush1.bf16.msra.mxu1 %v13728_v0  ;;  %4103 = vmatprep.subr.bf16.mxu0 %v13733_v17  ;;  %v13783_v0 = vld [vmem:[%s18609_s11 + $0x1c4] ss:$16 sps:$4 sm:$0xff]   ;;  %v13786_v17 = vld [vmem:[%s18609_s11 + $0x1cc] ss:$16 sps:$4 sm:$0xff]  }
 0x3bd   : > { %5519 = vmatprep.subr.bf16.mxu1 %v13736_v18 }
 0x3bf   : > { %4104 = vmatpush1.bf16.msra.mxu0 %v13731_v19  ;;  %v13779_v19 = vld [vmem:[%s18607_s9] sm:$0x1f]  }
 0x3c0   : > { %5520 = vmatpush1.bf16.msra.mxu1 %v13734_v20  ;;  %4105 = vmatprep.subr.bf16.mxu0 %v13739_v21  ;;  %v13780_v20 = vld [vmem:[%s18608_s10] sm:$0x1f]  }
 0x3c1   : > { %5521 = vmatprep.subr.bf16.mxu1 %v13742_v22  ;;  %v13781_v21 = vld [vmem:[%s18609_s11 + $0x1c0] ss:$16 sps:$4 sm:$0xff]   ;;  %v13784_v22 = vld [vmem:[%s18609_s11 + $0x1c8] ss:$16 sps:$4 sm:$0xff]  }
 0x3c3   : > { %4106 = vmatpush1.bf16.msra.mxu0 %v13737_v23  ;;  %v13789_v23 = vld [vmem:[%s18609_s11 + $0x1e4] ss:$16 sps:$4 sm:$0xff]  }
 0x3c4   : > { %5522 = vmatpush1.bf16.msra.mxu1 %v13740_v36  ;;  %4107 = vmatprep.subr.bf16.mxu0 %v13745_v24  ;;  %v13792_v36 = vld [vmem:[%s18609_s11 + $0x1ec] ss:$16 sps:$4 sm:$0xff]   ;;  %v13787_v24 = vld [vmem:[%s18609_s11 + $0x1e0] ss:$16 sps:$4 sm:$0xff]  }
 0x3c5   : > { %5523 = vmatprep.subr.bf16.mxu1 %v13748_v25  ;;  %v13790_v25 = vld [vmem:[%s18609_s11 + $0x1e8] ss:$16 sps:$4 sm:$0xff]  }
 0x3c7   : > { %4108 = vmatpush1.bf16.msra.mxu0 %v13743_v26  ;;  %v13795_v26 = vld [vmem:[%s18609_s11 + $0x204] ss:$16 sps:$4 sm:$0xff]  }
 0x3c8   : > { %5524 = vmatpush1.bf16.msra.mxu1 %v13746_v27  ;;  %4109 = vmatprep.subr.bf16.mxu0 %v13751_v28  ;;  %v13798_v27 = vld [vmem:[%s18609_s11 + $0x20c] ss:$16 sps:$4 sm:$0xff]   ;;  %v13793_v28 = vld [vmem:[%s18609_s11 + $0x200] ss:$16 sps:$4 sm:$0xff]  }
 0x3c9   : > { %5525 = vmatprep.subr.bf16.mxu1 %v13754_v29  ;;  %v13796_v29 = vld [vmem:[%s18609_s11 + $0x208] ss:$16 sps:$4 sm:$0xff]  }
 0x3cb   : > { %4110 = vmatpush1.bf16.msra.mxu0 %v13749_v30  ;;  %v13801_v30 = vld [vmem:[%s18609_s11 + $0x224] ss:$16 sps:$4 sm:$0xff]  }
 0x3cc   : > { %5526 = vmatpush1.bf16.msra.mxu1 %v13752_v31  ;;  %4111 = vmatprep.subr.bf16.mxu0 %v13757_v32  ;;  %v13804_v31 = vld [vmem:[%s18609_s11 + $0x22c] ss:$16 sps:$4 sm:$0xff]   ;;  %v13799_v32 = vld [vmem:[%s18609_s11 + $0x220] ss:$16 sps:$4 sm:$0xff]  }
 0x3cd   : > { %5527 = vmatprep.subr.bf16.mxu1 %v13760_v34  ;;  %v13802_v34 = vld [vmem:[%s18609_s11 + $0x228] ss:$16 sps:$4 sm:$0xff]  }
 0x3cf   : > { %4112 = vmatpush1.bf16.msra.mxu0 %v13755_v35  ;;  %v13807_v35 = vld [vmem:[%s18609_s11 + $0x244] ss:$16 sps:$4 sm:$0xff]  }
 0x3d0   : > { %5528 = vmatpush1.bf16.msra.mxu1 %v13758_v37  ;;  %4113 = vmatprep.subr.bf16.mxu0 %v13763_v38  ;;  %v13810_v37 = vld [vmem:[%s18609_s11 + $0x24c] ss:$16 sps:$4 sm:$0xff]   ;;  %v13805_v38 = vld [vmem:[%s18609_s11 + $0x240] ss:$16 sps:$4 sm:$0xff]  }
 0x3d1   : > { %5529 = vmatprep.subr.bf16.mxu1 %v13766_v39  ;;  %v13808_v39 = vld [vmem:[%s18609_s11 + $0x248] ss:$16 sps:$4 sm:$0xff]  }
 0x3d3   : > { %4114 = vmatpush1.bf16.msra.mxu0 %v13761_v40  ;;  %v13813_v40 = vld [vmem:[%s18609_s11 + $0x264] ss:$16 sps:$4 sm:$0xff]  }
 0x3d4   : > { %5530 = vmatpush1.bf16.msra.mxu1 %v13764_v41  ;;  %4115 = vmatprep.subr.bf16.mxu0 %v13769_v61  ;;  %v13816_v41 = vld [vmem:[%s18609_s11 + $0x26c] ss:$16 sps:$4 sm:$0xff]   ;;  %v13811_v61 = vld [vmem:[%s18609_s11 + $0x260] ss:$16 sps:$4 sm:$0xff]  }
 0x3d5   : > { %5531 = vmatprep.subr.bf16.mxu1 %v13772_v62  ;;  %v13814_v62 = vld [vmem:[%s18609_s11 + $0x268] ss:$16 sps:$4 sm:$0xff]  }
 0x3d7   : > { %4116 = vmatpush1.bf16.msra.mxu0 %v13767_v42  ;;  %v13819_v42 = vld [vmem:[%s18609_s11 + $0x284] ss:$16 sps:$4 sm:$0xff]  }
 0x3d8   : > { %5532 = vmatpush1.bf16.msra.mxu1 %v13770_v43  ;;  %4117 = vmatprep.subr.bf16.mxu0 %v13775_v51  ;;  %v13822_v43 = vld [vmem:[%s18609_s11 + $0x28c] ss:$16 sps:$4 sm:$0xff]   ;;  %v13817_v51 = vld [vmem:[%s18609_s11 + $0x280] ss:$16 sps:$4 sm:$0xff]  }
 0x3d9   : > { %5533 = vmatprep.subr.bf16.mxu1 %v13778_v52  ;;  %v13820_v52 = vld [vmem:[%s18609_s11 + $0x288] ss:$16 sps:$4 sm:$0xff]  }
 0x3db   : > { %4118 = vmatpush1.bf16.msra.mxu0 %v13773_v1  ;;  %v13825_v1 = vld [vmem:[%s18609_s11 + $0x2a4] ss:$16 sps:$4 sm:$0xff]  }
 0x3dc   : > { %5534 = vmatpush1.bf16.msra.mxu1 %v13776_v49  ;;  %v13828_v49 = vld [vmem:[%s18609_s11 + $0x2ac] ss:$16 sps:$4 sm:$0xff]  }
 0x3de   : > { %4120 = vmatmul.mubr.bf16.vlgmr.msra.gmra.mrb[24].mxu0 %v3718_v53 }
 0x3df   : > { %5536 = vmatmul.mubr.bf16.vlgmr.msra.gmra.mrb[24].mxu1 %v3718_v53  ;;  %5626 = vmatprep.mubr.bf16.mxu0 %v14641_v2  ;;  %v13823_v53 = vld [vmem:[%s18609_s11 + $0x2a0] ss:$16 sps:$4 sm:$0xff]  }
 0x3e0   : > { %5679 = vmatprep.mubr.bf16.mxu1 %v14641_v2 }
 0x4b1   : > { %v4121_v44 = vpop.f32.mrb[24].mxu0 }
 0x4b2   : > { %v5537_v46 = vpop.f32.mrb[24].mxu1  ;;  %v4123_v4 = vpop.f32.mrb[25].mxu0 }
 0x4b3   : > { %v5550_v6 = vmax.f32 %v4121_v44, %v5537_v46  ;;  %v5539_v8 = vpop.f32.mrb[25].mxu1  ;;  %v4125_v60 = vpop.f32.mrb[26].mxu0  ;;  %v13831_v44 = vld [vmem:[%s18609_s11 + $0x2c4] ss:$16 sps:$4 sm:$0xff]   ;;  %v13829_v46 = vld [vmem:[%s18609_s11 + $0x2c0] ss:$16 sps:$4 sm:$0xff]  }
 0x4b4   : > { %v5551_v9 = vmax.f32 %v4123_v4, %v5539_v8  ;;  %v5541_v11 = vpop.f32.mrb[26].mxu1  ;;  %v4127_v47 = vpop.f32.mrb[27].mxu0  ;;  %v13832_v4 = vld [vmem:[%s18609_s11 + $0x2c8] ss:$16 sps:$4 sm:$0xff]   ;;  %v13835_v8 = vld [vmem:[%s18609_s11 + $0x2e0] ss:$16 sps:$4 sm:$0xff]  }
 0x4b5   : > { %v5566_v10 = vadd.f32 %v5559_v45, %v5550_v6  ;;  %v5552_v59 = vmax.f32 %v4125_v60, %v5541_v11  ;;  %v5543_v12 = vpop.f32.mrb[27].mxu1  ;;  %v13840_v6 = vld [vmem:[%s18609_s11 + $0x2ec] ss:$16 sps:$4 sm:$0xff]   ;;  %v13838_v60 = vld [vmem:[%s18609_s11 + $0x2e8] ss:$16 sps:$4 sm:$0xff]  }
 0x4b6   : > { %v5567_v48 = vadd.f32 %v5563_v5, %v5551_v9  ;;  %v5553_v13 = vmax.f32 %v4127_v47, %v5543_v12  ;;  %v13843_v9 = vld [vmem:[%s18609_s11 + $0x304] ss:$16 sps:$4 sm:$0xff]   ;;  %v13846_v11 = vld [vmem:[%s18609_s11 + $0x30c] ss:$16 sps:$4 sm:$0xff]   ;;  %v13841_v47 = vld [vmem:[%s18609_s11 + $0x300] ss:$16 sps:$4 sm:$0xff]  }
 0x4b7   : > { %v5568_v50 = vadd.f32 %v5559_v45, %v5552_v59  ;;  %v5570_v15 = vmax.f32 %v5566_v10, 0.0  ;;  %v13834_v45 = vld [vmem:[%s18609_s11 + $0x2cc] ss:$16 sps:$4 sm:$0xff]   ;;  %v13844_v10 = vld [vmem:[%s18609_s11 + $0x308] ss:$16 sps:$4 sm:$0xff]  }
 0x4b8   : > { %v5569_v14 = vadd.f32 %v5563_v5, %v5553_v13  ;;  %v5571_v16 = vmax.f32 %v5567_v48, 0.0  ;;  %v13837_v5 = vld [vmem:[%s18609_s11 + $0x2e4] ss:$16 sps:$4 sm:$0xff]   ;;  %v13852_v12 = vld [vmem:[%s18609_s11 + $0x32c] ss:$16 sps:$4 sm:$0xff]  }
 0x4b9   : > { %v5572_v33 = vmax.f32 %v5568_v50, 0.0  ;;  %v13849_v59 = vld [vmem:[%s18609_s11 + $0x324] ss:$16 sps:$4 sm:$0xff]   ;;  %v13847_v48 = vld [vmem:[%s18609_s11 + $0x320] ss:$16 sps:$4 sm:$0xff]  }
 0x4ba   : > { %v5573_v57 = vmax.f32 %v5569_v14, 0.0  ;;  %v13850_v13 = vld [vmem:[%s18609_s11 + $0x328] ss:$16 sps:$4 sm:$0xff]   ;;  %v13855_v50 = vld [vmem:[%s18609_s11 + $0x344] ss:$16 sps:$4 sm:$0xff]  }
 0x4bb   : > { %v5576_v58 = vpack.c.bf16 %v5572_v33, %v5570_v15  ;;  %v13858_v14 = vld [vmem:[%s18609_s11 + $0x34c] ss:$16 sps:$4 sm:$0xff]   ;;  %v13853_v15 = vld [vmem:[%s18609_s11 + $0x340] ss:$16 sps:$4 sm:$0xff]   ;;  %v13856_v33 = vld [vmem:[%s18609_s11 + $0x348] ss:$16 sps:$4 sm:$0xff]  }
 0x4bc   : > { %v5577_v63 = vpack.c.bf16 %v5573_v57, %v5571_v16  ;;  %v13859_v16 = vld [vmem:[%s18609_s11 + $0x360] ss:$16 sps:$4 sm:$0xff]   ;;  %v13861_v57 = vld [vmem:[%s18609_s11 + $0x364] ss:$16 sps:$4 sm:$0xff]  }
 0x4bd   : > { %v5589_v18 = vsel %vm1275_vm3, %v5576_v58, 0  ;;  %v13862_v58 = vld [vmem:[%s18609_s11 + $0x368] ss:$16 sps:$4 sm:$0xff]  }
 0x4be   : > { %11745 = vmatprep.subr.msk.bf16.mxu0 %vm1275_vm3, %v5577_v63  ;;  %11748 = vmatprep.subr.msk.bf16.mxu1 %vm1275_vm3, %v5577_v63  ;;  %v13864_v63 = vld [vmem:[%s18609_s11 + $0x36c] ss:$16 sps:$4 sm:$0xff]  }
 0x4bf   : > { %5595 = vmatpush1.bf16.msra.mxu0 %v5589_v18  ;;  %5648 = vmatpush1.bf16.msra.mxu1 %v5589_v18 }
 0x4c0   : > { %6108 = vmatprep.subr.bf16.mxu0 %v13783_v0  ;;  %6149 = vmatprep.subr.bf16.mxu1 %v13786_v17  ;;  %v13867_v0 = vld [vmem:[%s18609_s11 + $0x4] ss:$16 sps:$4 sm:$0xff]   ;;  %v13870_v17 = vld [vmem:[%s18609_s11 + $0xc] ss:$16 sps:$4 sm:$0xff]  }
 0x4c2   : > { %11746 = vmatmul.mubr.msk.bf16.vlgmr.msra.gmra.mrb[28].mxu0 %vm5583_vm5, %v13779_v19  ;;  %11749 = vmatmul.mubr.msk.bf16.vlgmr.msra.gmra.mrb[28].mxu1 %vm5583_vm5, %v13780_v20 }
 0x4c3   : > { %6109 = vmatpush1.bf16.msra.mxu0 %v13781_v21  ;;  %6150 = vmatpush1.bf16.msra.mxu1 %v13784_v22 }
 0x4c4   : > { %6110 = vmatprep.subr.bf16.mxu0 %v13789_v23  ;;  %6151 = vmatprep.subr.bf16.mxu1 %v13792_v36 }
 0x4c7   : > { %6111 = vmatpush1.bf16.msra.mxu0 %v13787_v24  ;;  %6152 = vmatpush1.bf16.msra.mxu1 %v13790_v25 }
 0x4c8   : > { %6112 = vmatprep.subr.bf16.mxu0 %v13795_v26  ;;  %6153 = vmatprep.subr.bf16.mxu1 %v13798_v27 }
 0x4cb   : > { %6113 = vmatpush1.bf16.msra.mxu0 %v13793_v28  ;;  %6154 = vmatpush1.bf16.msra.mxu1 %v13796_v29 }
 0x4cc   : > { %6114 = vmatprep.subr.bf16.mxu0 %v13801_v30  ;;  %6155 = vmatprep.subr.bf16.mxu1 %v13804_v31 }
 0x4cf   : > { %6115 = vmatpush1.bf16.msra.mxu0 %v13799_v32  ;;  %6156 = vmatpush1.bf16.msra.mxu1 %v13802_v34 }
 0x4d0   : > { %6116 = vmatprep.subr.bf16.mxu0 %v13807_v35  ;;  %6157 = vmatprep.subr.bf16.mxu1 %v13810_v37 }
 0x4d3   : > { %6117 = vmatpush1.bf16.msra.mxu0 %v13805_v38  ;;  %6158 = vmatpush1.bf16.msra.mxu1 %v13808_v39 }
 0x4d4   : > { %6118 = vmatprep.subr.bf16.mxu0 %v13813_v40  ;;  %6159 = vmatprep.subr.bf16.mxu1 %v13816_v41 }
 0x4d7   : > { %6119 = vmatpush1.bf16.msra.mxu0 %v13811_v61  ;;  %6160 = vmatpush1.bf16.msra.mxu1 %v13814_v62  ;;  %v13865_v61 = vld [vmem:[%s18609_s11] ss:$16 sps:$4 sm:$0xff]   ;;  %v13868_v62 = vld [vmem:[%s18609_s11 + $0x8] ss:$16 sps:$4 sm:$0xff]  }
 0x4d8   : > { %6120 = vmatprep.subr.bf16.mxu0 %v13819_v42  ;;  %6161 = vmatprep.subr.bf16.mxu1 %v13822_v43  ;;  %v13873_v43 = vld [vmem:[%s18609_s11 + $0x24] ss:$16 sps:$4 sm:$0xff]  }
 0x4db   : > { %6121 = vmatpush1.bf16.msra.mxu0 %v13817_v51  ;;  %6162 = vmatpush1.bf16.msra.mxu1 %v13820_v52  ;;  %v13876_v51 = vld [vmem:[%s18609_s11 + $0x2c] ss:$16 sps:$4 sm:$0xff]   ;;  %v13871_v52 = vld [vmem:[%s18609_s11 + $0x20] ss:$16 sps:$4 sm:$0xff]  }
 0x4dc   : > { %6122 = vmatprep.subr.bf16.mxu0 %v13825_v1  ;;  %6163 = vmatprep.subr.bf16.mxu1 %v13828_v49  ;;  %v13874_v1 = vld [vmem:[%s18609_s11 + $0x28] ss:$16 sps:$4 sm:$0xff]   ;;  %v13879_v49 = vld [vmem:[%s18609_s11 + $0x44] ss:$16 sps:$4 sm:$0xff]  }
 0x4df   : > { %6123 = vmatpush1.bf16.msra.mxu0 %v13823_v53  ;;  %6164 = vmatpush1.bf16.msra.mxu1 %v13826_v3  ;;  %v13882_v53 = vld [vmem:[%s18609_s11 + $0x4c] ss:$16 sps:$4 sm:$0xff]   ;;  %v13877_v3 = vld [vmem:[%s18609_s11 + $0x40] ss:$16 sps:$4 sm:$0xff]  }
 0x4e0   : > { %6124 = vmatprep.subr.bf16.mxu0 %v13831_v44  ;;  %6165 = vmatprep.subr.bf16.mxu1 %v13834_v45  ;;  %v13880_v44 = vld [vmem:[%s18609_s11 + $0x48] ss:$16 sps:$4 sm:$0xff]   ;;  %v13885_v45 = vld [vmem:[%s18609_s11 + $0x64] ss:$16 sps:$4 sm:$0xff]  }
 0x4e3   : > { %6125 = vmatpush1.bf16.msra.mxu0 %v13829_v46  ;;  %6166 = vmatpush1.bf16.msra.mxu1 %v13832_v4  ;;  %v13888_v46 = vld [vmem:[%s18609_s11 + $0x6c] ss:$16 sps:$4 sm:$0xff]   ;;  %v13883_v4 = vld [vmem:[%s18609_s11 + $0x60] ss:$16 sps:$4 sm:$0xff]  }
 0x4e4   : > { %6126 = vmatprep.subr.bf16.mxu0 %v13837_v5  ;;  %6167 = vmatprep.subr.bf16.mxu1 %v13840_v6  ;;  %v13886_v5 = vld [vmem:[%s18609_s11 + $0x68] ss:$16 sps:$4 sm:$0xff]   ;;  %v13891_v6 = vld [vmem:[%s18609_s11 + $0x84] ss:$16 sps:$4 sm:$0xff]  }
 0x4e7   : > { %6127 = vmatpush1.bf16.msra.mxu0 %v13835_v8  ;;  %6168 = vmatpush1.bf16.msra.mxu1 %v13838_v60  ;;  %v13894_v8 = vld [vmem:[%s18609_s11 + $0x8c] ss:$16 sps:$4 sm:$0xff]   ;;  %v13889_v60 = vld [vmem:[%s18609_s11 + $0x80] ss:$16 sps:$4 sm:$0xff]  }
 0x4e8   : > { %6128 = vmatprep.subr.bf16.mxu0 %v13843_v9  ;;  %6169 = vmatprep.subr.bf16.mxu1 %v13846_v11  ;;  %v13892_v9 = vld [vmem:[%s18609_s11 + $0x88] ss:$16 sps:$4 sm:$0xff]   ;;  %v13897_v11 = vld [vmem:[%s18609_s11 + $0xa4] ss:$16 sps:$4 sm:$0xff]  }
 0x4eb   : > { %6129 = vmatpush1.bf16.msra.mxu0 %v13841_v47  ;;  %6170 = vmatpush1.bf16.msra.mxu1 %v13844_v10  ;;  %v13900_v47 = vld [vmem:[%s18609_s11 + $0xac] ss:$16 sps:$4 sm:$0xff]   ;;  %v13895_v10 = vld [vmem:[%s18609_s11 + $0xa0] ss:$16 sps:$4 sm:$0xff]  }
 0x4ec   : > { %6130 = vmatprep.subr.bf16.mxu0 %v13849_v59  ;;  %6171 = vmatprep.subr.bf16.mxu1 %v13852_v12  ;;  %v13898_v59 = vld [vmem:[%s18609_s11 + $0xa8] ss:$16 sps:$4 sm:$0xff]   ;;  %v13903_v12 = vld [vmem:[%s18609_s11 + $0xc4] ss:$16 sps:$4 sm:$0xff]  }
 0x4ef   : > { %6131 = vmatpush1.bf16.msra.mxu0 %v13847_v48  ;;  %6172 = vmatpush1.bf16.msra.mxu1 %v13850_v13  ;;  %v13906_v48 = vld [vmem:[%s18609_s11 + $0xcc] ss:$16 sps:$4 sm:$0xff]   ;;  %v13901_v13 = vld [vmem:[%s18609_s11 + $0xc0] ss:$16 sps:$4 sm:$0xff]  }
 0x4f0   : > { %6132 = vmatprep.subr.bf16.mxu0 %v13855_v50  ;;  %6173 = vmatprep.subr.bf16.mxu1 %v13858_v14  ;;  %v13904_v50 = vld [vmem:[%s18609_s11 + $0xc8] ss:$16 sps:$4 sm:$0xff]   ;;  %v13909_v14 = vld [vmem:[%s18609_s11 + $0xe4] ss:$16 sps:$4 sm:$0xff]  }
 0x4f3   : > { %6133 = vmatpush1.bf16.msra.mxu0 %v13853_v15  ;;  %6174 = vmatpush1.bf16.msra.mxu1 %v13856_v33  ;;  %v13912_v15 = vld [vmem:[%s18609_s11 + $0xec] ss:$16 sps:$4 sm:$0xff]   ;;  %v13907_v33 = vld [vmem:[%s18609_s11 + $0xe0] ss:$16 sps:$4 sm:$0xff]  }
 0x4f4   : > { %6134 = vmatprep.subr.bf16.mxu0 %v13861_v57  ;;  %6175 = vmatprep.subr.bf16.mxu1 %v13864_v63  ;;  %v13915_v57 = vld [vmem:[%s18609_s11 + $0x104] ss:$16 sps:$4 sm:$0xff]   ;;  %v13913_v63 = vld [vmem:[%s18609_s11 + $0x100] ss:$16 sps:$4 sm:$0xff]  }
 0x4f7   : > { %6135 = vmatpush1.bf16.msra.mxu0 %v13859_v16  ;;  %6176 = vmatpush1.bf16.msra.mxu1 %v13862_v58  ;;  %v13910_v16 = vld [vmem:[%s18609_s11 + $0xe8] ss:$16 sps:$4 sm:$0xff]   ;;  %v13918_v58 = vld [vmem:[%s18609_s11 + $0x10c] ss:$16 sps:$4 sm:$0xff]  }
 0x4f8   : > { %6472 = vmatprep.subr.bf16.mxu0 %v13867_v0  ;;  %6513 = vmatprep.subr.bf16.mxu1 %v13870_v17  ;;  %v13916_v0 = vld [vmem:[%s18609_s11 + $0x108] ss:$16 sps:$4 sm:$0xff]   ;;  %v13921_v17 = vld [vmem:[%s18609_s11 + $0x124] ss:$16 sps:$4 sm:$0xff]  }
 0x595   : > { %v5628_v18 = vpop.f32.mrb[28].mxu0  ;;  %v5681_v19 = vpop.f32.mrb[28].mxu1 }
 0x596   : > { %v5690_v20 = vmax.f32 %v5628_v18, %v5681_v19  ;;  %v5630_v21 = vpop.f32.mrb[29].mxu0  ;;  %v5683_v22 = vpop.f32.mrb[29].mxu1  ;;  %v13924_v18 = vld [vmem:[%s18609_s11 + $0x12c] ss:$16 sps:$4 sm:$0xff]   ;;  %v13919_v19 = vld [vmem:[%s18609_s11 + $0x120] ss:$16 sps:$4 sm:$0xff]  }
 0x597   : > { %v5691_v23 = vmax.f32 %v5630_v21, %v5683_v22  ;;  %v5632_v36 = vpop.f32.mrb[30].mxu0  ;;  %v5685_v24 = vpop.f32.mrb[30].mxu1  ;;  %v13927_v21 = vld [vmem:[%s18609_s11 + $0x144] ss:$16 sps:$4 sm:$0xff]   ;;  %v13930_v22 = vld [vmem:[%s18609_s11 + $0x14c] ss:$16 sps:$4 sm:$0xff]  }
 0x598   : > { %v16851_v25 = vpack.c.bf16 %v5690_v20, %v5690_v20  ;;  %v5692_v26 = vmax.f32 %v5632_v36, %v5685_v24  ;;  %v5634_v27 = vpop.f32.mrb[31].mxu0  ;;  %v5687_v28 = vpop.f32.mrb[31].mxu1  ;;  %v13928_v36 = vld [vmem:[%s18609_s11 + $0x148] ss:$16 sps:$4 sm:$0xff]   ;;  %v13933_v24 = vld [vmem:[%s18609_s11 + $0x164] ss:$16 sps:$4 sm:$0xff]  }
 0x599   : > { %v5751_v29 = vpack.c.bf16 %v5691_v23, %v5691_v23  ;;  %v5693_v30 = vmax.f32 %v5634_v27, %v5687_v28  ;;  %v13931_v27 = vld [vmem:[%s18609_s11 + $0x160] ss:$16 sps:$4 sm:$0xff]   ;;  %v13934_v28 = vld [vmem:[%s18609_s11 + $0x168] ss:$16 sps:$4 sm:$0xff]  }
 0x59a   : > { %v16853_v31 = vpack.c.bf16 %v5692_v26, %v5690_v20  ;;  %v5812_v32 = vshll.u32 %v16851_v25, 16  ;;  %v5810_v40 = vshrl.u32 %v16851_v25, 16  ;;  %v13922_v20 = vld [vmem:[%s18609_s11 + $0x128] ss:$16 sps:$4 sm:$0xff]   ;;  %v13936_v26 = vld [vmem:[%s18609_s11 + $0x16c] ss:$16 sps:$4 sm:$0xff]  }
 0x59b   : > { %v16856_v34 = vpack.c.bf16 %v5693_v30, %v5691_v23  ;;  %v5819_v35 = vshll.u32 %v5751_v29, 16  ;;  %v5817_v38 = vshrl.u32 %v5751_v29, 16  ;;  %v13925_v23 = vld [vmem:[%s18609_s11 + $0x140] ss:$16 sps:$4 sm:$0xff]   ;;  %v13942_v30 = vld [vmem:[%s18609_s11 + $0x18c] ss:$16 sps:$4 sm:$0xff]  }
 0x59c   : > { %v5814_v37 = vrot.slane %v5812_v32, 1  ;;  %v13937_v32 = vld [vmem:[%s18609_s11 + $0x180] ss:$16 sps:$4 sm:$0xff]  }
 0x59d   : > { %v5821_v39 = vrot.slane %v5819_v35, 1  ;;  %v13940_v35 = vld [vmem:[%s18609_s11 + $0x188] ss:$16 sps:$4 sm:$0xff]  }
 0x59e   : > { %v5815_v42 = vor.u32 %v5814_v37, %v5810_v40  ;;  %v13945_v37 = vld [vmem:[%s18609_s11 + $0x1a4] ss:$16 sps:$4 sm:$0xff]   ;;  %v13946_v40 = vld [vmem:[%s18609_s11 + $0x1a8] ss:$16 sps:$4 sm:$0xff]  }
 0x59f   : > { %v5822_v41 = vor.u32 %v5821_v39, %v5817_v38  ;;  %v13948_v38 = vld [vmem:[%s18609_s11 + $0x1ac] ss:$16 sps:$4 sm:$0xff]   ;;  %v13943_v39 = vld [vmem:[%s18609_s11 + $0x1a0] ss:$16 sps:$4 sm:$0xff]  }
 0x5a1   : > { %11862 = vmatprep.mubr.msk.bf16.mxu0 %vm6104_vm6, %v5822_v41  ;;  %11863 = vmatprep.mubr.msk.bf16.mxu1 %vm6104_vm6, %v5822_v41  ;;  %v13951_v41 = vld [vmem:[%s18609_s11 + $0x384] ss:$16 sps:$4 sm:$0xff]  }
 0x5a2   : > { %6141 = vmatmul.mubr.bf16.vlgmr.msra.gmra.mrb[32].mxu0 %v5815_v42  ;;  %6182 = vmatmul.mubr.bf16.vlgmr.msra.gmra.mrb[32].mxu1 %v5815_v42  ;;  %v13952_v42 = vld [vmem:[%s18609_s11 + $0x388] ss:$16 sps:$4 sm:$0xff]  }
 0x5a3   : > { %6473 = vmatpush1.bf16.msra.mxu0 %v13865_v61  ;;  %6514 = vmatpush1.bf16.msra.mxu1 %v13868_v62  ;;  %v13954_v61 = vld [vmem:[%s18609_s11 + $0x38c] ss:$16 sps:$4 sm:$0xff]   ;;  %v13949_v62 = vld [vmem:[%s18609_s11 + $0x380] ss:$16 sps:$4 sm:$0xff]  }
 0x5a4   : > { %11920 = vmatprep.mubr.msk.bf16.mxu0 %vm6104_vm6, %v5751_v29  ;;  %11921 = vmatprep.mubr.msk.bf16.mxu1 %vm6104_vm6, %v5751_v29  ;;  %v13939_v29 = vld [vmem:[%s18609_s11 + $0x184] ss:$16 sps:$4 sm:$0xff]  }
 0x5a5   : > { %6474 = vmatprep.subr.bf16.mxu0 %v13873_v43  ;;  %6515 = vmatprep.subr.bf16.mxu1 %v13876_v51  ;;  %v6616_v43 = vrot.slane %v16856_v34, 1  ;;  %v13957_v51 = vld [vmem:[%s18609_s11 + $0x3a4] ss:$16 sps:$4 sm:$0xff]   ;;  %v13958_v34 = vld [vmem:[%s18609_s11 + $0x3a8] ss:$16 sps:$4 sm:$0xff]  }
 0x5a7   : > { %6475 = vmatpush1.bf16.msra.mxu0 %v13871_v52  ;;  %6516 = vmatpush1.bf16.msra.mxu1 %v13874_v1  ;;  %v13960_v52 = vld [vmem:[%s18609_s11 + $0x3ac] ss:$16 sps:$4 sm:$0xff]   ;;  %v13955_v1 = vld [vmem:[%s18609_s11 + $0x3a0] ss:$16 sps:$4 sm:$0xff]  }
 0x5a8   : > { %6476 = vmatprep.subr.bf16.mxu0 %v13879_v49  ;;  %6517 = vmatprep.subr.bf16.mxu1 %v13882_v53  ;;  %v13963_v49 = vld [vmem:[%s18609_s11 + $0x3c4] ss:$16 sps:$4 sm:$0xff]   ;;  %v13961_v53 = vld [vmem:[%s18609_s11 + $0x3c0] ss:$16 sps:$4 sm:$0xff]  }
 0x5ab   : > { %6477 = vmatpush1.bf16.msra.mxu0 %v13877_v3  ;;  %6518 = vmatpush1.bf16.msra.mxu1 %v13880_v44  ;;  %v13964_v3 = vld [vmem:[%s18609_s11 + $0x3c8] ss:$16 sps:$4 sm:$0xff]   ;;  %v13969_v44 = vld [vmem:[%s18609_s11 + $0x3e4] ss:$16 sps:$4 sm:$0xff]  }
 0x5ac   : > { %6478 = vmatprep.subr.bf16.mxu0 %v13885_v45  ;;  %6519 = vmatprep.subr.bf16.mxu1 %v13888_v46  ;;  %v13972_v45 = vld [vmem:[%s18609_s11 + $0x3ec] ss:$16 sps:$4 sm:$0xff]   ;;  %v13967_v46 = vld [vmem:[%s18609_s11 + $0x3e0] ss:$16 sps:$4 sm:$0xff]  }
 0x5af   : > { %6479 = vmatpush1.bf16.msra.mxu0 %v13883_v4  ;;  %6520 = vmatpush1.bf16.msra.mxu1 %v13886_v5  ;;  %v13970_v4 = vld [vmem:[%s18609_s11 + $0x3e8] ss:$16 sps:$4 sm:$0xff]   ;;  %v13975_v5 = vld [vmem:[%s18609_s11 + $0x404] ss:$16 sps:$4 sm:$0xff]  }
 0x5b0   : > { %6480 = vmatprep.subr.bf16.mxu0 %v13891_v6  ;;  %6521 = vmatprep.subr.bf16.mxu1 %v13894_v8  ;;  %v13978_v6 = vld [vmem:[%s18609_s11 + $0x40c] ss:$16 sps:$4 sm:$0xff]   ;;  %v13973_v8 = vld [vmem:[%s18609_s11 + $0x400] ss:$16 sps:$4 sm:$0xff]  }
 0x5b3   : > { %6481 = vmatpush1.bf16.msra.mxu0 %v13889_v60  ;;  %6522 = vmatpush1.bf16.msra.mxu1 %v13892_v9  ;;  %v13976_v60 = vld [vmem:[%s18609_s11 + $0x408] ss:$16 sps:$4 sm:$0xff]   ;;  %v13981_v9 = vld [vmem:[%s18609_s11 + $0x424] ss:$16 sps:$4 sm:$0xff]  }
 0x5b4   : > { %6482 = vmatprep.subr.bf16.mxu0 %v13897_v11  ;;  %6523 = vmatprep.subr.bf16.mxu1 %v13900_v47  ;;  %v13984_v11 = vld [vmem:[%s18609_s11 + $0x42c] ss:$16 sps:$4 sm:$0xff]   ;;  %v13979_v47 = vld [vmem:[%s18609_s11 + $0x420] ss:$16 sps:$4 sm:$0xff]  }
 0x5b7   : > { %6483 = vmatpush1.bf16.msra.mxu0 %v13895_v10  ;;  %6524 = vmatpush1.bf16.msra.mxu1 %v13898_v59  ;;  %v13982_v10 = vld [vmem:[%s18609_s11 + $0x428] ss:$16 sps:$4 sm:$0xff]   ;;  %v13987_v59 = vld [vmem:[%s18609_s11 + $0x444] ss:$16 sps:$4 sm:$0xff]  }
 0x5b8   : > { %6484 = vmatprep.subr.bf16.mxu0 %v13903_v12  ;;  %6525 = vmatprep.subr.bf16.mxu1 %v13906_v48  ;;  %v13990_v12 = vld [vmem:[%s18609_s11 + $0x44c] ss:$16 sps:$4 sm:$0xff]   ;;  %v13985_v48 = vld [vmem:[%s18609_s11 + $0x440] ss:$16 sps:$4 sm:$0xff]  }
 0x5bb   : > { %6485 = vmatpush1.bf16.msra.mxu0 %v13901_v13  ;;  %6526 = vmatpush1.bf16.msra.mxu1 %v13904_v50  ;;  %v13988_v13 = vld [vmem:[%s18609_s11 + $0x448] ss:$16 sps:$4 sm:$0xff]   ;;  %v13993_v50 = vld [vmem:[%s18609_s11 + $0x464] ss:$16 sps:$4 sm:$0xff]  }
 0x5bc   : > { %6486 = vmatprep.subr.bf16.mxu0 %v13909_v14  ;;  %6527 = vmatprep.subr.bf16.mxu1 %v13912_v15  ;;  %v13996_v14 = vld [vmem:[%s18609_s11 + $0x46c] ss:$16 sps:$4 sm:$0xff]   ;;  %v13991_v15 = vld [vmem:[%s18609_s11 + $0x460] ss:$16 sps:$4 sm:$0xff]  }
 0x5bf   : > { %6487 = vmatpush1.bf16.msra.mxu0 %v13907_v33  ;;  %6528 = vmatpush1.bf16.msra.mxu1 %v13910_v16  ;;  %v13994_v33 = vld [vmem:[%s18609_s11 + $0x468] ss:$16 sps:$4 sm:$0xff]   ;;  %v13999_v16 = vld [vmem:[%s18609_s11 + $0x484] ss:$16 sps:$4 sm:$0xff]  }
 0x5c0   : > { %6488 = vmatprep.subr.bf16.mxu0 %v13915_v57  ;;  %6529 = vmatprep.subr.bf16.mxu1 %v13918_v58  ;;  %v14002_v57 = vld [vmem:[%s18609_s11 + $0x48c] ss:$16 sps:$4 sm:$0xff]   ;;  %v13997_v58 = vld [vmem:[%s18609_s11 + $0x480] ss:$16 sps:$4 sm:$0xff]  }
 0x5c3   : > { %6489 = vmatpush1.bf16.msra.mxu0 %v13913_v63  ;;  %6530 = vmatpush1.bf16.msra.mxu1 %v13916_v0  ;;  %v14000_v63 = vld [vmem:[%s18609_s11 + $0x488] ss:$16 sps:$4 sm:$0xff]   ;;  %v14005_v0 = vld [vmem:[%s18609_s11 + $0x4a4] ss:$16 sps:$4 sm:$0xff]  }
 0x5c4   : > { %6490 = vmatprep.subr.bf16.mxu0 %v13921_v17  ;;  %6531 = vmatprep.subr.bf16.mxu1 %v13924_v18  ;;  %v14008_v17 = vld [vmem:[%s18609_s11 + $0x4ac] ss:$16 sps:$4 sm:$0xff]   ;;  %v14003_v18 = vld [vmem:[%s18609_s11 + $0x4a0] ss:$16 sps:$4 sm:$0xff]  }
 0x5c7   : > { %6491 = vmatpush1.bf16.msra.mxu0 %v13919_v19  ;;  %6532 = vmatpush1.bf16.msra.mxu1 %v13922_v20  ;;  %v14006_v19 = vld [vmem:[%s18609_s11 + $0x4a8] ss:$16 sps:$4 sm:$0xff]   ;;  %v14011_v20 = vld [vmem:[%s18609_s11 + $0x4c4] ss:$16 sps:$4 sm:$0xff]  }
 0x5c8   : > { %6492 = vmatprep.subr.bf16.mxu0 %v13927_v21  ;;  %6533 = vmatprep.subr.bf16.mxu1 %v13930_v22  ;;  %v14014_v21 = vld [vmem:[%s18609_s11 + $0x4cc] ss:$16 sps:$4 sm:$0xff]   ;;  %v14009_v22 = vld [vmem:[%s18609_s11 + $0x4c0] ss:$16 sps:$4 sm:$0xff]  }
 0x5cb   : > { %6493 = vmatpush1.bf16.msra.mxu0 %v13925_v23  ;;  %6534 = vmatpush1.bf16.msra.mxu1 %v13928_v36  ;;  %v14012_v23 = vld [vmem:[%s18609_s11 + $0x4c8] ss:$16 sps:$4 sm:$0xff]   ;;  %v14017_v36 = vld [vmem:[%s18609_s11 + $0x4e4] ss:$16 sps:$4 sm:$0xff]  }
 0x5cc   : > { %6494 = vmatprep.subr.bf16.mxu0 %v13933_v24  ;;  %6535 = vmatprep.subr.bf16.mxu1 %v13936_v26  ;;  %v14020_v24 = vld [vmem:[%s18609_s11 + $0x4ec] ss:$16 sps:$4 sm:$0xff]   ;;  %v14015_v26 = vld [vmem:[%s18609_s11 + $0x4e0] ss:$16 sps:$4 sm:$0xff]  }
 0x5cf   : > { %6495 = vmatpush1.bf16.msra.mxu0 %v13931_v27  ;;  %6536 = vmatpush1.bf16.msra.mxu1 %v13934_v28  ;;  %v14018_v27 = vld [vmem:[%s18609_s11 + $0x4e8] ss:$16 sps:$4 sm:$0xff]   ;;  %v14023_v28 = vld [vmem:[%s18609_s11 + $0x504] ss:$16 sps:$4 sm:$0xff]  }
 0x5d0   : > { %6496 = vmatprep.subr.bf16.mxu0 %v13939_v29  ;;  %6537 = vmatprep.subr.bf16.mxu1 %v13942_v30  ;;  %v14026_v29 = vld [vmem:[%s18609_s11 + $0x50c] ss:$16 sps:$4 sm:$0xff]   ;;  %v14021_v30 = vld [vmem:[%s18609_s11 + $0x500] ss:$16 sps:$4 sm:$0xff]  }
 0x5d3   : > { %6497 = vmatpush1.bf16.msra.mxu0 %v13937_v32  ;;  %6538 = vmatpush1.bf16.msra.mxu1 %v13940_v35  ;;  %v14024_v32 = vld [vmem:[%s18609_s11 + $0x508] ss:$16 sps:$4 sm:$0xff]   ;;  %v14029_v35 = vld [vmem:[%s18609_s11 + $0x524] ss:$16 sps:$4 sm:$0xff]  }
 0x5d4   : > { %6498 = vmatprep.subr.bf16.mxu0 %v13945_v37  ;;  %6539 = vmatprep.subr.bf16.mxu1 %v13948_v38  ;;  %v14032_v37 = vld [vmem:[%s18609_s11 + $0x52c] ss:$16 sps:$4 sm:$0xff]   ;;  %v14027_v38 = vld [vmem:[%s18609_s11 + $0x520] ss:$16 sps:$4 sm:$0xff]  }
 0x5d7   : > { %6499 = vmatpush1.bf16.msra.mxu0 %v13943_v39  ;;  %6540 = vmatpush1.bf16.msra.mxu1 %v13946_v40  ;;  %v14030_v39 = vld [vmem:[%s18609_s11 + $0x528] ss:$16 sps:$4 sm:$0xff]   ;;  %v6615_v40 = vrot.slane %v16853_v31, 1 }
 0x5d8   : > { %6901 = vmatprep.subr.bf16.mxu0 %v13951_v41  ;;  %6942 = vmatprep.subr.bf16.mxu1 %v13954_v61  ;;  %v14033_v41 = vld [vmem:[%s18611_s13 + $0x2a0] ss:$12 sps:$4 sm:$0xff]   ;;  %v14035_v61 = vld [vmem:[%s18611_s13 + $0x2a4] ss:$12 sps:$4 sm:$0xff]  }
 0x5d9   : > { %v14036_v31 = vld [vmem:[%s18611_s13 + $0x2b8] ss:$12 sps:$4 sm:$0xff]  }
 0x5da   : > { %6505 = vmatmul.mubr.bf16.vlgmr.msra.gmra.mrb[36].mxu0 %v16851_v25  ;;  %6546 = vmatmul.mubr.bf16.vlgmr.msra.gmra.mrb[36].mxu1 %v16851_v25  ;;  %v13966_v25 = vld [vmem:[%s18609_s11 + $0x3cc] ss:$16 sps:$4 sm:$0xff]  }
 0x5db   : > { %6902 = vmatpush1.bf16.msra.mxu0 %v13949_v62  ;;  %12034 = vmatprep.mubr.msk.bf16.mxu0 %vm6104_vm6, %v6616_v43  ;;  %v14038_v62 = vld [vmem:[%s18611_s13 + $0x2bc] ss:$12 sps:$4 sm:$0xff]  }
 0x5dc   : > { %6943 = vmatpush1.bf16.msra.mxu1 %v13952_v42  ;;  %12035 = vmatprep.mubr.msk.bf16.mxu1 %vm6104_vm6, %v6616_v43  ;;  %v14048_v42 = vld [vmem:[%s18611_s13 + $0x420] ss:$12 sps:$4 sm:$0xff]   ;;  %v14050_v43 = vld [vmem:[%s18611_s13 + $0x424] ss:$12 sps:$4 sm:$0xff]  }
 0x5dd   : > { %6903 = vmatprep.subr.bf16.mxu0 %v13957_v51  ;;  %6944 = vmatprep.subr.bf16.mxu1 %v13960_v52  ;;  %v14041_v51 = vld [vmem:[%s18611_s13 + $0x2d4] ss:$12 sps:$4 sm:$0xff]   ;;  %v14056_v52 = vld [vmem:[%s18611_s13 + $0x43c] ss:$12 sps:$4 sm:$0xff]  }
 0x5df   : > { %6904 = vmatpush1.bf16.msra.mxu0 %v13955_v1  ;;  %v14054_v1 = vld [vmem:[%s18611_s13 + $0x438] ss:$12 sps:$4 sm:$0xff]  }
 0x5e0   : > { %6945 = vmatpush1.bf16.msra.mxu1 %v13958_v34  ;;  %6905 = vmatprep.subr.bf16.mxu0 %v13963_v49  ;;  %v14039_v34 = vld [vmem:[%s18611_s13 + $0x2d0] ss:$12 sps:$4 sm:$0xff]   ;;  %v14062_v49 = vld [vmem:[%s18611_s13 + $0x454] ss:$12 sps:$4 sm:$0xff]  }
 0x5e1   : > { %6946 = vmatprep.subr.bf16.mxu1 %v13966_v25  ;;  %v14044_v25 = vld [vmem:[%s18611_s13 + $0x2ec] ss:$12 sps:$4 sm:$0xff]  }
 0x5e3   : > { %6906 = vmatpush1.bf16.msra.mxu0 %v13961_v53  ;;  %v14060_v53 = vld [vmem:[%s18611_s13 + $0x450] ss:$12 sps:$4 sm:$0xff]  }
 0x5e4   : > { %6947 = vmatpush1.bf16.msra.mxu1 %v13964_v3  ;;  %6907 = vmatprep.subr.bf16.mxu0 %v13969_v44  ;;  %v14042_v3 = vld [vmem:[%s18611_s13 + $0x2e8] ss:$12 sps:$4 sm:$0xff]   ;;  %v14068_v44 = vld [vmem:[%s18611_s13 + $0x46c] ss:$12 sps:$4 sm:$0xff]  }
 0x5e5   : > { %6948 = vmatprep.subr.bf16.mxu1 %v13972_v45  ;;  %v14047_v45 = vld [vmem:[%s18611_s13 + $0x304] ss:$12 sps:$4 sm:$0xff]  }
 0x5e7   : > { %6908 = vmatpush1.bf16.msra.mxu0 %v13967_v46  ;;  %v14066_v46 = vld [vmem:[%s18611_s13 + $0x468] ss:$12 sps:$4 sm:$0xff]  }
 0x5e8   : > { %6949 = vmatpush1.bf16.msra.mxu1 %v13970_v4  ;;  %6909 = vmatprep.subr.bf16.mxu0 %v13975_v5  ;;  %v14045_v4 = vld [vmem:[%s18611_s13 + $0x300] ss:$12 sps:$4 sm:$0xff]   ;;  %v14074_v5 = vld [vmem:[%s18611_s13 + $0x484] ss:$12 sps:$4 sm:$0xff]  }
 0x5e9   : > { %6950 = vmatprep.subr.bf16.mxu1 %v13978_v6  ;;  %v14053_v6 = vld [vmem:[%s18611_s13 + $0x31c] ss:$12 sps:$4 sm:$0xff]  }
 0x5eb   : > { %6910 = vmatpush1.bf16.msra.mxu0 %v13973_v8  ;;  %v14072_v8 = vld [vmem:[%s18611_s13 + $0x480] ss:$12 sps:$4 sm:$0xff]  }
 0x5ec   : > { %6951 = vmatpush1.bf16.msra.mxu1 %v13976_v60  ;;  %6911 = vmatprep.subr.bf16.mxu0 %v13981_v9  ;;  %v14051_v60 = vld [vmem:[%s18611_s13 + $0x318] ss:$12 sps:$4 sm:$0xff]   ;;  %v14080_v9 = vld [vmem:[%s18611_s13 + $0x49c] ss:$12 sps:$4 sm:$0xff]  }
 0x5ed   : > { %6952 = vmatprep.subr.bf16.mxu1 %v13984_v11  ;;  %v14059_v11 = vld [vmem:[%s18611_s13 + $0x334] ss:$12 sps:$4 sm:$0xff]  }
 0x5ef   : > { %6912 = vmatpush1.bf16.msra.mxu0 %v13979_v47  ;;  %v14078_v47 = vld [vmem:[%s18611_s13 + $0x498] ss:$12 sps:$4 sm:$0xff]  }
 0x5f0   : > { %6953 = vmatpush1.bf16.msra.mxu1 %v13982_v10  ;;  %6913 = vmatprep.subr.bf16.mxu0 %v13987_v59  ;;  %v14057_v10 = vld [vmem:[%s18611_s13 + $0x330] ss:$12 sps:$4 sm:$0xff]   ;;  %v14086_v59 = vld [vmem:[%s18611_s13 + $0x4b4] ss:$12 sps:$4 sm:$0xff]  }
 0x5f1   : > { %6954 = vmatprep.subr.bf16.mxu1 %v13990_v12  ;;  %v14065_v12 = vld [vmem:[%s18611_s13 + $0x34c] ss:$12 sps:$4 sm:$0xff]  }
 0x5f3   : > { %6914 = vmatpush1.bf16.msra.mxu0 %v13985_v48  ;;  %v14084_v48 = vld [vmem:[%s18611_s13 + $0x4b0] ss:$12 sps:$4 sm:$0xff]  }
 0x5f4   : > { %6955 = vmatpush1.bf16.msra.mxu1 %v13988_v13  ;;  %6915 = vmatprep.subr.bf16.mxu0 %v13993_v50  ;;  %v14063_v13 = vld [vmem:[%s18611_s13 + $0x348] ss:$12 sps:$4 sm:$0xff]   ;;  %v14092_v50 = vld [vmem:[%s18611_s13 + $0x4cc] ss:$12 sps:$4 sm:$0xff]  }
 0x5f5   : > { %6956 = vmatprep.subr.bf16.mxu1 %v13996_v14  ;;  %v14071_v14 = vld [vmem:[%s18611_s13 + $0x364] ss:$12 sps:$4 sm:$0xff]  }
 0x5f7   : > { %6916 = vmatpush1.bf16.msra.mxu0 %v13991_v15  ;;  %v14090_v15 = vld [vmem:[%s18611_s13 + $0x4c8] ss:$12 sps:$4 sm:$0xff]  }
 0x5f8   : > { %6957 = vmatpush1.bf16.msra.mxu1 %v13994_v33  ;;  %6917 = vmatprep.subr.bf16.mxu0 %v13999_v16  ;;  %v14069_v33 = vld [vmem:[%s18611_s13 + $0x360] ss:$12 sps:$4 sm:$0xff]   ;;  %v14077_v16 = vld [vmem:[%s18611_s13 + $0x37c] ss:$12 sps:$4 sm:$0xff]  }
 0x5f9   : > { %6958 = vmatprep.subr.bf16.mxu1 %v14002_v57  ;;  %v14075_v57 = vld [vmem:[%s18611_s13 + $0x378] ss:$12 sps:$4 sm:$0xff]  }
 0x5fb   : > { %6918 = vmatpush1.bf16.msra.mxu0 %v13997_v58  ;;  %v14083_v58 = vld [vmem:[%s18611_s13 + $0x394] ss:$12 sps:$4 sm:$0xff]  }
 0x5fc   : > { %6959 = vmatpush1.bf16.msra.mxu1 %v14000_v63  ;;  %6919 = vmatprep.subr.bf16.mxu0 %v14005_v0  ;;  %v14081_v63 = vld [vmem:[%s18611_s13 + $0x390] ss:$12 sps:$4 sm:$0xff]   ;;  %v14089_v0 = vld [vmem:[%s18611_s13 + $0x3ac] ss:$12 sps:$4 sm:$0xff]  }
 0x5fd   : > { %6960 = vmatprep.subr.bf16.mxu1 %v14008_v17  ;;  %v14087_v17 = vld [vmem:[%s18611_s13 + $0x3a8] ss:$12 sps:$4 sm:$0xff]  }
 0x5ff   : > { %6920 = vmatpush1.bf16.msra.mxu0 %v14003_v18  ;;  %v14095_v18 = vld [vmem:[%s18611_s13 + $0x3c4] ss:$12 sps:$4 sm:$0xff]  }
 0x600   : > { %6961 = vmatpush1.bf16.msra.mxu1 %v14006_v19  ;;  %6921 = vmatprep.subr.bf16.mxu0 %v14011_v20  ;;  %v14098_v19 = vld [vmem:[%s18611_s13 + $0x4e4] ss:$12 sps:$4 sm:$0xff]   ;;  %v14093_v20 = vld [vmem:[%s18611_s13 + $0x3c0] ss:$12 sps:$4 sm:$0xff]  }
 0x601   : > { %6962 = vmatprep.subr.bf16.mxu1 %v14014_v21  ;;  %v14096_v21 = vld [vmem:[%s18611_s13 + $0x4e0] ss:$12 sps:$4 sm:$0xff]  }
 0x603   : > { %6922 = vmatpush1.bf16.msra.mxu0 %v14009_v22  ;;  %v14101_v22 = vld [vmem:[%s18611_s13 + $0x3dc] ss:$12 sps:$4 sm:$0xff]  }
 0x604   : > { %6963 = vmatpush1.bf16.msra.mxu1 %v14012_v23  ;;  %6923 = vmatprep.subr.bf16.mxu0 %v14017_v36  ;;  %v14104_v23 = vld [vmem:[%s18611_s13 + $0x4fc] ss:$12 sps:$4 sm:$0xff]   ;;  %v14099_v36 = vld [vmem:[%s18611_s13 + $0x3d8] ss:$12 sps:$4 sm:$0xff]  }
 0x605   : > { %6964 = vmatprep.subr.bf16.mxu1 %v14020_v24  ;;  %v14102_v24 = vld [vmem:[%s18611_s13 + $0x4f8] ss:$12 sps:$4 sm:$0xff]  }
 0x607   : > { %6924 = vmatpush1.bf16.msra.mxu0 %v14015_v26  ;;  %v14107_v26 = vld [vmem:[%s18611_s13 + $0x3f4] ss:$12 sps:$4 sm:$0xff]  }
 0x608   : > { %6965 = vmatpush1.bf16.msra.mxu1 %v14018_v27  ;;  %6925 = vmatprep.subr.bf16.mxu0 %v14023_v28  ;;  %v14110_v27 = vld [vmem:[%s18611_s13 + $0x514] ss:$12 sps:$4 sm:$0xff]   ;;  %v14105_v28 = vld [vmem:[%s18611_s13 + $0x3f0] ss:$12 sps:$4 sm:$0xff]  }
 0x609   : > { %6966 = vmatprep.subr.bf16.mxu1 %v14026_v29  ;;  %v14108_v29 = vld [vmem:[%s18611_s13 + $0x510] ss:$12 sps:$4 sm:$0xff]  }
 0x60b   : > { %6926 = vmatpush1.bf16.msra.mxu0 %v14021_v30  ;;  %v14113_v30 = vld [vmem:[%s18611_s13 + $0x40c] ss:$12 sps:$4 sm:$0xff]  }
 0x60c   : > { %6967 = vmatpush1.bf16.msra.mxu1 %v14024_v32  ;;  %6927 = vmatprep.subr.bf16.mxu0 %v14029_v35  ;;  %v14111_v32 = vld [vmem:[%s18611_s13 + $0x408] ss:$12 sps:$4 sm:$0xff]  }
 0x60d   : > { %6968 = vmatprep.subr.bf16.mxu1 %v14032_v37  ;;  %v14114_v35 = vld [vmem:[%s18611_s13 + $0x528] ss:$12 sps:$4 sm:$0xff]   ;;  %v14116_v37 = vld [vmem:[%s18611_s13 + $0x52c] ss:$12 sps:$4 sm:$0xff]  }
 0x60f   : > { %6928 = vmatpush1.bf16.msra.mxu0 %v14027_v38  ;;  %v14117_v38 = vld [vmem:[%s18611_s13 + $0x368] ss:$12 sps:$4 sm:$0xff]  }
 0x610   : > { %6969 = vmatpush1.bf16.msra.mxu1 %v14030_v39  ;;  %7729 = vmatprep.subr.bf16.mxu0 %v14035_v61  ;;  %v14120_v39 = vld [vmem:[%s18611_s13 + $0x184] ss:$12 sps:$4 sm:$0xff]  }
 0x611   : > { %7770 = vmatprep.subr.bf16.mxu1 %v14050_v43 }
 0x612   : > { %6934 = vmatmul.mubr.bf16.vlgmr.msra.gmra.mrb[40].mxu0 %v6615_v40 }
 0x613   : > { %6975 = vmatmul.mubr.bf16.vlgmr.msra.gmra.mrb[40].mxu1 %v6615_v40  ;;  %7730 = vmatpush1.bf16.msra.mxu0 %v14033_v41 }
 0x614   : > { %7731 = vmatprep.subr.bf16.mxu0 %v14038_v62  ;;  %7771 = vmatpush1.bf16.msra.mxu1 %v14048_v42 }
 0x615   : > { %7772 = vmatprep.subr.bf16.mxu1 %v14056_v52 }
 0x617   : > { %7732 = vmatpush1.bf16.msra.mxu0 %v14036_v31 }
 0x618   : > { %7733 = vmatprep.subr.bf16.mxu0 %v14041_v51  ;;  %7773 = vmatpush1.bf16.msra.mxu1 %v14054_v1 }
 0x619   : > { %7774 = vmatprep.subr.bf16.mxu1 %v14062_v49 }
 0x61b   : > { %7734 = vmatpush1.bf16.msra.mxu0 %v14039_v34 }
 0x61c   : > { %7735 = vmatprep.subr.bf16.mxu0 %v14044_v25  ;;  %7775 = vmatpush1.bf16.msra.mxu1 %v14060_v53 }
 0x61d   : > { %7776 = vmatprep.subr.bf16.mxu1 %v14068_v44 }
 0x61f   : > { %7736 = vmatpush1.bf16.msra.mxu0 %v14042_v3 }
 0x620   : > { %7737 = vmatprep.subr.bf16.mxu0 %v14047_v45  ;;  %7777 = vmatpush1.bf16.msra.mxu1 %v14066_v46 }
 0x621   : > { %7778 = vmatprep.subr.bf16.mxu1 %v14074_v5 }
 0x623   : > { %7738 = vmatpush1.bf16.msra.mxu0 %v14045_v4 }
 0x624   : > { %7739 = vmatprep.subr.bf16.mxu0 %v14053_v6  ;;  %7779 = vmatpush1.bf16.msra.mxu1 %v14072_v8  ;;  %v6987_v6 = vld [vmem:[%s18610_s12] sm:$0xf] }
 0x625   : > { %7780 = vmatprep.subr.bf16.mxu1 %v14080_v9  ;;  %v6992_v8 = vrot.slane %v6987_v6, %v15425_v7  ;;  %v7000_v9 = vrot.slane %v6987_v6, %v15427_v54 }
 0x627   : > { %7740 = vmatpush1.bf16.msra.mxu0 %v14051_v60 }
 0x628   : > { %7741 = vmatprep.subr.bf16.mxu0 %v14059_v11  ;;  %7781 = vmatpush1.bf16.msra.mxu1 %v14078_v47  ;;  %v6996_v11 = vrot.slane %v6987_v6, %v15429_v55 }
 0x629   : > { %7782 = vmatprep.subr.bf16.mxu1 %v14086_v59 }
 0x62b   : > { %7742 = vmatpush1.bf16.msra.mxu0 %v14057_v10 }
 0x62c   : > { %7743 = vmatprep.subr.bf16.mxu0 %v14065_v12  ;;  %7783 = vmatpush1.bf16.msra.mxu1 %v14084_v48  ;;  %v7004_v12 = vrot.slane %v6987_v6, %v15431_v56  ;;  %v14140_v6 = vld [vmem:[%s18611_s13 + $0x1e4] ss:$12 sps:$4 sm:$0xff]  }
 0x62d   : > { %7784 = vmatprep.subr.bf16.mxu1 %v14092_v50 }
 0x62f   : > { %7744 = vmatpush1.bf16.msra.mxu0 %v14063_v13 }
 0x630   : > { %7745 = vmatprep.subr.bf16.mxu0 %v14071_v14  ;;  %7785 = vmatpush1.bf16.msra.mxu1 %v14090_v15 }
 0x631   : > { %7786 = vmatprep.subr.bf16.mxu1 %v14098_v19 }
 0x633   : > { %7746 = vmatpush1.bf16.msra.mxu0 %v14069_v33 }
 0x634   : > { %7747 = vmatprep.subr.bf16.mxu0 %v14077_v16  ;;  %7787 = vmatpush1.bf16.msra.mxu1 %v14096_v21 }
 0x635   : > { %7788 = vmatprep.subr.bf16.mxu1 %v14104_v23 }
 0x637   : > { %7748 = vmatpush1.bf16.msra.mxu0 %v14075_v57 }
 0x638   : > { %7749 = vmatprep.subr.bf16.mxu0 %v14083_v58  ;;  %7789 = vmatpush1.bf16.msra.mxu1 %v14102_v24 }
 0x639   : > { %7790 = vmatprep.subr.bf16.mxu1 %v14110_v27 }
 0x63b   : > { %7750 = vmatpush1.bf16.msra.mxu0 %v14081_v63 }
 0x63c   : > { %7751 = vmatprep.subr.bf16.mxu0 %v14089_v0  ;;  %7791 = vmatpush1.bf16.msra.mxu1 %v14108_v29 }
 0x63d   : > { %7792 = vmatprep.subr.bf16.mxu1 %v14116_v37 }
 0x63f   : > { %7752 = vmatpush1.bf16.msra.mxu0 %v14087_v17 }
 0x640   : > { %7753 = vmatprep.subr.bf16.mxu0 %v14095_v18  ;;  %7793 = vmatpush1.bf16.msra.mxu1 %v14114_v35 }
 0x641   : > { %12721 = vmatprep.subr.bf16.mxu1 %v14117_v38 }
 0x643   : > { %7754 = vmatpush1.bf16.msra.mxu0 %v14093_v20 }
 0x644   : > { %7755 = vmatprep.subr.bf16.mxu0 %v14101_v22 }
 0x647   : > { %7756 = vmatpush1.bf16.msra.mxu0 %v14099_v36 }
 0x648   : > { %7757 = vmatprep.subr.bf16.mxu0 %v14107_v26 }
 0x64b   : > { %7758 = vmatpush1.bf16.msra.mxu0 %v14105_v28 }
 0x64c   : > { %7759 = vmatprep.subr.bf16.mxu0 %v14113_v30 }
 0x64f   : > { %7760 = vmatpush1.bf16.msra.mxu0 %v14111_v32 }
 0x650   : > { %8382 = vmatprep.subr.bf16.mxu0 %v14120_v39 }
 0x675   : > { %v6142_v40 = vpop.f32.mrb[32].mxu0  ;;  %v6183_v41 = vpop.f32.mrb[32].mxu1 }
 0x676   : > { %v6144_v61 = vpop.f32.mrb[33].mxu0  ;;  %v6185_v62 = vpop.f32.mrb[33].mxu1 }
 0x677   : > { %v6146_v31 = vpop.f32.mrb[34].mxu0  ;;  %v6187_v42 = vpop.f32.mrb[34].mxu1 }
 0x678   : > { %v6147_v43 = vpop.f32.mrb[35].mxu0  ;;  %v6188_v51 = vpop.f32.mrb[35].mxu1 }
 0x679   : > { %v14121_v43 = vld [vmem:[%s18611_s13 + $0x2a8] ss:$12 sps:$4 sm:$0xff]  }
 0x6ad   : > { %v6506_v52 = vpop.f32.mrb[36].mxu0  ;;  %v6547_v1 = vpop.f32.mrb[36].mxu1 }
 0x6ae   : > { %v6507_v34 = vadd.f32 %v6506_v52, %v6142_v40  ;;  %v6548_v49 = vadd.f32 %v6547_v1, %v6183_v41  ;;  %v6508_v25 = vpop.f32.mrb[37].mxu0  ;;  %v6549_v53 = vpop.f32.mrb[37].mxu1  ;;  %v14122_v52 = vld [vmem:[%s18611_s13 + $0x380] ss:$12 sps:$4 sm:$0xff]   ;;  %v14125_v1 = vld [vmem:[%s18611_s13 + $0x19c] ss:$12 sps:$4 sm:$0xff]  }
 0x6af   : > { %v6509_v3 = vadd.f32 %v6508_v25, %v6144_v61  ;;  %v6550_v44 = vadd.f32 %v6549_v53, %v6185_v62  ;;  %v6510_v45 = vpop.f32.mrb[38].mxu0  ;;  %v6551_v46 = vpop.f32.mrb[38].mxu1  ;;  %v14118_v61 = vld [vmem:[%s18611_s13 + $0x180] ss:$12 sps:$4 sm:$0xff]   ;;  %v14127_v53 = vld [vmem:[%s18611_s13 + $0x398] ss:$12 sps:$4 sm:$0xff]  }
 0x6b0   : > { %v6511_v4 = vpop.f32.mrb[39].mxu0  ;;  %v6552_v5 = vpop.f32.mrb[39].mxu1  ;;  %v14130_v25 = vld [vmem:[%s18611_s13 + $0x1b4] ss:$12 sps:$4 sm:$0xff]   ;;  %v14135_v45 = vld [vmem:[%s18611_s13 + $0x1cc] ss:$12 sps:$4 sm:$0xff]  }
 0x6b1   : > { %v14132_v46 = vld [vmem:[%s18611_s13 + $0x3b0] ss:$12 sps:$4 sm:$0xff]   ;;  %v14133_v4 = vld [vmem:[%s18611_s13 + $0x1c8] ss:$12 sps:$4 sm:$0xff]  }
 0x6b2   : > { %v14136_v5 = vld [vmem:[%s18611_s13 + $0x2f0] ss:$12 sps:$4 sm:$0xff]  }
 0x6e5   : > { %v6935_v60 = vpop.f32.mrb[40].mxu0 }
 0x6e6   : > { %v6983_v47 = vadd.f32 %v6935_v60, %v6507_v34  ;;  %v6976_v10 = vpop.f32.mrb[40].mxu1  ;;  %v6937_v59 = vpop.f32.mrb[41].mxu0  ;;  %v14123_v34 = vld [vmem:[%s18611_s13 + $0x198] ss:$12 sps:$4 sm:$0xff]   ;;  %v14138_v60 = vld [vmem:[%s18611_s13 + $0x1e0] ss:$12 sps:$4 sm:$0xff]  }
 0x6e7   : > { %v6985_v48 = vadd.f32 %v6976_v10, %v6548_v49  ;;  %v6984_v13 = vadd.f32 %v6937_v59, %v6509_v3  ;;  %v6978_v50 = vpop.f32.mrb[41].mxu1  ;;  %v6939_v14 = vpop.f32.mrb[42].mxu0  ;;  %v14126_v49 = vld [vmem:[%s18611_s13 + $0x2c0] ss:$12 sps:$4 sm:$0xff]   ;;  %v14128_v3 = vld [vmem:[%s18611_s13 + $0x1b0] ss:$12 sps:$4 sm:$0xff]  }
 0x6e8   : > { %v7009_v15 = vadd.f32 %v6992_v8, %v6983_v47  ;;  %v6986_v33 = vadd.f32 %v6978_v50, %v6550_v44  ;;  %v6980_v16 = vpop.f32.mrb[42].mxu1  ;;  %v6940_v57 = vpop.f32.mrb[43].mxu0  ;;  %v14131_v44 = vld [vmem:[%s18611_s13 + $0x2d8] ss:$12 sps:$4 sm:$0xff]   ;;  %v14137_v8 = vld [vmem:[%s18611_s13 + $0x3c8] ss:$12 sps:$4 sm:$0xff]  }
 0x6e9   : > { %v7011_v58 = vadd.f32 %v7000_v9, %v6985_v48  ;;  %v7010_v63 = vadd.f32 %v6996_v11, %v6984_v13  ;;  %v6981_v0 = vpop.f32.mrb[43].mxu1  ;;  %v14141_v9 = vld [vmem:[%s18611_s13 + $0x308] ss:$12 sps:$4 sm:$0xff]   ;;  %v14142_v47 = vld [vmem:[%s18611_s13 + $0x3e0] ss:$12 sps:$4 sm:$0xff]  }
 0x6ea   : > { %v7013_v17 = vmax.f32 %v7009_v15, 0.0  ;;  %v7012_v18 = vadd.f32 %v7004_v12, %v6986_v33  ;;  %v14145_v11 = vld [vmem:[%s18611_s13 + $0x1fc] ss:$12 sps:$4 sm:$0xff]   ;;  %v14143_v10 = vld [vmem:[%s18611_s13 + $0x1f8] ss:$12 sps:$4 sm:$0xff]  }
 0x6eb   : > { %v7015_v19 = vmax.f32 %v7011_v58, 0.0  ;;  %v7014_v20 = vmax.f32 %v7010_v63, 0.0  ;;  %v14146_v59 = vld [vmem:[%s18611_s13 + $0x320] ss:$12 sps:$4 sm:$0xff]   ;;  %v14147_v48 = vld [vmem:[%s18611_s13 + $0x3f8] ss:$12 sps:$4 sm:$0xff]  }
 0x6ec   : > { %v17380_v21 = vpack.c.bf16 %v7013_v17, %v7013_v17  ;;  %v7016_v22 = vmax.f32 %v7012_v18, 0.0  ;;  %v14150_v12 = vld [vmem:[%s18611_s13 + $0x214] ss:$12 sps:$4 sm:$0xff]   ;;  %v14148_v13 = vld [vmem:[%s18611_s13 + $0x210] ss:$12 sps:$4 sm:$0xff]  }
 0x6ed   : > { %v17382_v23 = vpack.c.bf16 %v7015_v19, %v7015_v19  ;;  %v17384_v36 = vpack.c.bf16 %v7014_v20, %v7014_v20  ;;  %v14151_v50 = vld [vmem:[%s18611_s13 + $0x338] ss:$12 sps:$4 sm:$0xff]   ;;  %v14152_v15 = vld [vmem:[%s18611_s13 + $0x410] ss:$12 sps:$4 sm:$0xff]   ;;  %v14153_v33 = vld [vmem:[%s18611_s13 + $0x228] ss:$12 sps:$4 sm:$0xff]  }
 0x6ee   : > { %v17386_v24 = vpack.c.bf16 %v7016_v22, %v7016_v22  ;;  %v7249_v26 = vshll.u32 %v17380_v21, 16  ;;  %v7247_v40 = vshrl.u32 %v17380_v21, 16  ;;  %v14155_v14 = vld [vmem:[%s18611_s13 + $0x22c] ss:$12 sps:$4 sm:$0xff]   ;;  %v14156_v16 = vld [vmem:[%s18611_s13 + $0x350] ss:$12 sps:$4 sm:$0xff]  }
 0x6ef   : > { %v7256_v27 = vshll.u32 %v17384_v36, 16  ;;  %v7263_v28 = vshll.u32 %v17382_v23, 16  ;;  %v7254_v32 = vshrl.u32 %v17384_v36, 16  ;;  %v7261_v62 = vshrl.u32 %v17382_v23, 16  ;;  %v14159_v57 = vld [vmem:[%s18611_s13 + $0x244] ss:$12 sps:$4 sm:$0xff]  }
 0x6f0   : > { %v7270_v29 = vshll.u32 %v17386_v24, 16  ;;  %v7251_v30 = vrot.slane %v7249_v26, 1  ;;  %v7268_v38 = vshrl.u32 %v17386_v24, 16  ;;  %v14157_v58 = vld [vmem:[%s18611_s13 + $0x240] ss:$12 sps:$4 sm:$0xff]  }
 0x6f1   : > { %v7258_v35 = vrot.slane %v7256_v27, 1  ;;  %v7265_v37 = vrot.slane %v7263_v28, 1  ;;  %v14160_v63 = vld [vmem:[%s18611_s13 + $0x428] ss:$12 sps:$4 sm:$0xff]   ;;  %v14161_v17 = vld [vmem:[%s18611_s13 + $0x258] ss:$12 sps:$4 sm:$0xff]  }
 0x6f2   : > { %v7272_v39 = vrot.slane %v7270_v29, 1  ;;  %v17401_v42 = vor.u32 %v7251_v30, %v7247_v40  ;;  %v14163_v0 = vld [vmem:[%s18611_s13 + $0x25c] ss:$12 sps:$4 sm:$0xff]   ;;  %v14164_v18 = vld [vmem:[%s18611_s13 + $0x440] ss:$12 sps:$4 sm:$0xff]  }
 0x6f3   : > { %v7259_v41 = vor.u32 %v7258_v35, %v7254_v32  ;;  %v17406_v51 = vor.u32 %v7265_v37, %v7261_v62  ;;  %v14167_v19 = vld [vmem:[%s18611_s13 + $0x274] ss:$12 sps:$4 sm:$0xff]   ;;  %v14165_v20 = vld [vmem:[%s18611_s13 + $0x270] ss:$12 sps:$4 sm:$0xff]   ;;  %v14168_v22 = vld [vmem:[%s18611_s13 + $0x458] ss:$12 sps:$4 sm:$0xff]  }
 0x6f4   : > { %v17399_v31 = vor.u32 %v7272_v39, %v7268_v38  ;;  %v14171_v26 = vld [vmem:[%s18611_s13 + $0x28c] ss:$12 sps:$4 sm:$0xff]   ;;  %v14169_v27 = vld [vmem:[%s18611_s13 + $0x288] ss:$12 sps:$4 sm:$0xff]   ;;  %v14172_v28 = vld [vmem:[%s18611_s13 + $0x470] ss:$12 sps:$4 sm:$0xff]  }
 0x6f5   : > { %7761 = vmatprep.mubr.bf16.mxu0 %v7259_v41  ;;  %v14174_v29 = vld [vmem:[%s18611_s13 + $0x188] ss:$12 sps:$4 sm:$0xff]   ;;  %v14176_v32 = vld [vmem:[%s18611_s13 + $0x1a0] ss:$12 sps:$4 sm:$0xff]   ;;  %v14178_v37 = vld [vmem:[%s18611_s13 + $0x1b8] ss:$12 sps:$4 sm:$0xff]  }
 0x6f6   : > { %12232 = vmatprep.mubr.msk.bf16.mxu1 %vm7725_vm7, %v17399_v31  ;;  %7762 = vmatmul.mubr.bf16.vlgmr.msra.gmra.mrb[44].mxu0 %v17401_v42  ;;  %v14173_v30 = vld [vmem:[%s18611_s13 + $0x488] ss:$12 sps:$4 sm:$0xff]   ;;  %v14175_v35 = vld [vmem:[%s18611_s13 + $0x4a0] ss:$12 sps:$4 sm:$0xff]   ;;  %v14177_v38 = vld [vmem:[%s18611_s13 + $0x4b8] ss:$12 sps:$4 sm:$0xff]  }
 0x6f7   : > { %7803 = vmatmul.mubr.bf16.vlgmr.msra.gmra.mrb[44].mxu1 %v17406_v51  ;;  %8383 = vmatpush1.bf16.msra.mxu0 %v14118_v61  ;;  %v14180_v39 = vld [vmem:[%s18611_s13 + $0x1d0] ss:$12 sps:$4 sm:$0xff]   ;;  %v14181_v61 = vld [vmem:[%s18611_s13 + $0x4e8] ss:$12 sps:$4 sm:$0xff]   ;;  %v14184_v62 = vld [vmem:[%s18611_s13 + $0x200] ss:$12 sps:$4 sm:$0xff]  }
 0x6f8   : > { %12722 = vmatpush3.bf16.msra.mxu1 %v14121_v43  ;;  %7843 = vmatprep.mubr.bf16.mxu1 %v7259_v41  ;;  %v14179_v40 = vld [vmem:[%s18611_s13 + $0x4d0] ss:$12 sps:$4 sm:$0xff]   ;;  %v14182_v41 = vld [vmem:[%s18611_s13 + $0x1e8] ss:$12 sps:$4 sm:$0xff]   ;;  %v14185_v43 = vld [vmem:[%s18611_s13 + $0x518] ss:$12 sps:$4 sm:$0xff]  }
 0x6f9   : > { %12318 = vmatprep.mubr.msk.bf16.mxu0 %vm7725_vm7, %v17386_v24  ;;  %12723 = vmatprep.subr.bf16.mxu1 %v14122_v52  ;;  %v14188_v52 = vld [vmem:[%s18611_s13 + $0x230] ss:$12 sps:$4 sm:$0xff]  }
 0x6fa   : > { %8384 = vmatprep.subr.bf16.mxu0 %v14125_v1  ;;  %v14187_v1 = vld [vmem:[%s18611_s13 + $0x530] ss:$12 sps:$4 sm:$0xff]  }
 0x6fb   : > { %8385 = vmatpush1.bf16.msra.mxu0 %v14123_v34  ;;  %v14191_v34 = vld [vmem:[%s18611_s13 + $0x4] ss:$12 sps:$4 sm:$0xff]  }
 0x6fc   : > { %12724 = vmatpush3.bf16.msra.mxu1 %v14126_v49  ;;  %8386 = vmatprep.subr.bf16.mxu0 %v14130_v25  ;;  %v14192_v49 = vld [vmem:[%s18611_s13 + $0x248] ss:$12 sps:$4 sm:$0xff]   ;;  %v14189_v25 = vld [vmem:[%s18611_s13] ss:$12 sps:$4 sm:$0xff]  }
 0x6fd   : > { %12725 = vmatprep.subr.bf16.mxu1 %v14127_v53  ;;  %v14195_v53 = vld [vmem:[%s18611_s13 + $0x1c] ss:$12 sps:$4 sm:$0xff]  }
 0x6ff   : > { %8387 = vmatpush1.bf16.msra.mxu0 %v14128_v3  ;;  %v14196_v3 = vld [vmem:[%s18611_s13 + $0x260] ss:$12 sps:$4 sm:$0xff]  }
 0x700   : > { %12726 = vmatpush3.bf16.msra.mxu1 %v14131_v44  ;;  %8388 = vmatprep.subr.bf16.mxu0 %v14135_v45  ;;  %v14193_v44 = vld [vmem:[%s18611_s13 + $0x18] ss:$12 sps:$4 sm:$0xff]   ;;  %v14199_v45 = vld [vmem:[%s18611_s13 + $0x34] ss:$12 sps:$4 sm:$0xff]  }
 0x701   : > { %12727 = vmatprep.subr.bf16.mxu1 %v14132_v46  ;;  %v14197_v46 = vld [vmem:[%s18611_s13 + $0x30] ss:$12 sps:$4 sm:$0xff]  }
 0x703   : > { %8389 = vmatpush1.bf16.msra.mxu0 %v14133_v4  ;;  %v14203_v4 = vld [vmem:[%s18611_s13 + $0x4c] ss:$12 sps:$4 sm:$0xff]  }
 0x704   : > { %12728 = vmatpush3.bf16.msra.mxu1 %v14136_v5  ;;  %8390 = vmatprep.subr.bf16.mxu0 %v14140_v6  ;;  %v14204_v5 = vld [vmem:[%s18611_s13 + $0x290] ss:$12 sps:$4 sm:$0xff]   ;;  %v14201_v6 = vld [vmem:[%s18611_s13 + $0x48] ss:$12 sps:$4 sm:$0xff]  }
 0x705   : > { %12729 = vmatprep.subr.bf16.mxu1 %v14137_v8  ;;  %v14210_v8 = vld [vmem:[%s18611_s13 + $0x6c4] ss:$12 sps:$4 sm:$0xff]  }
 0x707   : > { %8391 = vmatpush1.bf16.msra.mxu0 %v14138_v60  ;;  %v14207_v60 = vld [vmem:[%s18611_s13 + $0x64] ss:$12 sps:$4 sm:$0xff]  }
 0x708   : > { %12730 = vmatpush3.bf16.msra.mxu1 %v14141_v9  ;;  %8392 = vmatprep.subr.bf16.mxu0 %v14145_v11  ;;  %v14208_v9 = vld [vmem:[%s18611_s13 + $0x6c0] ss:$12 sps:$4 sm:$0xff]  }
 0x709   : > { %12731 = vmatprep.subr.bf16.mxu1 %v14142_v47  ;;  %v14205_v11 = vld [vmem:[%s18611_s13 + $0x60] ss:$12 sps:$4 sm:$0xff]   ;;  %v14216_v47 = vld [vmem:[%s18611_s13 + $0x6dc] ss:$12 sps:$4 sm:$0xff]  }
 0x70b   : > { %8393 = vmatpush1.bf16.msra.mxu0 %v14143_v10  ;;  %v8623_v10 = vrot.slane %v17386_v24, 1 }
 0x70c   : > { %12732 = vmatpush3.bf16.msra.mxu1 %v14146_v59  ;;  %8394 = vmatprep.subr.bf16.mxu0 %v14150_v12  ;;  %v14213_v59 = vld [vmem:[%s18611_s13 + $0x7c] ss:$12 sps:$4 sm:$0xff]   ;;  %v14214_v12 = vld [vmem:[%s18611_s13 + $0x6d8] ss:$12 sps:$4 sm:$0xff]  }
 0x70d   : > { %12733 = vmatprep.subr.bf16.mxu1 %v14147_v48  ;;  %v14211_v48 = vld [vmem:[%s18611_s13 + $0x78] ss:$12 sps:$4 sm:$0xff]  }
 0x70f   : > { %8395 = vmatpush1.bf16.msra.mxu0 %v14148_v13  ;;  %v14222_v13 = vld [vmem:[%s18611_s13 + $0x6f4] ss:$12 sps:$4 sm:$0xff]  }
 0x710   : > { %12734 = vmatpush3.bf16.msra.mxu1 %v14151_v50  ;;  %8396 = vmatprep.subr.bf16.mxu0 %v14155_v14  ;;  %v14219_v50 = vld [vmem:[%s18611_s13 + $0x94] ss:$12 sps:$4 sm:$0xff]   ;;  %v14220_v14 = vld [vmem:[%s18611_s13 + $0x6f0] ss:$12 sps:$4 sm:$0xff]  }
 0x711   : > { %12735 = vmatprep.subr.bf16.mxu1 %v14152_v15  ;;  %v14217_v15 = vld [vmem:[%s18611_s13 + $0x90] ss:$12 sps:$4 sm:$0xff]  }
 0x713   : > { %8397 = vmatpush1.bf16.msra.mxu0 %v14153_v33  ;;  %v14228_v33 = vld [vmem:[%s18611_s13 + $0x70c] ss:$12 sps:$4 sm:$0xff]  }
 0x714   : > { %12736 = vmatpush3.bf16.msra.mxu1 %v14156_v16  ;;  %8398 = vmatprep.subr.bf16.mxu0 %v14159_v57  ;;  %v14225_v16 = vld [vmem:[%s18611_s13 + $0xac] ss:$12 sps:$4 sm:$0xff]   ;;  %v14226_v57 = vld [vmem:[%s18611_s13 + $0x708] ss:$12 sps:$4 sm:$0xff]  }
 0x715   : > { %7851 = vmatprep.subr.bf16.mxu1 %v14641_v2 }
 0x717   : > { %7844 = vmatmul.mubr.bf16.vlgmr.msra.gmra.mrb[48].mxu1 %v17401_v42  ;;  %8399 = vmatpush1.bf16.msra.mxu0 %v14157_v58  ;;  %v14186_v42 = vld [vmem:[%s18611_s13 + $0x218] ss:$12 sps:$4 sm:$0xff]   ;;  %v14223_v58 = vld [vmem:[%s18611_s13 + $0xa8] ss:$12 sps:$4 sm:$0xff]  }
 0x718   : > { %7852 = vmatpush1.bf16.msra.mxu1 %v14160_v63  ;;  %12233 = vmatprep.mubr.msk.bf16.mxu1 %vm7725_vm7, %v17399_v31  ;;  %v14183_v31 = vld [vmem:[%s18611_s13 + $0x500] ss:$12 sps:$4 sm:$0xff]   ;;  %v14234_v63 = vld [vmem:[%s18611_s13 + $0x724] ss:$12 sps:$4 sm:$0xff]  }
 0x719   : > { %7853 = vmatprep.subr.bf16.mxu1 %v14641_v2  ;;  %8400 = vmatprep.subr.bf16.mxu0 %v14163_v0  ;;  %v14231_v0 = vld [vmem:[%s18611_s13 + $0xc4] ss:$12 sps:$4 sm:$0xff]  }
 0x71b   : > { %8401 = vmatpush1.bf16.msra.mxu0 %v14161_v17  ;;  %v14232_v17 = vld [vmem:[%s18611_s13 + $0x720] ss:$12 sps:$4 sm:$0xff]  }
 0x71c   : > { %7854 = vmatpush1.bf16.msra.mxu1 %v14164_v18  ;;  %8402 = vmatprep.subr.bf16.mxu0 %v14167_v19  ;;  %v14229_v18 = vld [vmem:[%s18611_s13 + $0xc0] ss:$12 sps:$4 sm:$0xff]   ;;  %v14240_v19 = vld [vmem:[%s18611_s13 + $0x73c] ss:$12 sps:$4 sm:$0xff]  }
 0x71d   : > { %7855 = vmatprep.subr.bf16.mxu1 %v14641_v2 }
 0x71f   : > { %8403 = vmatpush1.bf16.msra.mxu0 %v14165_v20  ;;  %v14237_v20 = vld [vmem:[%s18611_s13 + $0xdc] ss:$12 sps:$4 sm:$0xff]  }
 0x720   : > { %7856 = vmatpush1.bf16.msra.mxu1 %v14168_v22  ;;  %8404 = vmatprep.subr.bf16.mxu0 %v14171_v26  ;;  %v14238_v22 = vld [vmem:[%s18611_s13 + $0x738] ss:$12 sps:$4 sm:$0xff]  }
 0x721   : > { %7857 = vmatprep.subr.bf16.mxu1 %v14641_v2  ;;  %v14235_v26 = vld [vmem:[%s18611_s13 + $0xd8] ss:$12 sps:$4 sm:$0xff]  }
 0x723   : > { %8405 = vmatpush1.bf16.msra.mxu0 %v14169_v27  ;;  %v14246_v27 = vld [vmem:[%s18611_s13 + $0x754] ss:$12 sps:$4 sm:$0xff]  }
 0x724   : > { %7858 = vmatpush1.bf16.msra.mxu1 %v14172_v28  ;;  %8463 = vmatprep.subr.bf16.mxu0 %v14641_v2  ;;  %v14243_v28 = vld [vmem:[%s18611_s13 + $0xf4] ss:$12 sps:$4 sm:$0xff]  }
 0x725   : > { %7859 = vmatprep.subr.bf16.mxu1 %v14641_v2 }
 0x726   : > { %8415 = vmatmul.mubr.bf16.vlgmr.msra.gmra.mrb[48].mxu0 %v17382_v23 }
 0x727   : > { %8464 = vmatpush1.bf16.msra.mxu0 %v14174_v29  ;;  %12319 = vmatprep.mubr.msk.bf16.mxu0 %vm7725_vm7, %v17386_v24  ;;  %v14244_v29 = vld [vmem:[%s18611_s13 + $0x750] ss:$12 sps:$4 sm:$0xff]   ;;  %v14284_v24 = vld [vmem:[%s18611_s13 + $0x38] ss:$12 sps:$4 sm:$0xff]  }
 0x728   : > { %7860 = vmatpush1.bf16.msra.mxu1 %v14173_v30  ;;  %8465 = vmatprep.subr.bf16.mxu0 %v14641_v2  ;;  %v14241_v30 = vld [vmem:[%s18611_s13 + $0xf0] ss:$12 sps:$4 sm:$0xff]  }
 0x729   : > { %7861 = vmatprep.subr.bf16.mxu1 %v14641_v2 }
 0x72b   : > { %8466 = vmatpush1.bf16.msra.mxu0 %v14176_v32  ;;  %v14252_v32 = vld [vmem:[%s18611_s13 + $0x76c] ss:$12 sps:$4 sm:$0xff]  }
 0x72c   : > { %7862 = vmatpush1.bf16.msra.mxu1 %v14175_v35  ;;  %8467 = vmatprep.subr.bf16.mxu0 %v14641_v2  ;;  %v14249_v35 = vld [vmem:[%s18611_s13 + $0x10c] ss:$12 sps:$4 sm:$0xff]  }
 0x72d   : > { %7863 = vmatprep.subr.bf16.mxu1 %v14641_v2 }
 0x72f   : > { %8468 = vmatpush1.bf16.msra.mxu0 %v14178_v37  ;;  %v14250_v37 = vld [vmem:[%s18611_s13 + $0x768] ss:$12 sps:$4 sm:$0xff]  }
 0x730   : > { %7864 = vmatpush1.bf16.msra.mxu1 %v14177_v38  ;;  %8469 = vmatprep.subr.bf16.mxu0 %v14641_v2  ;;  %v14247_v38 = vld [vmem:[%s18611_s13 + $0x108] ss:$12 sps:$4 sm:$0xff]  }
 0x731   : > { %7865 = vmatprep.subr.bf16.mxu1 %v14641_v2 }
 0x733   : > { %8470 = vmatpush1.bf16.msra.mxu0 %v14180_v39  ;;  %v14258_v39 = vld [vmem:[%s18611_s13 + $0x784] ss:$12 sps:$4 sm:$0xff]  }
 0x734   : > { %7866 = vmatpush1.bf16.msra.mxu1 %v14179_v40  ;;  %8471 = vmatprep.subr.bf16.mxu0 %v14641_v2  ;;  %v14255_v40 = vld [vmem:[%s18611_s13 + $0x124] ss:$12 sps:$4 sm:$0xff]  }
 0x735   : > { %7867 = vmatprep.subr.bf16.mxu1 %v14641_v2 }
 0x737   : > { %8472 = vmatpush1.bf16.msra.mxu0 %v14182_v41  ;;  %v14256_v41 = vld [vmem:[%s18611_s13 + $0x780] ss:$12 sps:$4 sm:$0xff]  }
 0x738   : > { %7868 = vmatpush1.bf16.msra.mxu1 %v14181_v61  ;;  %8473 = vmatprep.subr.bf16.mxu0 %v14641_v2  ;;  %v14253_v61 = vld [vmem:[%s18611_s13 + $0x120] ss:$12 sps:$4 sm:$0xff]  }
 0x739   : > { %7869 = vmatprep.subr.bf16.mxu1 %v14641_v2 }
 0x73b   : > { %8474 = vmatpush1.bf16.msra.mxu0 %v14184_v62  ;;  %v14264_v62 = vld [vmem:[%s18611_s13 + $0x79c] ss:$12 sps:$4 sm:$0xff]  }
 0x73c   : > { %7870 = vmatpush1.bf16.msra.mxu1 %v14183_v31  ;;  %8475 = vmatprep.subr.bf16.mxu0 %v14641_v2  ;;  %v14261_v31 = vld [vmem:[%s18611_s13 + $0x13c] ss:$12 sps:$4 sm:$0xff]  }
 0x73d   : > { %7871 = vmatprep.subr.bf16.mxu1 %v14641_v2 }
 0x73f   : > { %8476 = vmatpush1.bf16.msra.mxu0 %v14186_v42  ;;  %v14262_v42 = vld [vmem:[%s18611_s13 + $0x798] ss:$12 sps:$4 sm:$0xff]  }
 0x740   : > { %7872 = vmatpush1.bf16.msra.mxu1 %v14185_v43  ;;  %8477 = vmatprep.subr.bf16.mxu0 %v14641_v2  ;;  %v14259_v43 = vld [vmem:[%s18611_s13 + $0x138] ss:$12 sps:$4 sm:$0xff]  }
 0x741   : > { %7873 = vmatprep.subr.bf16.mxu1 %v14641_v2 }
 0x743   : > { %8478 = vmatpush1.bf16.msra.mxu0 %v14188_v52  ;;  %v14270_v52 = vld [vmem:[%s18611_s13 + $0x7b4] ss:$12 sps:$4 sm:$0xff]  }
 0x744   : > { %7874 = vmatpush1.bf16.msra.mxu1 %v14187_v1  ;;  %8479 = vmatprep.subr.bf16.mxu0 %v14641_v2  ;;  %v14267_v1 = vld [vmem:[%s18611_s13 + $0x154] ss:$12 sps:$4 sm:$0xff]  }
 0x745   : > { %8341 = vmatprep.subr.bf16.mxu1 %v14191_v34  ;;  %v14268_v34 = vld [vmem:[%s18611_s13 + $0x7b0] ss:$12 sps:$4 sm:$0xff]  }
 0x747   : > { %7884 = vmatmul.mubr.bf16.vlgmr.msra.gmra.mrb[52].mxu1 %v17406_v51  ;;  %8480 = vmatpush1.bf16.msra.mxu0 %v14192_v49  ;;  %v14200_v51 = vld [vmem:[%s18611_s13 + $0x278] ss:$12 sps:$4 sm:$0xff]   ;;  %v14265_v49 = vld [vmem:[%s18611_s13 + $0x150] ss:$12 sps:$4 sm:$0xff]  }
 0x748   : > { %8342 = vmatpush1.bf16.msra.mxu1 %v14189_v25  ;;  %8373 = vmatprep.mubr.bf16.mxu1 %v17384_v36  ;;  %v14276_v25 = vld [vmem:[%s18611_s13 + $0x7cc] ss:$12 sps:$4 sm:$0xff]  }
 0x749   : > { %8343 = vmatprep.subr.bf16.mxu1 %v14195_v53  ;;  %8481 = vmatprep.subr.bf16.mxu0 %v14641_v2  ;;  %v14273_v53 = vld [vmem:[%s18611_s13 + $0x16c] ss:$12 sps:$4 sm:$0xff]  }
 0x74b   : > { %8482 = vmatpush1.bf16.msra.mxu0 %v14196_v3  ;;  %v14274_v3 = vld [vmem:[%s18611_s13 + $0x7c8] ss:$12 sps:$4 sm:$0xff]  }
 0x74c   : > { %8344 = vmatpush1.bf16.msra.mxu1 %v14193_v44  ;;  %8483 = vmatprep.subr.bf16.mxu0 %v14641_v2  ;;  %v14271_v44 = vld [vmem:[%s18611_s13 + $0x168] ss:$12 sps:$4 sm:$0xff]  }
 0x74d   : > { %8345 = vmatprep.subr.bf16.mxu1 %v14199_v45  ;;  %v14277_v45 = vld [vmem:[%s18611_s13 + $0xc8] ss:$12 sps:$4 sm:$0xff]  }
 0x74f   : > { %8484 = vmatpush1.bf16.msra.mxu0 %v14200_v51  ;;  %v14279_v51 = vld [vmem:[%s18611_s13 + $0x6c8] ss:$12 sps:$4 sm:$0xff]  }
 0x750   : > { %8346 = vmatpush1.bf16.msra.mxu1 %v14197_v46  ;;  %8485 = vmatprep.subr.bf16.mxu0 %v14641_v2  ;;  %v8622_v46 = vrot.slane %v17382_v23, 1 }
 0x751   : > { %8347 = vmatprep.subr.bf16.mxu1 %v14203_v4  ;;  %v14278_v4 = vld [vmem:[%s18611_s13 + $0x8] ss:$12 sps:$4 sm:$0xff]  }
 0x753   : > { %8486 = vmatpush1.bf16.msra.mxu0 %v14204_v5  ;;  %v14280_v5 = vld [vmem:[%s18611_s13 + $0xe0] ss:$12 sps:$4 sm:$0xff]  }
 0x754   : > { %8348 = vmatpush1.bf16.msra.mxu1 %v14201_v6  ;;  %9119 = vmatprep.subr.bf16.mxu0 %v14210_v8  ;;  %v14282_v6 = vld [vmem:[%s18611_s13 + $0x6e0] ss:$12 sps:$4 sm:$0xff]  }
 0x755   : > { %8349 = vmatprep.subr.bf16.mxu1 %v14207_v60  ;;  %v14281_v8 = vld [vmem:[%s18611_s13 + $0x20] ss:$12 sps:$4 sm:$0xff]   ;;  %v14283_v60 = vld [vmem:[%s18611_s13 + $0xf8] ss:$12 sps:$4 sm:$0xff]  }
 0x756   : > { %8496 = vmatmul.mubr.bf16.vlgmr.msra.gmra.mrb[52].mxu0 %v17382_v23  ;;  %v14328_v23 = vld [vmem:[%s18611_s13 + $0x5ec] ss:$12 sps:$4 sm:$0xff]  }
 0x757   : > { %9120 = vmatpush1.bf16.msra.mxu0 %v14208_v9  ;;  %12516 = vmatprep.mubr.msk.bf16.mxu0 %vm7725_vm7, %v8623_v10  ;;  %v14285_v9 = vld [vmem:[%s18611_s13 + $0x6f8] ss:$12 sps:$4 sm:$0xff]  }
 0x758   : > { %8350 = vmatpush1.bf16.msra.mxu1 %v14205_v11  ;;  %9121 = vmatprep.subr.bf16.mxu0 %v14216_v47  ;;  %v14286_v11 = vld [vmem:[%s18611_s13 + $0x110] ss:$12 sps:$4 sm:$0xff]  }
 0x759   : > { %8351 = vmatprep.subr.bf16.mxu1 %v14213_v59  ;;  %v14288_v47 = vld [vmem:[%s18611_s13 + $0x710] ss:$12 sps:$4 sm:$0xff]   ;;  %v14289_v59 = vld [vmem:[%s18611_s13 + $0x128] ss:$12 sps:$4 sm:$0xff]  }
 0x75b   : > { %9122 = vmatpush1.bf16.msra.mxu0 %v14214_v12  ;;  %v14291_v12 = vld [vmem:[%s18611_s13 + $0x728] ss:$12 sps:$4 sm:$0xff]  }
 0x75c   : > { %8352 = vmatpush1.bf16.msra.mxu1 %v14211_v48  ;;  %9123 = vmatprep.subr.bf16.mxu0 %v14222_v13  ;;  %v14290_v48 = vld [vmem:[%s18611_s13 + $0x68] ss:$12 sps:$4 sm:$0xff]   ;;  %v14292_v13 = vld [vmem:[%s18611_s13 + $0x140] ss:$12 sps:$4 sm:$0xff]  }
 0x75d   : > { %8353 = vmatprep.subr.bf16.mxu1 %v14219_v50  ;;  %v14294_v50 = vld [vmem:[%s18611_s13 + $0x740] ss:$12 sps:$4 sm:$0xff]  }
 0x75f   : > { %9124 = vmatpush1.bf16.msra.mxu0 %v14220_v14  ;;  %v14293_v14 = vld [vmem:[%s18611_s13 + $0x80] ss:$12 sps:$4 sm:$0xff]  }
 0x760   : > { %8354 = vmatpush1.bf16.msra.mxu1 %v14217_v15  ;;  %9125 = vmatprep.subr.bf16.mxu0 %v14228_v33  ;;  %v14295_v15 = vld [vmem:[%s18611_s13 + $0x158] ss:$12 sps:$4 sm:$0xff]  }
 0x761   : > { %8355 = vmatprep.subr.bf16.mxu1 %v14225_v16  ;;  %v14297_v33 = vld [vmem:[%s18611_s13 + $0x758] ss:$12 sps:$4 sm:$0xff]  }
 0x762   : > { %v14296_v16 = vld [vmem:[%s18611_s13 + $0x98] ss:$12 sps:$4 sm:$0xff]  }
 0x763   : > { %9126 = vmatpush1.bf16.msra.mxu0 %v14226_v57  ;;  %v14298_v57 = vld [vmem:[%s18611_s13 + $0x170] ss:$12 sps:$4 sm:$0xff]  }
 0x764   : > { %8356 = vmatpush1.bf16.msra.mxu1 %v14223_v58  ;;  %9127 = vmatprep.subr.bf16.mxu0 %v14234_v63  ;;  %v14300_v58 = vld [vmem:[%s18611_s13 + $0x770] ss:$12 sps:$4 sm:$0xff]  }
 0x765   : > { %8357 = vmatprep.subr.bf16.mxu1 %v14231_v0  ;;  %v14299_v63 = vld [vmem:[%s18611_s13 + $0xb0] ss:$12 sps:$4 sm:$0xff]  }
 0x766   : > { %v14303_v0 = vld [vmem:[%s18611_s13 + $0x544] ss:$12 sps:$4 sm:$0xff]  }
 0x767   : > { %9128 = vmatpush1.bf16.msra.mxu0 %v14232_v17  ;;  %v14304_v17 = vld [vmem:[%s18611_s13 + $0x788] ss:$12 sps:$4 sm:$0xff]  }
 0x768   : > { %8358 = vmatpush1.bf16.msra.mxu1 %v14229_v18  ;;  %9129 = vmatprep.subr.bf16.mxu0 %v14240_v19  ;;  %v14301_v18 = vld [vmem:[%s18611_s13 + $0x540] ss:$12 sps:$4 sm:$0xff]   ;;  %v14307_v19 = vld [vmem:[%s18611_s13 + $0x55c] ss:$12 sps:$4 sm:$0xff]  }
 0x769   : > { %8359 = vmatprep.subr.bf16.mxu1 %v14237_v20  ;;  %v8621_v20 = vrot.slane %v17384_v36, 1 }
 0x76b   : > { %9130 = vmatpush1.bf16.msra.mxu0 %v14238_v22  ;;  %v14308_v22 = vld [vmem:[%s18611_s13 + $0x7a0] ss:$12 sps:$4 sm:$0xff]  }
 0x76c   : > { %8360 = vmatpush1.bf16.msra.mxu1 %v14235_v26  ;;  %9131 = vmatprep.subr.bf16.mxu0 %v14246_v27  ;;  %v14305_v26 = vld [vmem:[%s18611_s13 + $0x558] ss:$12 sps:$4 sm:$0xff]   ;;  %v14311_v27 = vld [vmem:[%s18611_s13 + $0x574] ss:$12 sps:$4 sm:$0xff]  }
 0x76d   : > { %8361 = vmatprep.subr.bf16.mxu1 %v14243_v28  ;;  %v14312_v28 = vld [vmem:[%s18611_s13 + $0x7b8] ss:$12 sps:$4 sm:$0xff]  }
 0x76f   : > { %9132 = vmatpush1.bf16.msra.mxu0 %v14244_v29  ;;  %v14309_v29 = vld [vmem:[%s18611_s13 + $0x570] ss:$12 sps:$4 sm:$0xff]  }
 0x770   : > { %8362 = vmatpush1.bf16.msra.mxu1 %v14241_v30  ;;  %9133 = vmatprep.subr.bf16.mxu0 %v14252_v32  ;;  %v14315_v30 = vld [vmem:[%s18611_s13 + $0x58c] ss:$12 sps:$4 sm:$0xff]   ;;  %v14316_v32 = vld [vmem:[%s18611_s13 + $0x7d0] ss:$12 sps:$4 sm:$0xff]  }
 0x771   : > { %8363 = vmatprep.subr.bf16.mxu1 %v14249_v35  ;;  %v14313_v35 = vld [vmem:[%s18611_s13 + $0x588] ss:$12 sps:$4 sm:$0xff]  }
 0x773   : > { %9134 = vmatpush1.bf16.msra.mxu0 %v14250_v37  ;;  %v14319_v37 = vld [vmem:[%s18611_s13 + $0x5a4] ss:$12 sps:$4 sm:$0xff]  }
 0x774   : > { %8364 = vmatpush1.bf16.msra.mxu1 %v14247_v38  ;;  %9135 = vmatprep.subr.bf16.mxu0 %v14258_v39  ;;  %v14317_v38 = vld [vmem:[%s18611_s13 + $0x5a0] ss:$12 sps:$4 sm:$0xff]   ;;  %v14322_v39 = vld [vmem:[%s18611_s13 + $0x5bc] ss:$12 sps:$4 sm:$0xff]  }
 0x775   : > { %8365 = vmatprep.subr.bf16.mxu1 %v14255_v40  ;;  %v14320_v40 = vld [vmem:[%s18611_s13 + $0x5b8] ss:$12 sps:$4 sm:$0xff]  }
 0x777   : > { %9136 = vmatpush1.bf16.msra.mxu0 %v14256_v41  ;;  %v14325_v41 = vld [vmem:[%s18611_s13 + $0x5d4] ss:$12 sps:$4 sm:$0xff]  }
 0x778   : > { %8366 = vmatpush1.bf16.msra.mxu1 %v14253_v61  ;;  %9137 = vmatprep.subr.bf16.mxu0 %v14264_v62  ;;  %v14323_v61 = vld [vmem:[%s18611_s13 + $0x5d0] ss:$12 sps:$4 sm:$0xff]   ;;  %v14326_v62 = vld [vmem:[%s18611_s13 + $0x5e8] ss:$12 sps:$4 sm:$0xff]  }
 0x779   : > { %8367 = vmatprep.subr.bf16.mxu1 %v14261_v31  ;;  %v14331_v31 = vld [vmem:[%s18611_s13 + $0x604] ss:$12 sps:$4 sm:$0xff]  }
 0x77b   : > { %9138 = vmatpush1.bf16.msra.mxu0 %v14262_v42  ;;  %v14329_v42 = vld [vmem:[%s18611_s13 + $0x600] ss:$12 sps:$4 sm:$0xff]  }
 0x77c   : > { %8368 = vmatpush1.bf16.msra.mxu1 %v14259_v43  ;;  %9139 = vmatprep.subr.bf16.mxu0 %v14270_v52  ;;  %v14334_v43 = vld [vmem:[%s18611_s13 + $0x61c] ss:$12 sps:$4 sm:$0xff]   ;;  %v14332_v52 = vld [vmem:[%s18611_s13 + $0x618] ss:$12 sps:$4 sm:$0xff]  }
 0x77d   : > { %8369 = vmatprep.subr.bf16.mxu1 %v14267_v1 }
 0x77f   : > { %9140 = vmatpush1.bf16.msra.mxu0 %v14268_v34  ;;  %v14337_v34 = vld [vmem:[%s18611_s13 + $0x634] ss:$12 sps:$4 sm:$0xff]  }
 0x780   : > { %8370 = vmatpush1.bf16.msra.mxu1 %v14265_v49  ;;  %9141 = vmatprep.subr.bf16.mxu0 %v14276_v25 }
 0x781   : > { %8371 = vmatprep.subr.bf16.mxu1 %v14273_v53 }
 0x783   : > { %9142 = vmatpush1.bf16.msra.mxu0 %v14274_v3 }
 0x784   : > { %8372 = vmatpush1.bf16.msra.mxu1 %v14271_v44  ;;  %9200 = vmatprep.subr.bf16.mxu0 %v14641_v2 }
 0x785   : > { %12743 = vmatprep.subr.bf16.mxu1 %v14277_v45 }
 0x786   : > { %9152 = vmatmul.mubr.bf16.vlgmr.msra.gmra.mrb[56].mxu0 %v8622_v46 }
 0x787   : > { %8374 = vmatmul.mubr.bf16.vlgmr.msra.gmra.mrb[56].mxu1 %v17380_v21  ;;  %9201 = vmatpush1.bf16.msra.mxu0 %v14279_v51 }
 0x788   : > { %12744 = vmatpush3.bf16.msra.mxu1 %v14278_v4  ;;  %8455 = vmatprep.mubr.bf16.mxu1 %v17384_v36  ;;  %v14335_v4 = vld [vmem:[%s18611_s13 + $0x630] ss:$12 sps:$4 sm:$0xff]  }
 0x789   : > { %12517 = vmatprep.mubr.msk.bf16.mxu0 %vm7725_vm7, %v8623_v10  ;;  %12745 = vmatprep.subr.bf16.mxu1 %v14280_v5  ;;  %v14287_v10 = vld [vmem:[%s18611_s13 + $0x50] ss:$12 sps:$4 sm:$0xff]  }
 0x78a   : > { %9202 = vmatprep.subr.bf16.mxu0 %v14641_v2 }
 0x78b   : > { %9203 = vmatpush1.bf16.msra.mxu0 %v14282_v6  ;;  %v14340_v6 = vld [vmem:[%s18611_s13 + $0x64c] ss:$12 sps:$4 sm:$0xff]  }
 0x78c   : > { %12746 = vmatpush3.bf16.msra.mxu1 %v14281_v8  ;;  %9204 = vmatprep.subr.bf16.mxu0 %v14641_v2  ;;  %v14338_v8 = vld [vmem:[%s18611_s13 + $0x648] ss:$12 sps:$4 sm:$0xff]  }
 0x78d   : > { %12747 = vmatprep.subr.bf16.mxu1 %v14283_v60  ;;  %v14343_v60 = vld [vmem:[%s18611_s13 + $0x664] ss:$12 sps:$4 sm:$0xff]  }
 0x78f   : > { %9205 = vmatpush1.bf16.msra.mxu0 %v14285_v9  ;;  %v14341_v9 = vld [vmem:[%s18611_s13 + $0x660] ss:$12 sps:$4 sm:$0xff]  }
 0x790   : > { %12748 = vmatpush3.bf16.msra.mxu1 %v14284_v24  ;;  %9206 = vmatprep.subr.bf16.mxu0 %v14641_v2  ;;  %v14346_v24 = vld [vmem:[%s18611_s13 + $0x67c] ss:$12 sps:$4 sm:$0xff]  }
 0x791   : > { %12749 = vmatprep.subr.bf16.mxu1 %v14286_v11  ;;  %v14344_v11 = vld [vmem:[%s18611_s13 + $0x678] ss:$12 sps:$4 sm:$0xff]  }
 0x793   : > { %9207 = vmatpush1.bf16.msra.mxu0 %v14288_v47  ;;  %v14349_v47 = vld [vmem:[%s18611_s13 + $0x694] ss:$12 sps:$4 sm:$0xff]  }
 0x794   : > { %12750 = vmatpush3.bf16.msra.mxu1 %v14287_v10  ;;  %9208 = vmatprep.subr.bf16.mxu0 %v14641_v2  ;;  %v14347_v10 = vld [vmem:[%s18611_s13 + $0x690] ss:$12 sps:$4 sm:$0xff]  }
 0x795   : > { %12751 = vmatprep.subr.bf16.mxu1 %v14289_v59  ;;  %v14352_v59 = vld [vmem:[%s18611_s13 + $0x6ac] ss:$12 sps:$4 sm:$0xff]  }
 0x797   : > { %9209 = vmatpush1.bf16.msra.mxu0 %v14291_v12  ;;  %v14350_v12 = vld [vmem:[%s18611_s13 + $0x6a8] ss:$12 sps:$4 sm:$0xff]  }
 0x798   : > { %12752 = vmatpush3.bf16.msra.mxu1 %v14290_v48  ;;  %9210 = vmatprep.subr.bf16.mxu0 %v14641_v2  ;;  %v14353_v48 = vld [vmem:[%s18611_s13 + $0x608] ss:$12 sps:$4 sm:$0xff]  }
 0x799   : > { %12753 = vmatprep.subr.bf16.mxu1 %v14292_v13  ;;  %v14354_v13 = vld [vmem:[%s18611_s13 + $0x548] ss:$12 sps:$4 sm:$0xff]  }
 0x79b   : > { %9211 = vmatpush1.bf16.msra.mxu0 %v14294_v50  ;;  %v8620_v50 = vrot.slane %v17380_v21, 1 }
 0x79c   : > { %12754 = vmatpush3.bf16.msra.mxu1 %v14293_v14  ;;  %9212 = vmatprep.subr.bf16.mxu0 %v14641_v2  ;;  %v14355_v14 = vld [vmem:[%s18611_s13 + $0x620] ss:$12 sps:$4 sm:$0xff]  }
 0x79d   : > { %12755 = vmatprep.subr.bf16.mxu1 %v14295_v15  ;;  %v14356_v15 = vld [vmem:[%s18611_s13 + $0x560] ss:$12 sps:$4 sm:$0xff]  }
 0x79f   : > { %9213 = vmatpush1.bf16.msra.mxu0 %v14297_v33  ;;  %v14357_v33 = vld [vmem:[%s18611_s13 + $0x638] ss:$12 sps:$4 sm:$0xff]  }
 0x7a0   : > { %12756 = vmatpush3.bf16.msra.mxu1 %v14296_v16  ;;  %9214 = vmatprep.subr.bf16.mxu0 %v14641_v2 }
 0x7a1   : > { %12757 = vmatprep.subr.bf16.mxu1 %v14298_v57 }
 0x7a3   : > { %9215 = vmatpush1.bf16.msra.mxu0 %v14300_v58 }
 0x7a4   : > { %12758 = vmatpush3.bf16.msra.mxu1 %v14299_v63  ;;  %9216 = vmatprep.subr.bf16.mxu0 %v14641_v2  ;;  %v14358_v63 = vld [vmem:[%s18611_s13 + $0x578] ss:$12 sps:$4 sm:$0xff]  }
 0x7a5   : > { %9078 = vmatprep.subr.bf16.mxu1 %v14303_v0  ;;  %v14359_v0 = vld [vmem:[%s18611_s13 + $0x650] ss:$12 sps:$4 sm:$0xff]  }
 0x7a7   : > { %8456 = vmatmul.mubr.bf16.vlgmr.msra.gmra.mrb[60].mxu1 %v17380_v21  ;;  %9217 = vmatpush1.bf16.msra.mxu0 %v14304_v17  ;;  %v14360_v17 = vld [vmem:[%s18611_s13 + $0x590] ss:$12 sps:$4 sm:$0xff]  }
 0x7a8   : > { %9079 = vmatpush1.bf16.msra.mxu1 %v14301_v18  ;;  %9110 = vmatprep.mubr.bf16.mxu1 %v8621_v20  ;;  %v14361_v18 = vld [vmem:[%s18611_s13 + $0x668] ss:$12 sps:$4 sm:$0xff]  }
 0x7a9   : > { %9080 = vmatprep.subr.bf16.mxu1 %v14307_v19  ;;  %9218 = vmatprep.subr.bf16.mxu0 %v14641_v2  ;;  %v14362_v19 = vld [vmem:[%s18611_s13 + $0x5a8] ss:$12 sps:$4 sm:$0xff]  }
 0x7ab   : > { %9219 = vmatpush1.bf16.msra.mxu0 %v14308_v22  ;;  %v14364_v22 = vld [vmem:[%s18611_s13 + $0x5c0] ss:$12 sps:$4 sm:$0xff]  }
 0x7ac   : > { %9081 = vmatpush1.bf16.msra.mxu1 %v14305_v26  ;;  %9220 = vmatprep.subr.bf16.mxu0 %v14641_v2 }
 0x7ad   : > { %9082 = vmatprep.subr.bf16.mxu1 %v14311_v27  ;;  %v14365_v27 = vld [vmem:[%s18611_s13 + $0x698] ss:$12 sps:$4 sm:$0xff]  }
 0x7af   : > { %9221 = vmatpush1.bf16.msra.mxu0 %v14312_v28 }
 0x7b0   : > { %9083 = vmatpush1.bf16.msra.mxu1 %v14309_v29  ;;  %9222 = vmatprep.subr.bf16.mxu0 %v14641_v2 }
 0x7b1   : > { %9084 = vmatprep.subr.bf16.mxu1 %v14315_v30 }
 0x7b3   : > { %9223 = vmatpush1.bf16.msra.mxu0 %v14316_v32  ;;  %v14366_v32 = vld [vmem:[%s18611_s13 + $0x5d8] ss:$12 sps:$4 sm:$0xff]  }
 0x7b4   : > { %9085 = vmatpush1.bf16.msra.mxu1 %v14313_v35  ;;  %v14367_v35 = vld [vmem:[%s18611_s13 + $0x6b0] ss:$12 sps:$4 sm:$0xff]  }
 0x7b5   : > { %9086 = vmatprep.subr.bf16.mxu1 %v14319_v37  ;;  %v14368_v37 = vld [vmem:[%s18611_s13 + $0x5f0] ss:$12 sps:$4 sm:$0xff]  }
 0x7b6   : > { %9233 = vmatmul.mubr.bf16.vlgmr.msra.gmra.mrb[60].mxu0 %v8622_v46 }
 0x7b7   : > { %9607 = vmatprep.mubr.bf16.mxu0 %v14641_v2 }
 0x7b8   : > { %9087 = vmatpush1.bf16.msra.mxu1 %v14317_v38 }
 0x7b9   : > { %9088 = vmatprep.subr.bf16.mxu1 %v14322_v39 }
 0x7bc   : > { %9089 = vmatpush1.bf16.msra.mxu1 %v14320_v40 }
 0x7bd   : > { %9090 = vmatprep.subr.bf16.mxu1 %v14325_v41 }
 0x7c0   : > { %9091 = vmatpush1.bf16.msra.mxu1 %v14323_v61 }
 0x7c1   : > { %9092 = vmatprep.subr.bf16.mxu1 %v14328_v23 }
 0x7c4   : > { %9093 = vmatpush1.bf16.msra.mxu1 %v14326_v62 }
 0x7c5   : > { %9094 = vmatprep.subr.bf16.mxu1 %v14331_v31 }
 0x7c8   : > { %9095 = vmatpush1.bf16.msra.mxu1 %v14329_v42 }
 0x7c9   : > { %v7763_v1 = vpop.f32.mrb[44].mxu0  ;;  %9096 = vmatprep.subr.bf16.mxu1 %v14334_v43 }
 0x7ca   : > { %v7804_v49 = vpop.f32.mrb[44].mxu1  ;;  %v7765_v25 = vpop.f32.mrb[45].mxu0 }
 0x7cb   : > { %v17973_v53 = vadd.f32 %v7804_v49, %v7763_v1  ;;  %v7806_v3 = vpop.f32.mrb[45].mxu1  ;;  %v7767_v44 = vpop.f32.mrb[46].mxu0 }
 0x7cc   : > { %v17975_v45 = vadd.f32 %v7806_v3, %v7765_v25  ;;  %9097 = vmatpush1.bf16.msra.mxu1 %v14332_v52  ;;  %v7808_v51 = vpop.f32.mrb[46].mxu1  ;;  %v7768_v46 = vpop.f32.mrb[47].mxu0 }
 0x7cd   : > { %v7809_v5 = vpop.f32.mrb[47].mxu1  ;;  %9098 = vmatprep.subr.bf16.mxu1 %v14337_v34 }
 0x7d0   : > { %9099 = vmatpush1.bf16.msra.mxu1 %v14335_v4 }
 0x7d1   : > { %9100 = vmatprep.subr.bf16.mxu1 %v14340_v6  ;;  %v14369_v6 = vld [vmem:[%s18613_s15] ss:$16 sps:$4 sm:$0xff]  }
 0x7d4   : > { %9101 = vmatpush1.bf16.msra.mxu1 %v14338_v8  ;;  %v14371_v8 = vld [vmem:[%s18613_s15 + $0x4] ss:$16 sps:$4 sm:$0xff]  }
 0x7d5   : > { %9102 = vmatprep.subr.bf16.mxu1 %v14343_v60  ;;  %v14377_v60 = vld [vmem:[%s18613_s15 + $0x24] ss:$16 sps:$4 sm:$0xff]   ;;  %9575 = vmatprep.subr.bf16.mxu0 %v14371_v8 }
 0x7d6   : > { %9576 = vmatpush1.bf16.msra.mxu0 %v14369_v6 }
 0x7d7   : > { %9577 = vmatprep.subr.bf16.mxu0 %v14377_v60 }
 0x7d8   : > { %9103 = vmatpush1.bf16.msra.mxu1 %v14341_v9  ;;  %v14375_v9 = vld [vmem:[%s18613_s15 + $0x20] ss:$16 sps:$4 sm:$0xff]  }
 0x7d9   : > { %9104 = vmatprep.subr.bf16.mxu1 %v14346_v24 }
 0x7da   : > { %9578 = vmatpush1.bf16.msra.mxu0 %v14375_v9 }
 0x7dc   : > { %9105 = vmatpush1.bf16.msra.mxu1 %v14344_v11 }
 0x7dd   : > { %9106 = vmatprep.subr.bf16.mxu1 %v14349_v47 }
 0x7e0   : > { %9107 = vmatpush1.bf16.msra.mxu1 %v14347_v10 }
 0x7e1   : > { %9108 = vmatprep.subr.bf16.mxu1 %v14352_v59 }
 0x7e4   : > { %9109 = vmatpush1.bf16.msra.mxu1 %v14350_v12 }
 0x7e5   : > { %12765 = vmatprep.subr.bf16.mxu1 %v14353_v48 }
 0x7e7   : > { %9111 = vmatmul.mubr.bf16.vlgmr.msra.gmra.mrb[64].mxu1 %v8620_v50 }
 0x7e8   : > { %12766 = vmatpush3.bf16.msra.mxu1 %v14354_v13  ;;  %9192 = vmatprep.mubr.bf16.mxu1 %v8621_v20  ;;  %v14363_v20 = vld [vmem:[%s18611_s13 + $0x680] ss:$12 sps:$4 sm:$0xff]  }
 0x7e9   : > { %12767 = vmatprep.subr.bf16.mxu1 %v14355_v14 }
 0x7ea   : > { %v12737_v21 = vpop.f32.mrb[48].mxu1 }
 0x7eb   : > { %v12738_v16 = vpop.f32.mrb[49].mxu1 }
 0x7ec   : > { %v12739_v57 = vadd.f32 %v12738_v16, %v12737_v21  ;;  %v12740_v58 = vpop.f32.mrb[50].mxu1  ;;  %12768 = vmatpush3.bf16.msra.mxu1 %v14356_v15  ;;  %v14380_v21 = vld [vmem:[%s18613_s15 + $0xa4] ss:$16 sps:$4 sm:$0xff]  }
 0x7ed   : > { %v12741_v36 = vpop.f32.mrb[51].mxu1  ;;  %12769 = vmatprep.subr.bf16.mxu1 %v14357_v33  ;;  %v9243_v33 = vld [vmem:[%s18612_s14] sm:$0x7]  ;;  %v14383_v16 = vld [vmem:[%s18613_s15 + $0x44] ss:$16 sps:$4 sm:$0xff]  }
 0x7ee   : > { %v14378_v58 = vld [vmem:[%s18613_s15 + $0xa0] ss:$16 sps:$4 sm:$0xff]   ;;  %9579 = vmatprep.subr.bf16.mxu0 %v14383_v16  ;;  %v14410_v16 = vld [vmem:[%s18613_s15 + $0xcc] ss:$16 sps:$4 sm:$0xff]  }
 0x7f0   : > { %12770 = vmatpush3.bf16.msra.mxu1 %v14358_v63  ;;  %v14381_v63 = vld [vmem:[%s18613_s15 + $0x40] ss:$16 sps:$4 sm:$0xff]  }
 0x7f1   : > { %12771 = vmatprep.subr.bf16.mxu1 %v14359_v0  ;;  %9580 = vmatpush1.bf16.msra.mxu0 %v14381_v63  ;;  %v14411_v63 = vld [vmem:[%s18613_s15 + $0x160] ss:$16 sps:$4 sm:$0xff]  }
 0x7f4   : > { %12772 = vmatpush3.bf16.msra.mxu1 %v14360_v17  ;;  %v9248_v17 = vrot.slane %v9243_v33, %v15425_v7 }
 0x7f5   : > { %12773 = vmatprep.subr.bf16.mxu1 %v14361_v18 }
 0x7f8   : > { %12774 = vmatpush3.bf16.msra.mxu1 %v14362_v19 }
 0x7f9   : > { %v8416_v26 = vpop.f32.mrb[48].mxu0  ;;  %12775 = vmatprep.subr.bf16.mxu1 %v14363_v20 }
 0x7fa   : > { %v8418_v28 = vpop.f32.mrb[49].mxu0 }
 0x7fb   : > { %v8420_v29 = vpop.f32.mrb[50].mxu0 }
 0x7fc   : > { %12776 = vmatpush3.bf16.msra.mxu1 %v14364_v22  ;;  %v8421_v30 = vpop.f32.mrb[51].mxu0 }
 0x7fd   : > { %12777 = vmatprep.subr.bf16.mxu1 %v14365_v27  ;;  %v14386_v27 = vld [vmem:[%s18613_s15 + $0xc4] ss:$16 sps:$4 sm:$0xff]   ;;  %v14384_v30 = vld [vmem:[%s18613_s15 + $0xc0] ss:$16 sps:$4 sm:$0xff]  }
 0x800   : > { %12778 = vmatpush3.bf16.msra.mxu1 %v14366_v32  ;;  %v14387_v32 = vld [vmem:[%s18613_s15 + $0x60] ss:$16 sps:$4 sm:$0xff]  }
 0x801   : > { %12779 = vmatprep.subr.bf16.mxu1 %v14367_v35 }
 0x804   : > { %12780 = vmatpush3.bf16.msra.mxu1 %v14368_v37 }
 0x807   : > { %9193 = vmatmul.mubr.bf16.vlgmr.msra.gmra.mrb[68].mxu1 %v8620_v50 }
 0x808   : > { %9442 = vmatprep.mubr.bf16.mxu1 %v14641_v2 }
 0x81a   : > { %v7885_v38 = vpop.f32.mrb[52].mxu1 }
 0x81b   : > { %v7886_v39 = vadd.f32 %v12739_v57, %v7885_v38  ;;  %v7887_v40 = vpop.f32.mrb[53].mxu1 }
 0x81c   : > { %v7888_v41 = vpop.f32.mrb[54].mxu1  ;;  %v14395_v40 = vld [vmem:[%s18613_s15 + $0x104] ss:$16 sps:$4 sm:$0xff]  }
 0x81d   : > { %v7889_v61 = vpop.f32.mrb[55].mxu1  ;;  %v14390_v41 = vld [vmem:[%s18613_s15 + $0xe0] ss:$16 sps:$4 sm:$0xff]  }
 0x81e   : > { %v14398_v61 = vld [vmem:[%s18613_s15 + $0x8c] ss:$16 sps:$4 sm:$0xff]  }
 0x829   : > { %v8497_v23 = vpop.f32.mrb[52].mxu0 }
 0x82a   : > { %v8499_v62 = vpop.f32.mrb[53].mxu0 }
 0x82b   : > { %v8500_v31 = vpop.f32.mrb[54].mxu0 }
 0x82c   : > { %v8501_v42 = vpop.f32.mrb[55].mxu0 }
 0x859   : > { %v9153_v43 = vpop.f32.mrb[56].mxu0 }
 0x85a   : > { %v8375_v52 = vpop.f32.mrb[56].mxu1  ;;  %v9155_v1 = vpop.f32.mrb[57].mxu0 }
 0x85b   : > { %v8376_v34 = vadd.f32 %v8375_v52, %v17973_v53  ;;  %v8377_v49 = vpop.f32.mrb[57].mxu1  ;;  %v9157_v25 = vpop.f32.mrb[58].mxu0  ;;  %v14372_v53 = vld [vmem:[%s18613_s15 + $0x80] ss:$16 sps:$4 sm:$0xff]  }
 0x85c   : > { %v8378_v3 = vadd.f32 %v8377_v49, %v17975_v45  ;;  %v8379_v44 = vpop.f32.mrb[58].mxu1  ;;  %v9158_v51 = vpop.f32.mrb[59].mxu0  ;;  %v14374_v45 = vld [vmem:[%s18613_s15 + $0x84] ss:$16 sps:$4 sm:$0xff]  }
 0x85d   : > { %v8417_v46 = vadd.f32 %v8416_v26, %v8376_v34  ;;  %v8380_v4 = vpop.f32.mrb[59].mxu1  ;;  %9410 = vmatprep.subr.bf16.mxu1 %v14374_v45  ;;  %v9252_v26 = vrot.slane %v9243_v33, %v15429_v55  ;;  %v9256_v34 = vrot.slane %v9243_v33, %v15427_v54  ;;  %v14402_v33 = vld [vmem:[%s18613_s15 + $0xa8] ss:$16 sps:$4 sm:$0xff]  }
 0x85e   : > { %v8419_v5 = vadd.f32 %v8418_v28, %v8378_v3  ;;  %9411 = vmatpush1.bf16.msra.mxu1 %v14372_v53  ;;  %v14389_v28 = vld [vmem:[%s18613_s15 + $0x64] ss:$16 sps:$4 sm:$0xff]  }
 0x85f   : > { %9412 = vmatprep.subr.bf16.mxu1 %v14380_v21  ;;  %9581 = vmatprep.subr.bf16.mxu0 %v14389_v28  ;;  %v14405_v21 = vld [vmem:[%s18613_s15 + $0x140] ss:$16 sps:$4 sm:$0xff]   ;;  %v14428_v28 = vld [vmem:[%s18613_s15 + $0x2c] ss:$16 sps:$4 sm:$0xff]  }
 0x860   : > { %9582 = vmatpush1.bf16.msra.mxu0 %v14387_v32  ;;  %v14429_v32 = vld [vmem:[%s18613_s15 + $0x1c0] ss:$16 sps:$4 sm:$0xff]  }
 0x861   : > { %9759 = vmatprep.subr.bf16.mxu0 %v14395_v40  ;;  %v14440_v40 = vld [vmem:[%s18613_s15 + $0x6c] ss:$16 sps:$4 sm:$0xff]  }
 0x862   : > { %9413 = vmatpush1.bf16.msra.mxu1 %v14378_v58  ;;  %v14408_v58 = vld [vmem:[%s18613_s15 + $0xc8] ss:$16 sps:$4 sm:$0xff]  }
 0x863   : > { %9414 = vmatprep.subr.bf16.mxu1 %v14386_v27  ;;  %v14423_v27 = vld [vmem:[%s18613_s15 + $0x1a0] ss:$16 sps:$4 sm:$0xff]  }
 0x866   : > { %9415 = vmatpush1.bf16.msra.mxu1 %v14384_v30  ;;  %v14426_v30 = vld [vmem:[%s18613_s15 + $0x28] ss:$16 sps:$4 sm:$0xff]  }
 0x87a   : > { %v12759_v24 = vpop.f32.mrb[60].mxu1 }
 0x87b   : > { %v12760_v11 = vpop.f32.mrb[61].mxu1 }
 0x87c   : > { %v12761_v47 = vadd.f32 %v12760_v11, %v12759_v24  ;;  %v12762_v10 = vpop.f32.mrb[62].mxu1  ;;  %v14393_v24 = vld [vmem:[%s18613_s15 + $0x100] ss:$16 sps:$4 sm:$0xff]  }
 0x87d   : > { %v12763_v59 = vpop.f32.mrb[63].mxu1 }
 0x87e   : > { %v8458_v12 = vadd.f32 %v12761_v47, %v7886_v39  ;;  %v14392_v39 = vld [vmem:[%s18613_s15 + $0xe4] ss:$16 sps:$4 sm:$0xff]  }
 0x87f   : > { %9416 = vmatprep.subr.bf16.mxu1 %v14392_v39  ;;  %v14401_v59 = vld [vmem:[%s18613_s15 + $0x124] ss:$16 sps:$4 sm:$0xff]   ;;  %v14435_v39 = vld [vmem:[%s18613_s15 + $0x1e0] ss:$16 sps:$4 sm:$0xff]  }
 0x880   : > { %v8498_v48 = vadd.f32 %v8497_v23, %v8458_v12  ;;  %9417 = vmatpush1.bf16.msra.mxu1 %v14390_v41  ;;  %v14467_v41 = vld [vmem:[%s18615_s17 + $0x4] ss:$8 sps:$4 sm:$0xff]  }
 0x881   : > { %9451 = vmatprep.subr.bf16.mxu1 %v14398_v61  ;;  %v14438_v61 = vld [vmem:[%s18613_s15 + $0x68] ss:$16 sps:$4 sm:$0xff]  }
 0x889   : > { %v9234_v13 = vpop.f32.mrb[60].mxu0 }
 0x88a   : > { %v9236_v50 = vpop.f32.mrb[61].mxu0 }
 0x88b   : > { %v9237_v14 = vpop.f32.mrb[62].mxu0 }
 0x88c   : > { %v9238_v15 = vpop.f32.mrb[63].mxu0  ;;  %v14404_v14 = vld [vmem:[%s18613_s15 + $0xac] ss:$16 sps:$4 sm:$0xff]  }
 0x88d   : > { %v14407_v15 = vld [vmem:[%s18613_s15 + $0x144] ss:$16 sps:$4 sm:$0xff]  }
 0x8ba   : > { %v9112_v57 = vpop.f32.mrb[64].mxu1 }
 0x8bb   : > { %v9154_v36 = vadd.f32 %v9153_v43, %v9112_v57  ;;  %v9114_v0 = vpop.f32.mrb[65].mxu1  ;;  %v14413_v57 = vld [vmem:[%s18613_s15 + $0x164] ss:$16 sps:$4 sm:$0xff]  }
 0x8bc   : > { %v9156_v18 = vadd.f32 %v9155_v1, %v9114_v0  ;;  %v9116_v19 = vpop.f32.mrb[66].mxu1  ;;  %v14419_v0 = vld [vmem:[%s18613_s15 + $0x184] ss:$16 sps:$4 sm:$0xff]  }
 0x8bd   : > { %v9240_v20 = vadd.f32 %v9154_v36, %v8417_v46  ;;  %v9117_v22 = vpop.f32.mrb[67].mxu1  ;;  %v14416_v36 = vld [vmem:[%s18613_s15 + $0xec] ss:$16 sps:$4 sm:$0xff]  }
 0x8be   : > { %v9241_v29 = vadd.f32 %v9156_v18, %v8419_v5  ;;  %v14417_v18 = vld [vmem:[%s18613_s15 + $0x180] ss:$16 sps:$4 sm:$0xff]   ;;  %v14425_v22 = vld [vmem:[%s18613_s15 + $0x1a4] ss:$16 sps:$4 sm:$0xff]  }
 0x8bf   : > { %v9260_v35 = vadd.f32 %v9248_v17, %v9240_v20  ;;  %v14414_v17 = vld [vmem:[%s18613_s15 + $0xe8] ss:$16 sps:$4 sm:$0xff]   ;;  %v14422_v20 = vld [vmem:[%s18613_s15 + $0xc] ss:$16 sps:$4 sm:$0xff]  }
 0x8c0   : > { %v9261_v38 = vadd.f32 %v9252_v26, %v9241_v29  ;;  %v14420_v26 = vld [vmem:[%s18613_s15 + $0x8] ss:$16 sps:$4 sm:$0xff]   ;;  %v14431_v29 = vld [vmem:[%s18613_s15 + $0x1c4] ss:$16 sps:$4 sm:$0xff]  }
 0x8c1   : > { %v9263_v37 = vmax.f32 %v9260_v35, 0.0  ;;  %v14434_v35 = vld [vmem:[%s18613_s15 + $0x4c] ss:$16 sps:$4 sm:$0xff]  }
 0x8c2   : > { %v9264_v23 = vmax.f32 %v9261_v38, 0.0  ;;  %v14432_v38 = vld [vmem:[%s18613_s15 + $0x48] ss:$16 sps:$4 sm:$0xff]  }
 0x8c3   : > { %9267 = vrot.lane.b32.xlu0 %v9263_v37, %s14642_s28 }
 0x8c7   : > { %9273 = vrot.lane.b32.xlu0 %v9264_v23, %s14642_s28  ;;  %s648_s28 = scalar_lea.vmem [#allocation2], %s647_s26 }
 0x8c8   : > { %s10730_s0 = sshll.u32 %s648_s28, 4  ;;  %s18558_s0 = int_to_ptr.vmem [resolvable:$true] %s10730_s0 }
 0x8c9   : > { %s14577_s5 = scalar_lea.vmem %s18558_s0, 16  ;;  %p14584_p0 = scmp.lt.s32.totalorder %s18558_s0, %s14582_s21 }
 0x8ca   : > { %p14578_p11 = scmp.ne.s32.totalorder %s18558_s0, %s14577_s5  ;;  %p14585_p1 = scmp.lt.s32.totalorder %s14583_s4, %s14577_s5 }
 0x8cc   : > { %p14579_p12 = pnand %p14578_p11, %p14792_p5  ;;  %p14586_p2 = por %p14585_p1, %p14584_p0 }
 0x8ce   : > { %p14580_p13 = pneg %p14579_p12 }
 0x8d0   : > { %p14587_p3 = pnand %p14586_p2, %p14580_p13 }
 0x8da   : > { %v12781_v62 = vpop.f32.mrb[68].mxu1 }
 0x8db   : > { %v12782_v31 = vpop.f32.mrb[69].mxu1 }
 0x8dc   : > { %v12783_v42 = vadd.f32 %v12782_v31, %v12781_v62  ;;  %v12784_v43 = vpop.f32.mrb[70].mxu1  ;;  %v14443_v31 = vld [vmem:[%s18613_s15 + $0x10c] ss:$16 sps:$4 sm:$0xff]  }
 0x8dd   : > { %v12785_v52 = vpop.f32.mrb[71].mxu1  ;;  %v14441_v43 = vld [vmem:[%s18613_s15 + $0x108] ss:$16 sps:$4 sm:$0xff]  }
 0x8de   : > { %v9235_v1 = vadd.f32 %v12783_v42, %v9234_v13  ;;  %v14399_v13 = vld [vmem:[%s18613_s15 + $0x120] ss:$16 sps:$4 sm:$0xff]   ;;  %v14470_v42 = vld [vmem:[%s18615_s17 + $0x14] ss:$8 sps:$4 sm:$0xff]  }
 0x8df   : > { %v14446_v52 = vld [vmem:[%s18613_s15 + $0x12c] ss:$16 sps:$4 sm:$0xff]  }
 0x8e0   : > { %v9242_v49 = vadd.f32 %v9235_v1, %v8498_v48  ;;  %v14396_v48 = vld [vmem:[%s18613_s15 + $0x88] ss:$16 sps:$4 sm:$0xff]  }
 0x8e1   : > { %v14468_v1 = vld [vmem:[%s18615_s17 + $0x10] ss:$8 sps:$4 sm:$0xff]  }
 0x8e2   : > { %v9262_v25 = vadd.f32 %v9256_v34, %v9242_v49  ;;  %v14473_v34 = vld [vmem:[%s18615_s17 + $0x24] ss:$8 sps:$4 sm:$0xff]   ;;  %v14444_v49 = vld [vmem:[%s18613_s15 + $0x128] ss:$16 sps:$4 sm:$0xff]  }
 0x8e4   : > { %v9265_v5 = vmax.f32 %v9262_v25, 0.0  ;;  %v14449_v25 = vld [vmem:[%s18613_s15 + $0x14c] ss:$16 sps:$4 sm:$0xff]  }
 0x935   : > { %v9268_v3 = vpop.permute.xlu0 %9267 }
 0x936   : > { %v9270_v44 = vmax.f32 %v9263_v37, %v9268_v3  ;;  %v14437_v37 = vld [vmem:[%s18613_s15 + $0x1e4] ss:$16 sps:$4 sm:$0xff]   ;;  %v14471_v3 = vld [vmem:[%s18615_s17 + $0x20] ss:$8 sps:$4 sm:$0xff]  }
 0x938   : > { %v9271_v51 = vmax.f32 %v9270_v44, %v9264_v23  ;;  %v14476_v44 = vld [vmem:[%s18615_s17 + $0x34] ss:$8 sps:$4 sm:$0xff]  }
 0x939   : > { %v9274_v46 = vpop.permute.xlu0 %9273 }
 0x93a   : > { %v9279_v4 = vrot.slane %v9271_v51, 1  ;;  %v9276_v6 = vmax.f32 %v9264_v23, %v9274_v46  ;;  %v9282_v53 = vrot.slane %v9271_v51, 2  ;;  %v14465_v23 = vld [vmem:[%s18615_s17] ss:$8 sps:$4 sm:$0xff]   ;;  %v14452_v46 = vld [vmem:[%s18613_s15 + $0x16c] ss:$16 sps:$4 sm:$0xff]  }
 0x93c   : > { %v9281_v8 = vmax.f32 %v9271_v51, %v9279_v4  ;;  %v9277_v45 = vmax.f32 %v9276_v6, %v9265_v5  ;;  %v14447_v51 = vld [vmem:[%s18613_s15 + $0x148] ss:$16 sps:$4 sm:$0xff]   ;;  %v14479_v5 = vld [vmem:[%s18615_s17 + $0x44] ss:$8 sps:$4 sm:$0xff]  }
 0x93d   : > { %v14474_v4 = vld [vmem:[%s18615_s17 + $0x30] ss:$8 sps:$4 sm:$0xff]  }
 0x93e   : > { %v9284_v60 = vmax.f32 %v9281_v8, %v9282_v53  ;;  %v9286_v9 = vrot.slane %v9277_v45, 1  ;;  %v9289_v10 = vrot.slane %v9277_v45, 2  ;;  %v14450_v6 = vld [vmem:[%s18613_s15 + $0x168] ss:$16 sps:$4 sm:$0xff]   ;;  %v14455_v8 = vld [vmem:[%s18613_s15 + $0x18c] ss:$16 sps:$4 sm:$0xff]  }
 0x93f   : > { %v14477_v53 = vld [vmem:[%s18615_s17 + $0x40] ss:$8 sps:$4 sm:$0xff]  }
 0x940   : > { %v18127_v11 = vpack.c.bf16 %v9284_v60, %v9284_v60  ;;  %v9288_v47 = vmax.f32 %v9277_v45, %v9286_v9  ;;  %v14482_v45 = vld [vmem:[%s18615_s17 + $0x54] ss:$8 sps:$4 sm:$0xff]   ;;  %v14453_v60 = vld [vmem:[%s18613_s15 + $0x188] ss:$16 sps:$4 sm:$0xff]  }
 0x941   : > { %v14458_v9 = vld [vmem:[%s18613_s15 + $0x1ac] ss:$16 sps:$4 sm:$0xff]  }
 0x942   : > { %v9291_v12 = vmax.f32 %v9288_v47, %v9289_v10  ;;  %12568 = vmatmul.mubr.msk.bf16.vlgmr.msra.gmra.mrb[64].mxu0 %vm7725_vm7, %v18127_v11  ;;  %v9675_v19 = vrot.slane %v18127_v11, 1  ;;  %v14456_v47 = vld [vmem:[%s18613_s15 + $0x1a8] ss:$16 sps:$4 sm:$0xff]   ;;  %v14461_v10 = vld [vmem:[%s18613_s15 + $0x1cc] ss:$16 sps:$4 sm:$0xff]  }
 0x943   : > { %9760 = vmatpush1.bf16.msra.mxu0 %v14393_v24  ;;  %9791 = vmatprep.mubr.bf16.mxu0 %v14641_v2  ;;  %v14480_v24 = vld [vmem:[%s18615_s17 + $0x50] ss:$8 sps:$4 sm:$0xff]  }
 0x944   : > { %v18141_v50 = vpack.c.bf16 %v9291_v12, %v9291_v12  ;;  %9761 = vmatprep.subr.bf16.mxu0 %v14401_v59  ;;  %v14464_v59 = vld [vmem:[%s18613_s15 + $0x1ec] ss:$16 sps:$4 sm:$0xff]   ;;  %v14483_v12 = vld [vmem:[%s18615_s17 + $0x60] ss:$8 sps:$4 sm:$0xff]  }
 0x946   : > { %12550 = vmatmul.mubr.msk.bf16.vlgmr.msra.gmra.mrb[72].mxu1 %vm7725_vm7, %v18141_v50  ;;  %v9863_v62 = vrot.slane %v18141_v50, 1 }
 0x947   : > { %9452 = vmatpush1.bf16.msra.mxu1 %v14396_v48  ;;  %9762 = vmatpush1.bf16.msra.mxu0 %v14399_v13  ;;  %v14485_v48 = vld [vmem:[%s18615_s17 + $0x64] ss:$8 sps:$4 sm:$0xff]   ;;  %v14488_v13 = vld [vmem:[%s18615_s17 + $0x74] ss:$8 sps:$4 sm:$0xff]  }
 0x948   : > { %9453 = vmatprep.subr.bf16.mxu1 %v14404_v14  ;;  %9763 = vmatprep.subr.bf16.mxu0 %v14407_v15  ;;  %v14491_v14 = vld [vmem:[%s18615_s17 + $0x84] ss:$8 sps:$4 sm:$0xff]   ;;  %v14489_v15 = vld [vmem:[%s18615_s17 + $0x80] ss:$8 sps:$4 sm:$0xff]  }
 0x949   : > { %9483 = vmatprep.mubr.bf16.mxu1 %v14641_v2 }
 0x94b   : > { %9454 = vmatpush1.bf16.msra.mxu1 %v14402_v33  ;;  %9764 = vmatpush1.bf16.msra.mxu0 %v14405_v21  ;;  %v14494_v33 = vld [vmem:[%s18615_s17 + $0x94] ss:$8 sps:$4 sm:$0xff]   ;;  %v14492_v21 = vld [vmem:[%s18615_s17 + $0x90] ss:$8 sps:$4 sm:$0xff]  }
 0x94c   : > { %9455 = vmatprep.subr.bf16.mxu1 %v14410_v16  ;;  %9765 = vmatprep.subr.bf16.mxu0 %v14413_v57  ;;  %v14497_v16 = vld [vmem:[%s18615_s17 + $0xa4] ss:$8 sps:$4 sm:$0xff]   ;;  %v14495_v57 = vld [vmem:[%s18615_s17 + $0xa0] ss:$8 sps:$4 sm:$0xff]  }
 0x94f   : > { %9456 = vmatpush1.bf16.msra.mxu1 %v14408_v58  ;;  %9766 = vmatpush1.bf16.msra.mxu0 %v14411_v63  ;;  %v14500_v58 = vld [vmem:[%s18615_s17 + $0xb4] ss:$8 sps:$4 sm:$0xff]   ;;  %v14498_v63 = vld [vmem:[%s18615_s17 + $0xb0] ss:$8 sps:$4 sm:$0xff]  }
 0x950   : > { %9457 = vmatprep.subr.bf16.mxu1 %v14416_v36  ;;  %9947 = vmatprep.subr.bf16.mxu0 %v14419_v0  ;;  %v14503_v36 = vld [vmem:[%s18615_s17 + $0xc4] ss:$8 sps:$4 sm:$0xff]   ;;  %v14501_v0 = vld [vmem:[%s18615_s17 + $0xc0] ss:$8 sps:$4 sm:$0xff]  }
 0x952   : > { %12602 = vmatmul.mubr.msk.bf16.vlgmr.msra.gmra.mrb[68].mxu0 %vm7725_vm7, %v9675_v19 }
 0x953   : > { %9458 = vmatpush1.bf16.msra.mxu1 %v14414_v17  ;;  %9948 = vmatpush1.bf16.msra.mxu0 %v14417_v18  ;;  %v14506_v17 = vld [vmem:[%s18615_s17 + $0xd4] ss:$8 sps:$4 sm:$0xff]   ;;  %v14504_v18 = vld [vmem:[%s18615_s17 + $0xd0] ss:$8 sps:$4 sm:$0xff]  }
 0x954   : > { %9616 = vmatprep.subr.bf16.mxu1 %v14422_v20  ;;  %9949 = vmatprep.subr.bf16.mxu0 %v14425_v22  ;;  %v14507_v20 = vld [vmem:[%s18615_s17 + $0xe0] ss:$8 sps:$4 sm:$0xff]   ;;  %v14512_v22 = vld [vmem:[%s18615_s17 + $0xf4] ss:$8 sps:$4 sm:$0xff]  }
 0x955   : > { %9979 = vmatprep.mubr.bf16.mxu0 %v14641_v2 }
 0x956   : > { %12551 = vmatmul.mubr.msk.bf16.vlgmr.msra.gmra.mrb[76].mxu1 %vm7725_vm7, %v18141_v50  ;;  %v14486_v50 = vld [vmem:[%s18615_s17 + $0x70] ss:$8 sps:$4 sm:$0xff]  }
 0x957   : > { %9617 = vmatpush1.bf16.msra.mxu1 %v14420_v26  ;;  %9950 = vmatpush1.bf16.msra.mxu0 %v14423_v27  ;;  %v14510_v26 = vld [vmem:[%s18615_s17 + $0xf0] ss:$8 sps:$4 sm:$0xff]   ;;  %v14515_v27 = vld [vmem:[%s18615_s17 + $0x104] ss:$8 sps:$4 sm:$0xff]  }
 0x958   : > { %9618 = vmatprep.subr.bf16.mxu1 %v14428_v28  ;;  %9951 = vmatprep.subr.bf16.mxu0 %v14431_v29  ;;  %v14561_v28 = vld [vmem:[%s18617_s19 + $0x40] sm:$0xff]  }
 0x959   : > { %9648 = vmatprep.mubr.bf16.mxu1 %v14641_v2  ;;  %v14562_v29 = vld [vmem:[%s18617_s19] sm:$0xff]  }
 0x95b   : > { %9619 = vmatpush1.bf16.msra.mxu1 %v14426_v30  ;;  %9952 = vmatpush1.bf16.msra.mxu0 %v14429_v32  ;;  %v14563_v30 = vld [vmem:[%s18617_s19 + $0x48] sm:$0xff]  }
 0x95c   : > { %9620 = vmatprep.subr.bf16.mxu1 %v14434_v35  ;;  %9953 = vmatprep.subr.bf16.mxu0 %v14437_v37  ;;  %v14564_v32 = vld [vmem:[%s18617_s19 + $0x8] sm:$0xff]   ;;  %v14565_v35 = vld [vmem:[%s18617_s19 + $0x50] sm:$0xff]  }
 0x95d   : > { %v14566_v37 = vld [vmem:[%s18617_s19 + $0x10] sm:$0xff]  }
 0x95f   : > { %9621 = vmatpush1.bf16.msra.mxu1 %v14432_v38  ;;  %9954 = vmatpush1.bf16.msra.mxu0 %v14435_v39  ;;  %v14567_v38 = vld [vmem:[%s18617_s19 + $0x58] sm:$0xff]  }
 0x960   : > { %9622 = vmatprep.subr.bf16.mxu1 %v14440_v40  ;;  %10463 = vmatprep.subr.bf16.mxu0 %v14467_v41  ;;  %v14568_v39 = vld [vmem:[%s18617_s19 + $0x18] sm:$0xff]   ;;  %v14569_v40 = vld [vmem:[%s18617_s19 + $0x60] sm:$0xff]  }
 0x961   : > { %v14570_v41 = vld [vmem:[%s18617_s19 + $0x20] sm:$0xff]  }
 0x962   : > { %12636 = vmatmul.mubr.msk.bf16.vlgmr.msra.gmra.mrb[72].mxu0 %vm7725_vm7, %v9863_v62 }
 0x963   : > { %9623 = vmatpush1.bf16.msra.mxu1 %v14438_v61  ;;  %10464 = vmatpush1.bf16.msra.mxu0 %v14465_v23  ;;  %v14571_v61 = vld [vmem:[%s18617_s19 + $0x68] sm:$0xff]  }
 0x964   : > { %9800 = vmatprep.subr.bf16.mxu1 %v14443_v31  ;;  %10465 = vmatprep.subr.bf16.mxu0 %v14470_v42  ;;  %v14572_v23 = vld [vmem:[%s18617_s19 + $0x28] sm:$0xff]  }
 0x966   : > { %12569 = vmatmul.mubr.msk.bf16.vlgmr.msra.gmra.mrb[80].mxu1 %vm7725_vm7, %v18127_v11  ;;  %v14459_v11 = vld [vmem:[%s18613_s15 + $0x1c8] ss:$16 sps:$4 sm:$0xff]  }
 0x967   : > { %9801 = vmatpush1.bf16.msra.mxu1 %v14441_v43  ;;  %9832 = vmatprep.mubr.bf16.mxu1 %v14641_v2 }
 0x968   : > { %9802 = vmatprep.subr.bf16.mxu1 %v14446_v52  ;;  %10466 = vmatpush1.bf16.msra.mxu0 %v14468_v1 }
 0x969   : > { %10467 = vmatprep.subr.bf16.mxu0 %v14473_v34 }
 0x96b   : > { %9803 = vmatpush1.bf16.msra.mxu1 %v14444_v49 }
 0x96c   : > { %9804 = vmatprep.subr.bf16.mxu1 %v14449_v25  ;;  %10468 = vmatpush1.bf16.msra.mxu0 %v14471_v3 }
 0x96d   : > { %10469 = vmatprep.subr.bf16.mxu0 %v14476_v44 }
 0x96f   : > { %9805 = vmatpush1.bf16.msra.mxu1 %v14447_v51 }
 0x970   : > { %9806 = vmatprep.subr.bf16.mxu1 %v14452_v46  ;;  %10470 = vmatpush1.bf16.msra.mxu0 %v14474_v4 }
 0x971   : > { %10471 = vmatprep.subr.bf16.mxu0 %v14479_v5 }
 0x973   : > { %9807 = vmatpush1.bf16.msra.mxu1 %v14450_v6 }
 0x974   : > { %9988 = vmatprep.subr.bf16.mxu1 %v14455_v8  ;;  %10472 = vmatpush1.bf16.msra.mxu0 %v14477_v53 }
 0x975   : > { %10473 = vmatprep.subr.bf16.mxu0 %v14482_v45 }
 0x976   : > { %12603 = vmatmul.mubr.msk.bf16.vlgmr.msra.gmra.mrb[84].mxu1 %vm7725_vm7, %v9675_v19  ;;  %v14509_v19 = vld [vmem:[%s18615_s17 + $0xe4] ss:$8 sps:$4 sm:$0xff]  }
 0x977   : > { %9989 = vmatpush1.bf16.msra.mxu1 %v14453_v60  ;;  %10020 = vmatprep.mubr.bf16.mxu1 %v14641_v2  ;;  %v14462_v2 = vld [vmem:[%s18613_s15 + $0x1e8] ss:$16 sps:$4 sm:$0xff]  }
 0x978   : > { %9990 = vmatprep.subr.bf16.mxu1 %v14458_v9  ;;  %10474 = vmatpush1.bf16.msra.mxu0 %v14480_v24  ;;  %v18431_v24 = vld [vmem:[%s18614_s16] sm:$0xf] }
 0x979   : > { %10475 = vmatprep.subr.bf16.mxu0 %v14485_v48 }
 0x97b   : > { %9991 = vmatpush1.bf16.msra.mxu1 %v14456_v47  ;;  %v10038_v47 = vrot.slane %v18431_v24, %v15425_v7 }
 0x97c   : > { %9992 = vmatprep.subr.bf16.mxu1 %v14461_v10  ;;  %10476 = vmatpush1.bf16.msra.mxu0 %v14483_v12 }
 0x97d   : > { %10477 = vmatprep.subr.bf16.mxu0 %v14488_v13 }
 0x97f   : > { %9993 = vmatpush1.bf16.msra.mxu1 %v14459_v11  ;;  %v10042_v11 = vrot.slane %v18431_v24, %v15429_v55 }
 0x980   : > { %9994 = vmatprep.subr.bf16.mxu1 %v14464_v59  ;;  %10478 = vmatpush1.bf16.msra.mxu0 %v14486_v50 }
 0x981   : > { %10479 = vmatprep.subr.bf16.mxu0 %v14491_v14 }
 0x983   : > { %9995 = vmatpush1.bf16.msra.mxu1 %v14462_v2 }
 0x984   : > { %10480 = vmatpush1.bf16.msra.mxu0 %v14489_v15  ;;  %12787 = vmatprep.subr.bf16.mxu1 %v14561_v28 }
 0x985   : > { %10481 = vmatprep.subr.bf16.mxu0 %v14494_v33 }
 0x986   : > { %12637 = vmatmul.mubr.msk.bf16.vlgmr.msra.gmra.mrb[88].mxu1 %vm7725_vm7, %v9863_v62  ;;  %v14573_v62 = vld [vmem:[%s18617_s19 + $0x70] sm:$0xff]  }
 0x987   : > { %12788 = vmatpush3.bf16.msra.mxu1 %v14562_v29  ;;  %v14522_v29 = vld [vmem:[%s18615_s17 + $0x130] ss:$8 sps:$4 sm:$0xff]  }
 0x988   : > { %10482 = vmatpush1.bf16.msra.mxu0 %v14492_v21  ;;  %12789 = vmatprep.subr.bf16.mxu1 %v14563_v30 }
 0x989   : > { %10483 = vmatprep.subr.bf16.mxu0 %v14497_v16 }
 0x98b   : > { %12790 = vmatpush3.bf16.msra.mxu1 %v14564_v32 }
 0x98c   : > { %10484 = vmatpush1.bf16.msra.mxu0 %v14495_v57  ;;  %12791 = vmatprep.subr.bf16.mxu1 %v14565_v35  ;;  %v14527_v35 = vld [vmem:[%s18615_s17 + $0x144] ss:$8 sps:$4 sm:$0xff]  }
 0x98d   : > { %10485 = vmatprep.subr.bf16.mxu0 %v14500_v58 }
 0x98f   : > { %12792 = vmatpush3.bf16.msra.mxu1 %v14566_v37 }
 0x990   : > { %10486 = vmatpush1.bf16.msra.mxu0 %v14498_v63  ;;  %12793 = vmatprep.subr.bf16.mxu1 %v14567_v38 }
 0x991   : > { %10487 = vmatprep.subr.bf16.mxu0 %v14503_v36 }
 0x993   : > { %12794 = vmatpush3.bf16.msra.mxu1 %v14568_v39 }
 0x994   : > { %10488 = vmatpush1.bf16.msra.mxu0 %v14501_v0  ;;  %12795 = vmatprep.subr.bf16.mxu1 %v14569_v40  ;;  %v14525_v40 = vld [vmem:[%s18615_s17 + $0x140] ss:$8 sps:$4 sm:$0xff]  }
 0x995   : > { %10489 = vmatprep.subr.bf16.mxu0 %v14506_v17  ;;  %v14513_v17 = vld [vmem:[%s18615_s17 + $0x100] ss:$8 sps:$4 sm:$0xff]  }
 0x997   : > { %12796 = vmatpush3.bf16.msra.mxu1 %v14570_v41  ;;  %v14530_v41 = vld [vmem:[%s18615_s17 + $0x154] ss:$8 sps:$4 sm:$0xff]  }
 0x998   : > { %10490 = vmatpush1.bf16.msra.mxu0 %v14504_v18  ;;  %12797 = vmatprep.subr.bf16.mxu1 %v14571_v61  ;;  %v14528_v61 = vld [vmem:[%s18615_s17 + $0x150] ss:$8 sps:$4 sm:$0xff]  }
 0x999   : > { %10491 = vmatprep.subr.bf16.mxu0 %v14509_v19  ;;  %v14518_v19 = vld [vmem:[%s18615_s17 + $0x114] ss:$8 sps:$4 sm:$0xff]  }
 0x99b   : > { %12798 = vmatpush3.bf16.msra.mxu1 %v14572_v23  ;;  %v14533_v23 = vld [vmem:[%s18615_s17 + $0x164] ss:$8 sps:$4 sm:$0xff]  }
 0x99c   : > { %10492 = vmatpush1.bf16.msra.mxu0 %v14507_v20  ;;  %12799 = vmatprep.subr.bf16.mxu1 %v14573_v62  ;;  %v14516_v20 = vld [vmem:[%s18615_s17 + $0x110] ss:$8 sps:$4 sm:$0xff]   ;;  %v14531_v62 = vld [vmem:[%s18615_s17 + $0x160] ss:$8 sps:$4 sm:$0xff]  }
 0x99d   : > { %10493 = vmatprep.subr.bf16.mxu0 %v14512_v22  ;;  %v14521_v22 = vld [vmem:[%s18615_s17 + $0x124] ss:$8 sps:$4 sm:$0xff]  }
 0x9a0   : > { %10494 = vmatpush1.bf16.msra.mxu0 %v14510_v26  ;;  %v14519_v26 = vld [vmem:[%s18615_s17 + $0x120] ss:$8 sps:$4 sm:$0xff]  }
 0x9a1   : > { %10504 = vmatprep.subr.bf16.mxu0 %v14515_v27  ;;  %v14524_v27 = vld [vmem:[%s18615_s17 + $0x134] ss:$8 sps:$4 sm:$0xff]  }
 0xa15   : > { %v9609_v31 = vpop.f32.mrb[64].mxu0 }
 0xa16   : > { %v9611_v42 = vpop.f32.mrb[65].mxu0 }
 0xa17   : > { %v9613_v43 = vpop.f32.mrb[66].mxu0 }
 0xa18   : > { %v9614_v52 = vpop.f32.mrb[67].mxu0 }
 0xa19   : > { %v9444_v1 = vpop.f32.mrb[72].mxu1  ;;  %v10050_v52 = vrot.slane %v18431_v24, %v15431_v56  ;;  %v14537_v56 = vld [vmem:[%s18615_s17 + $0x180] ss:$8 sps:$4 sm:$0xff]  }
 0xa1a   : > { %v9610_v34 = vadd.f32 %v9609_v31, %v9444_v1  ;;  %v9446_v49 = vpop.f32.mrb[73].mxu1  ;;  %v14536_v31 = vld [vmem:[%s18615_s17 + $0x174] ss:$8 sps:$4 sm:$0xff]   ;;  %v14534_v1 = vld [vmem:[%s18615_s17 + $0x170] ss:$8 sps:$4 sm:$0xff]  }
 0xa1b   : > { %v9612_v25 = vadd.f32 %v9611_v42, %v9446_v49  ;;  %v9448_v3 = vpop.f32.mrb[74].mxu1  ;;  %v10046_v42 = vrot.slane %v18431_v24, %v15427_v54  ;;  %v14551_v24 = vld [vmem:[%s18615_s17 + $0x1c4] ss:$8 sps:$4 sm:$0xff]  }
 0xa1c   : > { %v9449_v44 = vpop.f32.mrb[75].mxu1 }
 0xa25   : > { %v9793_v51 = vpop.f32.mrb[68].mxu0 }
 0xa26   : > { %v9841_v46 = vadd.f32 %v9793_v51, %v9610_v34  ;;  %v9795_v4 = vpop.f32.mrb[69].mxu0 }
 0xa27   : > { %v9842_v5 = vadd.f32 %v9795_v4, %v9612_v25  ;;  %v9797_v6 = vpop.f32.mrb[70].mxu0  ;;  %v14539_v25 = vld [vmem:[%s18615_s17 + $0x184] ss:$8 sps:$4 sm:$0xff]   ;;  %v14542_v4 = vld [vmem:[%s18615_s17 + $0x194] ss:$8 sps:$4 sm:$0xff]  }
 0xa28   : > { %v9798_v8 = vpop.f32.mrb[71].mxu0 }
 0xa29   : > { %v9485_v53 = vpop.f32.mrb[76].mxu1  ;;  %v14540_v8 = vld [vmem:[%s18615_s17 + $0x190] ss:$8 sps:$4 sm:$0xff]  }
 0xa2a   : > { %v9487_v45 = vpop.f32.mrb[77].mxu1 }
 0xa2b   : > { %v9489_v60 = vpop.f32.mrb[78].mxu1 }
 0xa2c   : > { %v9490_v9 = vpop.f32.mrb[79].mxu1  ;;  %v14548_v60 = vld [vmem:[%s18615_s17 + $0x1b4] ss:$8 sps:$4 sm:$0xff]  }
 0xa2d   : > { %v14546_v9 = vld [vmem:[%s18615_s17 + $0x1b0] ss:$8 sps:$4 sm:$0xff]  }
 0xa35   : > { %v9981_v10 = vpop.f32.mrb[72].mxu0 }
 0xa36   : > { %v10029_v59 = vadd.f32 %v9981_v10, %v9841_v46  ;;  %v9983_v2 = vpop.f32.mrb[73].mxu0  ;;  %v14554_v10 = vld [vmem:[%s18615_s17 + $0x1d4] ss:$8 sps:$4 sm:$0xff]  }
 0xa37   : > { %v10030_v12 = vadd.f32 %v9983_v2, %v9842_v5  ;;  %v9985_v48 = vpop.f32.mrb[74].mxu0  ;;  %v14555_v2 = vld [vmem:[%s18615_s17 + $0x1e0] ss:$8 sps:$4 sm:$0xff]  }
 0xa38   : > { %v10055_v13 = vadd.f32 %v10038_v47, %v10029_v59  ;;  %v9986_v50 = vpop.f32.mrb[75].mxu0  ;;  %v14549_v47 = vld [vmem:[%s18615_s17 + $0x1c0] ss:$8 sps:$4 sm:$0xff]   ;;  %v14557_v59 = vld [vmem:[%s18615_s17 + $0x1e4] ss:$8 sps:$4 sm:$0xff]  }
 0xa39   : > { %v10056_v14 = vadd.f32 %v10042_v11, %v10030_v12  ;;  %v9650_v15 = vpop.f32.mrb[80].mxu1  ;;  %v14552_v11 = vld [vmem:[%s18615_s17 + $0x1d0] ss:$8 sps:$4 sm:$0xff]   ;;  %v14560_v12 = vld [vmem:[%s18615_s17 + $0x1f4] ss:$8 sps:$4 sm:$0xff]  }
 0xa3a   : > { %v10059_v33 = vmax.f32 %v10055_v13, 0.0  ;;  %v9651_v21 = vadd.f32 %v9650_v15, %v9485_v53  ;;  %v9652_v16 = vpop.f32.mrb[81].mxu1  ;;  %v14545_v53 = vld [vmem:[%s18615_s17 + $0x1a4] ss:$8 sps:$4 sm:$0xff]   ;;  %v14558_v48 = vld [vmem:[%s18615_s17 + $0x1f0] ss:$8 sps:$4 sm:$0xff]  }
 0xa3b   : > { %v10060_v57 = vmax.f32 %v10056_v14, 0.0  ;;  %v9653_v58 = vadd.f32 %v9652_v16, %v9487_v45  ;;  %v9654_v63 = vpop.f32.mrb[82].mxu1  ;;  %v14543_v45 = vld [vmem:[%s18615_s17 + $0x1a0] ss:$8 sps:$4 sm:$0xff]   ;;  %v14574_v14 = vld [vmem:[%s18617_s19 + $0x30] sm:$0xff]   ;;  %v14575_v15 = vld [vmem:[%s18617_s19 + $0x78] sm:$0xff]  }
 0xa3c   : > { %v9655_v36 = vpop.f32.mrb[83].mxu1  ;;  %v10127_v18 = vpack.c.bf16 %v10059_v33, %v10059_v33  ;;  %12800 = vmatpush3.bf16.msra.mxu1 %v14574_v14  ;;  %v14576_v33 = vld [vmem:[%s18617_s19 + $0x38] sm:$0xff]  }
 0xa3d   : > { %v10128_v0 = vpack.c.bf16 %v10060_v57, %v10060_v57  ;;  %12801 = vmatprep.subr.bf16.mxu1 %v14575_v15 }
 0xa3f   : > { %10495 = vmatprep.mubr.bf16.mxu0 %v10128_v0 }
 0xa40   : > { %10496 = vmatmul.mubr.bf16.vlgmr.msra.gmra.mrb[76].mxu0 %v10127_v18  ;;  %12802 = vmatpush3.bf16.msra.mxu1 %v14576_v33 }
 0xa41   : > { %10505 = vmatpush1.bf16.msra.mxu0 %v14513_v17 }
 0xa42   : > { %10506 = vmatprep.subr.bf16.mxu0 %v14518_v19 }
 0xa45   : > { %10507 = vmatpush1.bf16.msra.mxu0 %v14516_v20 }
 0xa46   : > { %10508 = vmatprep.subr.bf16.mxu0 %v14521_v22 }
 0xa49   : > { %10509 = vmatpush1.bf16.msra.mxu0 %v14519_v26  ;;  %v9834_v28 = vpop.f32.mrb[84].mxu1 }
 0xa4a   : > { %v9843_v30 = vadd.f32 %v9834_v28, %v9651_v21  ;;  %v9836_v32 = vpop.f32.mrb[85].mxu1  ;;  %10510 = vmatprep.subr.bf16.mxu0 %v14524_v27  ;;  %v10131_v21 = vld [vmem:[%s18616_s18] sm:$0x3] }
 0xa4b   : > { %v9844_v37 = vadd.f32 %v9836_v32, %v9653_v58  ;;  %v9838_v38 = vpop.f32.mrb[86].mxu1  ;;  %v10456_v16 = vrot.slane %v10131_v21, %v15425_v7  ;;  %v10460_v57 = vrot.slane %v10131_v21, %v15429_v55  ;;  %v10579_v7 = vld [vmem:[%s18618_s20] sm:$0x1] }
 0xa4c   : > { %v9839_v39 = vpop.f32.mrb[87].mxu1 }
 0xa4d   : > { %10511 = vmatpush1.bf16.msra.mxu0 %v14522_v29 }
 0xa4e   : > { %10512 = vmatprep.subr.bf16.mxu0 %v14527_v35 }
 0xa51   : > { %10513 = vmatpush1.bf16.msra.mxu0 %v14525_v40 }
 0xa52   : > { %10514 = vmatprep.subr.bf16.mxu0 %v14530_v41 }
 0xa55   : > { %10515 = vmatpush1.bf16.msra.mxu0 %v14528_v61 }
 0xa56   : > { %10516 = vmatprep.subr.bf16.mxu0 %v14533_v23 }
 0xa59   : > { %10517 = vmatpush1.bf16.msra.mxu0 %v14531_v62  ;;  %v10022_v43 = vpop.f32.mrb[88].mxu1 }
 0xa5a   : > { %v10031_v34 = vadd.f32 %v10022_v43, %v9843_v30  ;;  %v10024_v49 = vpop.f32.mrb[89].mxu1  ;;  %10518 = vmatprep.subr.bf16.mxu0 %v14536_v31 }
 0xa5b   : > { %v10032_v3 = vadd.f32 %v10024_v49, %v9844_v37  ;;  %v10026_v44 = vpop.f32.mrb[90].mxu1 }
 0xa5c   : > { %v10057_v51 = vadd.f32 %v10046_v42, %v10031_v34  ;;  %v10027_v54 = vpop.f32.mrb[91].mxu1 }
 0xa5d   : > { %v10058_v46 = vadd.f32 %v10050_v52, %v10032_v3  ;;  %10519 = vmatpush1.bf16.msra.mxu0 %v14534_v1 }
 0xa5e   : > { %10520 = vmatprep.subr.bf16.mxu0 %v14539_v25  ;;  %v10061_v13 = vmax.f32 %v10057_v51, 0.0 }
 0xa5f   : > { %v10062_v5 = vmax.f32 %v10058_v46, 0.0 }
 0xa60   : > { %v10129_v50 = vpack.c.bf16 %v10061_v13, %v10061_v13 }
 0xa61   : > { %v10130_v6 = vpack.c.bf16 %v10062_v5, %v10062_v5  ;;  %10521 = vmatpush1.bf16.msra.mxu0 %v14537_v56 }
 0xa62   : > { %10522 = vmatprep.subr.bf16.mxu0 %v14542_v4 }
 0xa63   : > { %10536 = vmatprep.mubr.bf16.mxu0 %v10130_v6 }
 0xa65   : > { %10523 = vmatpush1.bf16.msra.mxu0 %v14540_v8 }
 0xa66   : > { %10524 = vmatprep.subr.bf16.mxu0 %v14545_v53 }
 0xa69   : > { %10525 = vmatpush1.bf16.msra.mxu0 %v14543_v45 }
 0xa6a   : > { %10526 = vmatprep.subr.bf16.mxu0 %v14548_v60 }
 0xa6d   : > { %10527 = vmatpush1.bf16.msra.mxu0 %v14546_v9 }
 0xa6e   : > { %10528 = vmatprep.subr.bf16.mxu0 %v14551_v24 }
 0xa71   : > { %10529 = vmatpush1.bf16.msra.mxu0 %v14549_v47 }
 0xa72   : > { %10530 = vmatprep.subr.bf16.mxu0 %v14554_v10 }
 0xa75   : > { %10531 = vmatpush1.bf16.msra.mxu0 %v14552_v11 }
 0xa76   : > { %10532 = vmatprep.subr.bf16.mxu0 %v14557_v59 }
 0xa79   : > { %10533 = vmatpush1.bf16.msra.mxu0 %v14555_v2 }
 0xa7a   : > { %10534 = vmatprep.subr.bf16.mxu0 %v14560_v12 }
 0xa7d   : > { %10535 = vmatpush1.bf16.msra.mxu0 %v14558_v48 }
 0xa80   : > { %10537 = vmatmul.mubr.bf16.vlgmr.msra.gmra.mrb[76].mxu0 %v10129_v50 }
 0xb53   : > { %v10538_v58 = vpop.f32.mrb[76].mxu0 }
 0xb54   : > { %v12809_v63 = vadd.f32 %v10538_v58, %v10456_v16  ;;  %v10540_v36 = vpop.f32.mrb[77].mxu0 }
 0xb55   : > { %v12810_v0 = vadd.f32 %v10540_v36, %v10460_v57  ;;  %v10542_v17 = vpop.f32.mrb[78].mxu0 }
 0xb56   : > { %v10543_v18 = vpop.f32.mrb[79].mxu0  ;;  %v10577_v20 = vpack.c.bf16 %v12809_v63, %v12809_v63 }
 0xb57   : > { %v10578_v19 = vpack.c.bf16 %v12810_v0, %v12810_v0 }
 0xb59   : > { %10708 = vmatprep.mubr.bf16.mxu1 %v10578_v19 }
 0xb5a   : > { %10709 = vmatmul.mubr.bf16.vlgmr.msra.gmra.mrb[92].mxu1 %v10577_v20 }
 0xc2d   : > { %v12803_v22 = vpop.f32.mrb[92].mxu1 }
 0xc2e   : > { %v12804_v26 = vpop.f32.mrb[93].mxu1 }
 0xc2f   : > { %v12805_v55 = vadd.f32 %v12804_v26, %v12803_v22  ;;  %v12806_v27 = vpop.f32.mrb[94].mxu1 }
 0xc30   : > { %v12807_v28 = vpop.f32.mrb[95].mxu1 }
 0xc31   : > { %v10711_v29 = vadd.f32 %v12805_v55, %v10579_v7 }
 0xc33   : > { %10716 = vst [vmem:[%s648_s28] sm:$0x1] %v10711_v29 }
 0xc34   : > { %14590 = shalt.err (!%p14587_p3)
}
 0xc35   : > { %s14591_s26 = scalar_lea.hbm %s18556_s22, 16  ;;  %s14595_s2 = scalar_lea.hbm %s18655_s30, 32 }
 0xc36   : > { %p14592_p4 = scmp.ne.s32.totalorder %s18556_s22, %s14591_s26  ;;  %p14596_p9 = scmp.lt.u32.totalorder %s18556_s22, %s18655_s30 }
 0xc37   : > { %p14597_p10 = scmp.lt.u32.totalorder %s14595_s2, %s14591_s26  ;;  %p14599_p12 = scmp.lt.u32.totalorder %s14591_s26, %s18556_s22 }
 0xc38   : > { %p14593_p7 = pnand %p14592_p4, %p14792_p5 }
 0xc39   : > { %p14598_p11 = por %p14597_p10, %p14596_p9 }
 0xc3a   : > { %p14594_p8 = pneg %p14593_p7 }
 0xc3b   : > { %p14600_p13 = por %p14599_p12, %p14598_p11 }
 0xc3d   : > { %p14601_p0 = pnand %p14600_p13, %p14594_p8 }
 0xc3f   : > { %14604 = shalt.err (!%p14601_p0)
}
 0xc40   : > { %12920 = dma.vmem_to_hbm [thread:$0]  (%p14792_p5), %s18558_s0, 16, %s18556_s22, %s10718_s27  }
 0xc41 PF: > { %s18656_s4 = sld [smem:[#allocation7_spill]]  ;;  %s18657_s5 = sld [smem:[#allocation5_spill]] }
 0xc47   : > { %p12926_p1 = scmp.ge.s32.totalorder %s18656_s4, 2  ;;  %s10742_s1 = sand.u32 1, %s18657_s5  }
 0xc48   : > { %s10743_s28 = scalar_lea.sflag [#allocation3], %s10742_s1 }
 0xc49   : > { %p12923_p2 = pnand %p12926_p1, %p14796_p6 }
 0xc4b   : > { %14622 = dma.done.wait (!%p12923_p2), %s10743_s28, 16  }
 0xc4c   : > { %14624 = vsyncadd (!%p12923_p2), %s10743_s28, 4294967280  ;;  %s18659_s27 = sld [smem:[#allocation8_spill]]  ;;  %s18660_s26 = sld [smem:[#allocation6_spill]] }
 0xc4d   : > { %s18661_s29 = sld [smem:[#allocation9_spill]]  ;;  %s18662_s2 = smov %s14631_s25 }
 0xc52   : > { %p31_p3 = scmp.ge.s32.totalorder %s18659_s27, 4   ;;  %s18663_s25 = smov %s18660_s26 }
 0xc53   : > { %s18664_s26 = smov %s18661_s29 }
 0xc54   :  { %33 = sbr.rel (!%p31_p3) target bundleno = 11 (0xb), region = 154 }
 0xc5b   :  { %10747 = vsyncpa [#allocation3], 1 }
 0xc5c   :  { %10749 = vsyncpa [#allocation3 + $0x1], 1 }

</bundles_post_ra>
